<compile_context>
chip_gen: v7x
topology: tpu7x:2x2x1
jax: 0.10.0
libtpu: 0.0.40
codegen_flags: <defaults>
</compile_context>

<pallas_src>
import jax
import jax.numpy as jnp
import numpy as np
from jax.experimental import pallas as pl
from jax.experimental.pallas import tpu as pltpu

EPS = 1e-5


def _round_up(x, m):
    return (x + m - 1) // m * m


def _vmem_limit_bytes():
    """Generation-aware VMEM cap (v5e/v6e: 128 MiB physical, v7x: 64 MiB)."""
    try:
        cap = getattr(pltpu.get_tpu_info(), "vmem_capacity_bytes", None)
        if cap:
            return int(min(cap * 3 // 4, 96 * 1024 * 1024))
    except Exception:
        pass
    return None  # fall back to the compiler default


def _compiler_params():
    return pltpu.CompilerParams(
        dimension_semantics=("parallel",),
        vmem_limit_bytes=_vmem_limit_bytes(),
    )


def _make_conv_kernel(P_pad, Wq, lead, C, fuse):
    """Kernel factory: optional (folded-BN affine + ReLU) -> conv3x3 -> stats.

    Activations use the flat padded-plane layout: plane[(h+1)*Wq + w, c].
    Tap (kh, kw) is the plane shifted by s = (kh-1)*Wq + (kw-1) flat rows;
    the zero pad row/column absorbs all out-of-image neighbours.
    """
    shifts = [(kh - 1) * Wq + (kw - 1) for kh in range(3) for kw in range(3)]

    def body(plane, w_ref, m_ref, o_ref, st_ref):
        # plane: [P_pad, C] f32 with pad/halo positions already zero.
        zpad = jnp.zeros((lead, C), jnp.float32)
        # One 8-aligned sublane concat (lead and P_pad are multiples of 8);
        # single cast to bf16 for the MXU (elementwise work stays f32).
        xext = jnp.concatenate([zpad, plane, zpad], axis=0).astype(jnp.bfloat16)
        acc = None
        for t, s in enumerate(shifts):
            tap = xext[lead + s:lead + s + P_pad]          # sublane-shift view
            d = jnp.dot(tap, w_ref[t], preferred_element_type=jnp.float32)
            acc = d if acc is None else acc + d
        y = acc * m_ref[...]                  # zero conv garbage at pad rows
        o_ref[...] = y.astype(o_ref.dtype)[None]
        # lane-dense per-image BN partials: [sum | sumsq] -> (1, 1, 2*C)
        s_ = jnp.sum(y, axis=0, keepdims=True)
        ss = jnp.sum(y * y, axis=0, keepdims=True)
        st_ref[...] = jnp.concatenate([s_, ss], axis=-1)[None]

    if fuse:
        def kernel(x_ref, w_ref, m_ref, sc_ref, sh_ref, o_ref, st_ref):
            plane = x_ref[0].astype(jnp.float32)
            # previous BN folded into per-channel scale/shift, fused with ReLU
            plane = jnp.maximum(plane * sc_ref[...] + sh_ref[...], 0.0)
            plane = plane * m_ref[...]        # re-zero the halo after affine
            body(plane, w_ref, m_ref, o_ref, st_ref)
    else:
        def kernel(x_ref, w_ref, m_ref, o_ref, st_ref):
            # wrapper guarantees zero halo in the raw input plane
            body(x_ref[0].astype(jnp.float32), w_ref, m_ref, o_ref, st_ref)
    return kernel


def _conv3x3_bn_stats(x_pl, w, mask, C, Wq, lead, scale=None, shift=None):
    """Grid-tiled pallas_call: (opt. affine+ReLU) -> conv3x3 -> BN partials."""
    N, P_pad, _ = x_pl.shape
    fuse = scale is not None

    act_spec = pl.BlockSpec((1, P_pad, C), lambda n: (n, 0, 0))
    w_spec = pl.BlockSpec((9, C, C), lambda n: (0, 0, 0))     # VMEM resident
    m_spec = pl.BlockSpec((P_pad, 1), lambda n: (0, 0))       # VMEM resident
    v_spec = pl.BlockSpec((1, C), lambda n: (0, 0))           # VMEM resident
    st_spec = pl.BlockSpec((1, 1, 2 * C), lambda n: (n, 0, 0))

    in_specs = [act_spec, w_spec, m_spec] + ([v_spec, v_spec] if fuse else [])
    args = (x_pl, w, mask) + ((scale, shift) if fuse else ())

    return pl.pallas_call(
        _make_conv_kernel(P_pad, Wq, lead, C, fuse),
        grid=(N,),
        in_specs=in_specs,
        out_specs=[act_spec, st_spec],
        out_shape=[jax.ShapeDtypeStruct((N, P_pad, C), jnp.bfloat16),
                   jax.ShapeDtypeStruct((N, 1, 2 * C), jnp.float32)],
        compiler_params=_compiler_params(),
    )(*args)


def _residual_kernel(z_ref, x_ref, sc_ref, sh_ref, o_ref):
    # bn2 affine + identity add + ReLU in one elementwise pass (f32)
    z = z_ref[0].astype(jnp.float32)
    o_ref[...] = jnp.maximum(z * sc_ref[...] + sh_ref[...] + x_ref[0], 0.0)[None]


def _affine_residual_relu(z_pl, x_pl, scale, shift):
    N, P_pad, C = x_pl.shape
    act_spec = pl.BlockSpec((1, P_pad, C), lambda n: (n, 0, 0))
    vec_spec = pl.BlockSpec((1, C), lambda n: (0, 0))
    return pl.pallas_call(
        _residual_kernel,
        grid=(N,),
        in_specs=[act_spec, act_spec, vec_spec, vec_spec],
        out_specs=act_spec,
        out_shape=jax.ShapeDtypeStruct((N, P_pad, C), jnp.float32),
        # reuse the (dead) padded-identity buffer for the output
        input_output_aliases={1: 0},
        compiler_params=_compiler_params(),
    )(z_pl, x_pl, scale, shift)


def _bn_scale_shift(stats, gamma, beta, count_per_image):
    """Combine per-image (sum, sumsq) partials into training-mode BN
    scale/shift.  Uses Chan's parallel-variance combine (per-image M2, then
    recombine) to limit f32 cancellation; O(C) JAX glue between pallas_calls.
    """
    n = stats.shape[0]
    c = gamma.shape[0]
    st = stats.reshape(n, 2 * c)
    s, ss = st[:, :c], st[:, c:]
    cnt = jnp.float32(count_per_image)
    total_cnt = cnt * n
    mean_b = s / cnt
    m2_b = ss - cnt * mean_b * mean_b
    mean = jnp.sum(s, axis=0) / total_cnt
    m2 = jnp.sum(m2_b, axis=0) + cnt * jnp.sum((mean_b - mean) ** 2, axis=0)
    var = m2 / total_cnt                       # biased var (training-mode BN)
    scale = gamma * jax.lax.rsqrt(var + EPS)
    shift = beta - mean * scale
    return scale.reshape(1, c), shift.reshape(1, c)


@jax.jit
def basic_block(x, w1, w2, g1, b1, g2, b2):
    """x: [N, H, W, C] f32 (NHWC); w*: [9, Cin, Cout] (3x3 taps, kh*3+kw);
    g*/b*: [C].  stride=1, downsample=None, Cin == Cout."""
    N, H, W, C = x.shape
    assert w1.shape == (9, C, C) and w2.shape == (9, C, C), (
        "BasicBlock kernel assumes stride=1, downsample=None, Cin == Cout")

    Hq, Wq = H + 2, W + 1                 # padded plane: zero row top/bottom,
    P = Hq * Wq                           # one trailing zero column per row
    P_pad = _round_up(P, 8)
    lead = _round_up(Wq + 1, 8)           # halo rows for the in-kernel taps
    count_per_image = H * W

    # channel-minor padded-plane layout: plane[(h+1)*Wq + w, c] = x[h, w, c]
    xq = jnp.pad(x, ((0, 0), (1, 1), (0, 1), (0, 0)))
    x_pl = jnp.pad(xq.reshape(N, P, C), ((0, 0), (0, P_pad - P), (0, 0)))

    # validity mask over flat plane positions (1.0 = real pixel) -- a small
    # VMEM-resident constant, avoids in-kernel integer div/mod.
    idx = np.arange(P_pad)
    valid = (idx // Wq >= 1) & (idx // Wq <= H) & (idx % Wq < W)
    mask = jnp.asarray(valid.astype(np.float32).reshape(P_pad, 1))

    w1b = w1.astype(jnp.bfloat16)
    w2b = w2.astype(jnp.bfloat16)

    # conv1 (+ per-image BN1 partials)
    y1, st1 = _conv3x3_bn_stats(x_pl, w1b, mask, C, Wq, lead)
    sc1, sh1 = _bn_scale_shift(st1, g1, b1, count_per_image)

    # bn1-affine + ReLU fused into conv2's kernel; conv2 (+ BN2 partials)
    y2, st2 = _conv3x3_bn_stats(y1, w2b, mask, C, Wq, lead, sc1, sh1)
    sc2, sh2 = _bn_scale_shift(st2, g2, b2, count_per_image)

    # bn2-affine + residual add + ReLU
    out_pl = _affine_residual_relu(y2, x_pl, sc2, sh2)
    return out_pl[:, :P, :].reshape(N, Hq, Wq, C)[:, 1:H + 1, :W, :]


def _reference(x, w1, w2, g1, b1, g2, b2):
    """Pure-JAX f32 reference (same math, training-mode BN)."""
    def conv(inp, w_flat):
        w = w_flat.reshape(3, 3, w_flat.shape[1], w_flat.shape[2])  # HWIO
        return jax.lax.conv_general_dilated(
            inp, w, window_strides=(1, 1), padding=((1, 1), (1, 1)),
            dimension_numbers=("NHWC", "HWIO", "NHWC"))

    def bn(y, g, b):
        mean = jnp.mean(y, axis=(0, 1, 2), keepdims=True)
        var = jnp.mean((y - mean) ** 2, axis=(0, 1, 2), keepdims=True)
        return (y - mean) * jax.lax.rsqrt(var + EPS) * g.reshape(1, 1, 1, -1) \
            + b.reshape(1, 1, 1, -1)

    out = jnp.maximum(bn(conv(x, w1), g1, b1), 0.0)
    out = bn(conv(out, w2), g2, b2)
    return jnp.maximum(out + x, 0.0)


if __name__ == "__main__":
    # NOTE: demo shapes (W*C = 64 lanes) are unrepresentative of production
    # ResNet stages (56x56x64); they only validate correctness.
    N, H, W, C = 2, 16, 16, 4
    key = jax.random.PRNGKey(0)
    kx, k1, k2 = jax.random.split(key, 3)

    x = jax.random.normal(kx, (N, H, W, C), dtype=jnp.float32)
    w1 = jax.random.normal(k1, (9, C, C), dtype=jnp.float32) * 0.1
    w2 = jax.random.normal(k2, (9, C, C), dtype=jnp.float32) * 0.1
    # BatchNorm2d default init: weight (gamma) = 1, bias (beta) = 0
    g1 = jnp.ones((C,), jnp.float32)
    b1 = jnp.zeros((C,), jnp.float32)
    g2 = jnp.ones((C,), jnp.float32)
    b2 = jnp.zeros((C,), jnp.float32)

    out = jax.block_until_ready(basic_block(x, w1, w2, g1, b1, g2, b2))
    ref = jax.block_until_ready(_reference(x, w1, w2, g1, b1, g2, b2))

    assert out.shape == (N, H, W, C)
    # bf16 MXU operands + bf16 inter-stage activations => relaxed tolerance
    # vs the f32 reference (expected quantization error, per review).
    max_err = float(jnp.max(jnp.abs(out - ref)))
    mean_err = float(jnp.mean(jnp.abs(out - ref)))
    assert max_err < 1e-1 and mean_err < 1e-2, (max_err, mean_err)
    print("KERNEL_OK")
</pallas_src>

<mosaic_0001>
module attributes {stable_mosaic.version = 11 : i64} {
  func.func @kernel(%arg0: i32, %arg1: memref<1x312x4xf32, #tpu.memory_space<vmem>>, %arg2: memref<9x4x4xbf16, #tpu.memory_space<vmem>>, %arg3: memref<312x1xf32, #tpu.memory_space<vmem>>, %arg4: memref<1x312x4xbf16, #tpu.memory_space<vmem>>, %arg5: memref<1x1x8xf32, #tpu.memory_space<vmem>>) attributes {dimension_semantics = [#tpu.dimension_semantics<parallel>], iteration_bounds = array<i64: 2>, scalar_prefetch = 0 : i64, scratch_operands = 0 : i64, tpu.core_type = #tpu.core_type<tc>, window_params = [{transform_indices = @transform_0, window_bounds = array<i64: 1, 312, 4>}, {pipeline_mode = #tpu.pipeline_mode<synchronous>, transform_indices = @transform_1, window_bounds = array<i64: 9, 4, 4>}, {pipeline_mode = #tpu.pipeline_mode<synchronous>, transform_indices = @transform_2, window_bounds = array<i64: 312, 1>}, {transform_indices = @transform_3, window_bounds = array<i64: 1, 312, 4>}, {transform_indices = @transform_4, window_bounds = array<i64: 1, 1, 8>}]} {
    %c0 = arith.constant 0 : index
    %c0_0 = arith.constant 0 : index
    %c0_1 = arith.constant 0 : index
    %0 = vector.load %arg1[%c0, %c0_0, %c0_1] : memref<1x312x4xf32, #tpu.memory_space<vmem>>, vector<1x312x4xf32>
    %1 = vector.shape_cast %0 : vector<1x312x4xf32> to vector<312x4xf32>
    %cst = arith.constant 0.000000e+00 : f32
    %2 = vector.broadcast %cst : f32 to vector<24x4xf32>
    %3 = tpu.concatenate %2, %1, %2 in 0 : vector<24x4xf32>, vector<312x4xf32>, vector<24x4xf32> -> vector<360x4xf32>
    %4 = arith.truncf %3 : vector<360x4xf32> to vector<360x4xbf16>
    %5 = vector.extract_strided_slice %4 {offsets = [6, 0], sizes = [312, 4], strides = [1, 1]} : vector<360x4xbf16> to vector<312x4xbf16>
    %c0_2 = arith.constant 0 : index
    %c0_3 = arith.constant 0 : index
    %c0_4 = arith.constant 0 : index
    %6 = vector.load %arg2[%c0_2, %c0_3, %c0_4] : memref<9x4x4xbf16, #tpu.memory_space<vmem>>, vector<1x4x4xbf16>
    %7 = vector.shape_cast %6 : vector<1x4x4xbf16> to vector<4x4xbf16>
    %cst_5 = arith.constant dense<0.000000e+00> : vector<312x4xf32>
    %8 = tpu.matmul %5, %7, %cst_5 {dimension_numbers = #tpu.dot_dimension_numbers<[1], [0], [0], [1], [0, 0, 1, 1], [], []>} : vector<312x4xbf16>, vector<4x4xbf16>, vector<312x4xf32> -> vector<312x4xf32>
    %9 = vector.extract_strided_slice %4 {offsets = [7, 0], sizes = [312, 4], strides = [1, 1]} : vector<360x4xbf16> to vector<312x4xbf16>
    %c1 = arith.constant 1 : index
    %c0_6 = arith.constant 0 : index
    %c0_7 = arith.constant 0 : index
    %10 = vector.load %arg2[%c1, %c0_6, %c0_7] : memref<9x4x4xbf16, #tpu.memory_space<vmem>>, vector<1x4x4xbf16>
    %11 = vector.shape_cast %10 : vector<1x4x4xbf16> to vector<4x4xbf16>
    %cst_8 = arith.constant dense<0.000000e+00> : vector<312x4xf32>
    %12 = tpu.matmul %9, %11, %cst_8 {dimension_numbers = #tpu.dot_dimension_numbers<[1], [0], [0], [1], [0, 0, 1, 1], [], []>} : vector<312x4xbf16>, vector<4x4xbf16>, vector<312x4xf32> -> vector<312x4xf32>
    %13 = arith.addf %8, %12 : vector<312x4xf32>
    %14 = vector.extract_strided_slice %4 {offsets = [8, 0], sizes = [312, 4], strides = [1, 1]} : vector<360x4xbf16> to vector<312x4xbf16>
    %c2 = arith.constant 2 : index
    %c0_9 = arith.constant 0 : index
    %c0_10 = arith.constant 0 : index
    %15 = vector.load %arg2[%c2, %c0_9, %c0_10] : memref<9x4x4xbf16, #tpu.memory_space<vmem>>, vector<1x4x4xbf16>
    %16 = vector.shape_cast %15 : vector<1x4x4xbf16> to vector<4x4xbf16>
    %cst_11 = arith.constant dense<0.000000e+00> : vector<312x4xf32>
    %17 = tpu.matmul %14, %16, %cst_11 {dimension_numbers = #tpu.dot_dimension_numbers<[1], [0], [0], [1], [0, 0, 1, 1], [], []>} : vector<312x4xbf16>, vector<4x4xbf16>, vector<312x4xf32> -> vector<312x4xf32>
    %18 = arith.addf %13, %17 : vector<312x4xf32>
    %19 = vector.extract_strided_slice %4 {offsets = [23, 0], sizes = [312, 4], strides = [1, 1]} : vector<360x4xbf16> to vector<312x4xbf16>
    %c3 = arith.constant 3 : index
    %c0_12 = arith.constant 0 : index
    %c0_13 = arith.constant 0 : index
    %20 = vector.load %arg2[%c3, %c0_12, %c0_13] : memref<9x4x4xbf16, #tpu.memory_space<vmem>>, vector<1x4x4xbf16>
    %21 = vector.shape_cast %20 : vector<1x4x4xbf16> to vector<4x4xbf16>
    %cst_14 = arith.constant dense<0.000000e+00> : vector<312x4xf32>
    %22 = tpu.matmul %19, %21, %cst_14 {dimension_numbers = #tpu.dot_dimension_numbers<[1], [0], [0], [1], [0, 0, 1, 1], [], []>} : vector<312x4xbf16>, vector<4x4xbf16>, vector<312x4xf32> -> vector<312x4xf32>
    %23 = arith.addf %18, %22 : vector<312x4xf32>
    %24 = vector.extract_strided_slice %4 {offsets = [24, 0], sizes = [312, 4], strides = [1, 1]} : vector<360x4xbf16> to vector<312x4xbf16>
    %c4 = arith.constant 4 : index
    %c0_15 = arith.constant 0 : index
    %c0_16 = arith.constant 0 : index
    %25 = vector.load %arg2[%c4, %c0_15, %c0_16] : memref<9x4x4xbf16, #tpu.memory_space<vmem>>, vector<1x4x4xbf16>
    %26 = vector.shape_cast %25 : vector<1x4x4xbf16> to vector<4x4xbf16>
    %cst_17 = arith.constant dense<0.000000e+00> : vector<312x4xf32>
    %27 = tpu.matmul %24, %26, %cst_17 {dimension_numbers = #tpu.dot_dimension_numbers<[1], [0], [0], [1], [0, 0, 1, 1], [], []>} : vector<312x4xbf16>, vector<4x4xbf16>, vector<312x4xf32> -> vector<312x4xf32>
    %28 = arith.addf %23, %27 : vector<312x4xf32>
    %29 = vector.extract_strided_slice %4 {offsets = [25, 0], sizes = [312, 4], strides = [1, 1]} : vector<360x4xbf16> to vector<312x4xbf16>
    %c5 = arith.constant 5 : index
    %c0_18 = arith.constant 0 : index
    %c0_19 = arith.constant 0 : index
    %30 = vector.load %arg2[%c5, %c0_18, %c0_19] : memref<9x4x4xbf16, #tpu.memory_space<vmem>>, vector<1x4x4xbf16>
    %31 = vector.shape_cast %30 : vector<1x4x4xbf16> to vector<4x4xbf16>
    %cst_20 = arith.constant dense<0.000000e+00> : vector<312x4xf32>
    %32 = tpu.matmul %29, %31, %cst_20 {dimension_numbers = #tpu.dot_dimension_numbers<[1], [0], [0], [1], [0, 0, 1, 1], [], []>} : vector<312x4xbf16>, vector<4x4xbf16>, vector<312x4xf32> -> vector<312x4xf32>
    %33 = arith.addf %28, %32 : vector<312x4xf32>
    %34 = vector.extract_strided_slice %4 {offsets = [40, 0], sizes = [312, 4], strides = [1, 1]} : vector<360x4xbf16> to vector<312x4xbf16>
    %c6 = arith.constant 6 : index
    %c0_21 = arith.constant 0 : index
    %c0_22 = arith.constant 0 : index
    %35 = vector.load %arg2[%c6, %c0_21, %c0_22] : memref<9x4x4xbf16, #tpu.memory_space<vmem>>, vector<1x4x4xbf16>
    %36 = vector.shape_cast %35 : vector<1x4x4xbf16> to vector<4x4xbf16>
    %cst_23 = arith.constant dense<0.000000e+00> : vector<312x4xf32>
    %37 = tpu.matmul %34, %36, %cst_23 {dimension_numbers = #tpu.dot_dimension_numbers<[1], [0], [0], [1], [0, 0, 1, 1], [], []>} : vector<312x4xbf16>, vector<4x4xbf16>, vector<312x4xf32> -> vector<312x4xf32>
    %38 = arith.addf %33, %37 : vector<312x4xf32>
    %39 = vector.extract_strided_slice %4 {offsets = [41, 0], sizes = [312, 4], strides = [1, 1]} : vector<360x4xbf16> to vector<312x4xbf16>
    %c7 = arith.constant 7 : index
    %c0_24 = arith.constant 0 : index
    %c0_25 = arith.constant 0 : index
    %40 = vector.load %arg2[%c7, %c0_24, %c0_25] : memref<9x4x4xbf16, #tpu.memory_space<vmem>>, vector<1x4x4xbf16>
    %41 = vector.shape_cast %40 : vector<1x4x4xbf16> to vector<4x4xbf16>
    %cst_26 = arith.constant dense<0.000000e+00> : vector<312x4xf32>
    %42 = tpu.matmul %39, %41, %cst_26 {dimension_numbers = #tpu.dot_dimension_numbers<[1], [0], [0], [1], [0, 0, 1, 1], [], []>} : vector<312x4xbf16>, vector<4x4xbf16>, vector<312x4xf32> -> vector<312x4xf32>
    %43 = arith.addf %38, %42 : vector<312x4xf32>
    %44 = vector.extract_strided_slice %4 {offsets = [42, 0], sizes = [312, 4], strides = [1, 1]} : vector<360x4xbf16> to vector<312x4xbf16>
    %c8 = arith.constant 8 : index
    %c0_27 = arith.constant 0 : index
    %c0_28 = arith.constant 0 : index
    %45 = vector.load %arg2[%c8, %c0_27, %c0_28] : memref<9x4x4xbf16, #tpu.memory_space<vmem>>, vector<1x4x4xbf16>
    %46 = vector.shape_cast %45 : vector<1x4x4xbf16> to vector<4x4xbf16>
    %cst_29 = arith.constant dense<0.000000e+00> : vector<312x4xf32>
    %47 = tpu.matmul %44, %46, %cst_29 {dimension_numbers = #tpu.dot_dimension_numbers<[1], [0], [0], [1], [0, 0, 1, 1], [], []>} : vector<312x4xbf16>, vector<4x4xbf16>, vector<312x4xf32> -> vector<312x4xf32>
    %48 = arith.addf %43, %47 : vector<312x4xf32>
    %c0_30 = arith.constant 0 : index
    %c0_31 = arith.constant 0 : index
    %49 = vector.load %arg3[%c0_30, %c0_31] : memref<312x1xf32, #tpu.memory_space<vmem>>, vector<312x1xf32>
    %50 = vector.broadcast %49 : vector<312x1xf32> to vector<312x4xf32>
    %51 = arith.mulf %48, %50 : vector<312x4xf32>
    %52 = arith.truncf %51 : vector<312x4xf32> to vector<312x4xbf16>
    %53 = vector.shape_cast %52 : vector<312x4xbf16> to vector<1x312x4xbf16>
    %c0_32 = arith.constant 0 : index
    %c0_33 = arith.constant 0 : index
    %c0_34 = arith.constant 0 : index
    %54 = vector.load %arg4[%c0_32, %c0_33, %c0_34] : memref<1x312x4xbf16, #tpu.memory_space<vmem>>, vector<1x312x4xbf16>
    tpu.vector_store %arg4[%c0_32, %c0_33, %c0_34], %53 {strides = array<i32>} : memref<1x312x4xbf16, #tpu.memory_space<vmem>>, vector<1x312x4xbf16>,
    %cst_35 = arith.constant dense<0.000000e+00> : vector<4xf32>
    %55 = vector.multi_reduction <add>, %51, %cst_35 [0] : vector<312x4xf32> to vector<4xf32>
    %56 = vector.shape_cast %55 : vector<4xf32> to vector<1x4xf32>
    %57 = arith.mulf %51, %51 : vector<312x4xf32>
    %cst_36 = arith.constant dense<0.000000e+00> : vector<4xf32>
    %58 = vector.multi_reduction <add>, %57, %cst_36 [0] : vector<312x4xf32> to vector<4xf32>
    %59 = vector.shape_cast %58 : vector<4xf32> to vector<1x4xf32>
    %60 = tpu.concatenate %56, %59 in 1 : vector<1x4xf32>, vector<1x4xf32> -> vector<1x8xf32>
    %61 = vector.shape_cast %60 : vector<1x8xf32> to vector<1x1x8xf32>
    %c0_37 = arith.constant 0 : index
    %c0_38 = arith.constant 0 : index
    %c0_39 = arith.constant 0 : index
    %62 = vector.load %arg5[%c0_37, %c0_38, %c0_39] : memref<1x1x8xf32, #tpu.memory_space<vmem>>, vector<1x1x8xf32>
    tpu.vector_store %arg5[%c0_37, %c0_38, %c0_39], %61 {strides = array<i32>} : memref<1x1x8xf32, #tpu.memory_space<vmem>>, vector<1x1x8xf32>,
    return
  }
  func.func @transform_0(%arg0: i32) -> (i32, i32, i32) {
    %c0_i32 = arith.constant 0 : i32
    %c0_i32_0 = arith.constant 0 : i32
    %c0_i32_1 = arith.constant 0 : i32
    return %arg0, %c0_i32, %c0_i32_0 : i32, i32, i32
  }
  func.func @transform_1(%arg0: i32) -> (i32, i32, i32) {
    %c0_i32 = arith.constant 0 : i32
    %c0_i32_0 = arith.constant 0 : i32
    %c0_i32_1 = arith.constant 0 : i32
    %c0_i32_2 = arith.constant 0 : i32
    return %c0_i32, %c0_i32_0, %c0_i32_1 : i32, i32, i32
  }
  func.func @transform_2(%arg0: i32) -> (i32, i32) {
    %c0_i32 = arith.constant 0 : i32
    %c0_i32_0 = arith.constant 0 : i32
    %c0_i32_1 = arith.constant 0 : i32
    return %c0_i32, %c0_i32_0 : i32, i32
  }
  func.func @transform_3(%arg0: i32) -> (i32, i32, i32) {
    %c0_i32 = arith.constant 0 : i32
    %c0_i32_0 = arith.constant 0 : i32
    %c0_i32_1 = arith.constant 0 : i32
    return %arg0, %c0_i32, %c0_i32_0 : i32, i32, i32
  }
  func.func @transform_4(%arg0: i32) -> (i32, i32, i32) {
    %c0_i32 = arith.constant 0 : i32
    %c0_i32_0 = arith.constant 0 : i32
    %c0_i32_1 = arith.constant 0 : i32
    return %arg0, %c0_i32, %c0_i32_0 : i32, i32, i32
  }
}

module attributes {stable_mosaic.version = 11 : i64} {
  func.func @_residual_kernel(%arg0: i32, %arg1: memref<1x312x4xbf16, #tpu.memory_space<vmem>>, %arg2: memref<1x312x4xf32, #tpu.memory_space<vmem>>, %arg3: memref<1x4xf32, #tpu.memory_space<vmem>>, %arg4: memref<1x4xf32, #tpu.memory_space<vmem>>, %arg5: memref<1x312x4xf32, #tpu.memory_space<vmem>>) attributes {dimension_semantics = [#tpu.dimension_semantics<parallel>], iteration_bounds = array<i64: 2>, scalar_prefetch = 0 : i64, scratch_operands = 0 : i64, tpu.core_type = #tpu.core_type<tc>, window_params = [{transform_indices = @transform_0, window_bounds = array<i64: 1, 312, 4>}, {transform_indices = @transform_1, window_bounds = array<i64: 1, 312, 4>}, {pipeline_mode = #tpu.pipeline_mode<synchronous>, transform_indices = @transform_2, window_bounds = array<i64: 1, 4>}, {pipeline_mode = #tpu.pipeline_mode<synchronous>, transform_indices = @transform_3, window_bounds = array<i64: 1, 4>}, {transform_indices = @transform_4, window_bounds = array<i64: 1, 312, 4>}]} {
    %c0 = arith.constant 0 : index
    %c0_0 = arith.constant 0 : index
    %c0_1 = arith.constant 0 : index
    %0 = vector.load %arg1[%c0, %c0_0, %c0_1] : memref<1x312x4xbf16, #tpu.memory_space<vmem>>, vector<1x312x4xbf16>
    %1 = vector.shape_cast %0 : vector<1x312x4xbf16> to vector<312x4xbf16>
    %2 = arith.extf %1 : vector<312x4xbf16> to vector<312x4xf32>
    %c0_2 = arith.constant 0 : index
    %c0_3 = arith.constant 0 : index
    %3 = vector.load %arg3[%c0_2, %c0_3] : memref<1x4xf32, #tpu.memory_space<vmem>>, vector<1x4xf32>
    %4 = vector.broadcast %3 : vector<1x4xf32> to vector<312x4xf32>
    %5 = arith.mulf %2, %4 : vector<312x4xf32>
    %c0_4 = arith.constant 0 : index
    %c0_5 = arith.constant 0 : index
    %6 = vector.load %arg4[%c0_4, %c0_5] : memref<1x4xf32, #tpu.memory_space<vmem>>, vector<1x4xf32>
    %7 = vector.broadcast %6 : vector<1x4xf32> to vector<312x4xf32>
    %8 = arith.addf %5, %7 : vector<312x4xf32>
    %c0_6 = arith.constant 0 : index
    %c0_7 = arith.constant 0 : index
    %c0_8 = arith.constant 0 : index
    %9 = vector.load %arg2[%c0_6, %c0_7, %c0_8] : memref<1x312x4xf32, #tpu.memory_space<vmem>>, vector<1x312x4xf32>
    %10 = vector.shape_cast %9 : vector<1x312x4xf32> to vector<312x4xf32>
    %11 = arith.addf %8, %10 : vector<312x4xf32>
    %cst = arith.constant 0.000000e+00 : f32
    %12 = vector.broadcast %cst : f32 to vector<312x4xf32>
    %13 = arith.maximumf %11, %12 : vector<312x4xf32>
    %14 = vector.shape_cast %13 : vector<312x4xf32> to vector<1x312x4xf32>
    %c0_9 = arith.constant 0 : index
    %c0_10 = arith.constant 0 : index
    %c0_11 = arith.constant 0 : index
    %15 = vector.load %arg5[%c0_9, %c0_10, %c0_11] : memref<1x312x4xf32, #tpu.memory_space<vmem>>, vector<1x312x4xf32>
    tpu.vector_store %arg5[%c0_9, %c0_10, %c0_11], %14 {strides = array<i32>} : memref<1x312x4xf32, #tpu.memory_space<vmem>>, vector<1x312x4xf32>,
    return
  }
  func.func @transform_0(%arg0: i32) -> (i32, i32, i32) {
    %c0_i32 = arith.constant 0 : i32
    %c0_i32_0 = arith.constant 0 : i32
    %c0_i32_1 = arith.constant 0 : i32
    return %arg0, %c0_i32, %c0_i32_0 : i32, i32, i32
  }
  func.func @transform_1(%arg0: i32) -> (i32, i32, i32) {
    %c0_i32 = arith.constant 0 : i32
    %c0_i32_0 = arith.constant 0 : i32
    %c0_i32_1 = arith.constant 0 : i32
    return %arg0, %c0_i32, %c0_i32_0 : i32, i32, i32
  }
  func.func @transform_2(%arg0: i32) -> (i32, i32) {
    %c0_i32 = arith.constant 0 : i32
    %c0_i32_0 = arith.constant 0 : i32
    %c0_i32_1 = arith.constant 0 : i32
    return %c0_i32, %c0_i32_0 : i32, i32
  }
  func.func @transform_3(%arg0: i32) -> (i32, i32) {
    %c0_i32 = arith.constant 0 : i32
    %c0_i32_0 = arith.constant 0 : i32
    %c0_i32_1 = arith.constant 0 : i32
    return %c0_i32, %c0_i32_0 : i32, i32
  }
  func.func @transform_4(%arg0: i32) -> (i32, i32, i32) {
    %c0_i32 = arith.constant 0 : i32
    %c0_i32_0 = arith.constant 0 : i32
    %c0_i32_1 = arith.constant 0 : i32
    return %arg0, %c0_i32, %c0_i32_0 : i32, i32, i32
  }
}

module attributes {stable_mosaic.version = 11 : i64} {
  func.func @kernel(%arg0: i32, %arg1: memref<1x312x4xbf16, #tpu.memory_space<vmem>>, %arg2: memref<9x4x4xbf16, #tpu.memory_space<vmem>>, %arg3: memref<312x1xf32, #tpu.memory_space<vmem>>, %arg4: memref<1x4xf32, #tpu.memory_space<vmem>>, %arg5: memref<1x4xf32, #tpu.memory_space<vmem>>, %arg6: memref<1x312x4xbf16, #tpu.memory_space<vmem>>, %arg7: memref<1x1x8xf32, #tpu.memory_space<vmem>>) attributes {dimension_semantics = [#tpu.dimension_semantics<parallel>], iteration_bounds = array<i64: 2>, scalar_prefetch = 0 : i64, scratch_operands = 0 : i64, tpu.core_type = #tpu.core_type<tc>, window_params = [{transform_indices = @transform_0, window_bounds = array<i64: 1, 312, 4>}, {pipeline_mode = #tpu.pipeline_mode<synchronous>, transform_indices = @transform_1, window_bounds = array<i64: 9, 4, 4>}, {pipeline_mode = #tpu.pipeline_mode<synchronous>, transform_indices = @transform_2, window_bounds = array<i64: 312, 1>}, {pipeline_mode = #tpu.pipeline_mode<synchronous>, transform_indices = @transform_3, window_bounds = array<i64: 1, 4>}, {pipeline_mode = #tpu.pipeline_mode<synchronous>, transform_indices = @transform_4, window_bounds = array<i64: 1, 4>}, {transform_indices = @transform_5, window_bounds = array<i64: 1, 312, 4>}, {transform_indices = @transform_6, window_bounds = array<i64: 1, 1, 8>}]} {
    %c0 = arith.constant 0 : index
    %c0_0 = arith.constant 0 : index
    %c0_1 = arith.constant 0 : index
    %0 = vector.load %arg1[%c0, %c0_0, %c0_1] : memref<1x312x4xbf16, #tpu.memory_space<vmem>>, vector<1x312x4xbf16>
    %1 = vector.shape_cast %0 : vector<1x312x4xbf16> to vector<312x4xbf16>
    %2 = arith.extf %1 : vector<312x4xbf16> to vector<312x4xf32>
    %c0_2 = arith.constant 0 : index
    %c0_3 = arith.constant 0 : index
    %3 = vector.load %arg4[%c0_2, %c0_3] : memref<1x4xf32, #tpu.memory_space<vmem>>, vector<1x4xf32>
    %4 = vector.broadcast %3 : vector<1x4xf32> to vector<312x4xf32>
    %5 = arith.mulf %2, %4 : vector<312x4xf32>
    %c0_4 = arith.constant 0 : index
    %c0_5 = arith.constant 0 : index
    %6 = vector.load %arg5[%c0_4, %c0_5] : memref<1x4xf32, #tpu.memory_space<vmem>>, vector<1x4xf32>
    %7 = vector.broadcast %6 : vector<1x4xf32> to vector<312x4xf32>
    %8 = arith.addf %5, %7 : vector<312x4xf32>
    %cst = arith.constant 0.000000e+00 : f32
    %9 = vector.broadcast %cst : f32 to vector<312x4xf32>
    %10 = arith.maximumf %8, %9 : vector<312x4xf32>
    %c0_6 = arith.constant 0 : index
    %c0_7 = arith.constant 0 : index
    %11 = vector.load %arg3[%c0_6, %c0_7] : memref<312x1xf32, #tpu.memory_space<vmem>>, vector<312x1xf32>
    %12 = vector.broadcast %11 : vector<312x1xf32> to vector<312x4xf32>
    %13 = arith.mulf %10, %12 : vector<312x4xf32>
    %cst_8 = arith.constant 0.000000e+00 : f32
    %14 = vector.broadcast %cst_8 : f32 to vector<24x4xf32>
    %15 = tpu.concatenate %14, %13, %14 in 0 : vector<24x4xf32>, vector<312x4xf32>, vector<24x4xf32> -> vector<360x4xf32>
    %16 = arith.truncf %15 : vector<360x4xf32> to vector<360x4xbf16>
    %17 = vector.extract_strided_slice %16 {offsets = [6, 0], sizes = [312, 4], strides = [1, 1]} : vector<360x4xbf16> to vector<312x4xbf16>
    %c0_9 = arith.constant 0 : index
    %c0_10 = arith.constant 0 : index
    %c0_11 = arith.constant 0 : index
    %18 = vector.load %arg2[%c0_9, %c0_10, %c0_11] : memref<9x4x4xbf16, #tpu.memory_space<vmem>>, vector<1x4x4xbf16>
    %19 = vector.shape_cast %18 : vector<1x4x4xbf16> to vector<4x4xbf16>
    %cst_12 = arith.constant dense<0.000000e+00> : vector<312x4xf32>
    %20 = tpu.matmul %17, %19, %cst_12 {dimension_numbers = #tpu.dot_dimension_numbers<[1], [0], [0], [1], [0, 0, 1, 1], [], []>} : vector<312x4xbf16>, vector<4x4xbf16>, vector<312x4xf32> -> vector<312x4xf32>
    %21 = vector.extract_strided_slice %16 {offsets = [7, 0], sizes = [312, 4], strides = [1, 1]} : vector<360x4xbf16> to vector<312x4xbf16>
    %c1 = arith.constant 1 : index
    %c0_13 = arith.constant 0 : index
    %c0_14 = arith.constant 0 : index
    %22 = vector.load %arg2[%c1, %c0_13, %c0_14] : memref<9x4x4xbf16, #tpu.memory_space<vmem>>, vector<1x4x4xbf16>
    %23 = vector.shape_cast %22 : vector<1x4x4xbf16> to vector<4x4xbf16>
    %cst_15 = arith.constant dense<0.000000e+00> : vector<312x4xf32>
    %24 = tpu.matmul %21, %23, %cst_15 {dimension_numbers = #tpu.dot_dimension_numbers<[1], [0], [0], [1], [0, 0, 1, 1], [], []>} : vector<312x4xbf16>, vector<4x4xbf16>, vector<312x4xf32> -> vector<312x4xf32>
    %25 = arith.addf %20, %24 : vector<312x4xf32>
    %26 = vector.extract_strided_slice %16 {offsets = [8, 0], sizes = [312, 4], strides = [1, 1]} : vector<360x4xbf16> to vector<312x4xbf16>
    %c2 = arith.constant 2 : index
    %c0_16 = arith.constant 0 : index
    %c0_17 = arith.constant 0 : index
    %27 = vector.load %arg2[%c2, %c0_16, %c0_17] : memref<9x4x4xbf16, #tpu.memory_space<vmem>>, vector<1x4x4xbf16>
    %28 = vector.shape_cast %27 : vector<1x4x4xbf16> to vector<4x4xbf16>
    %cst_18 = arith.constant dense<0.000000e+00> : vector<312x4xf32>
    %29 = tpu.matmul %26, %28, %cst_18 {dimension_numbers = #tpu.dot_dimension_numbers<[1], [0], [0], [1], [0, 0, 1, 1], [], []>} : vector<312x4xbf16>, vector<4x4xbf16>, vector<312x4xf32> -> vector<312x4xf32>
    %30 = arith.addf %25, %29 : vector<312x4xf32>
    %31 = vector.extract_strided_slice %16 {offsets = [23, 0], sizes = [312, 4], strides = [1, 1]} : vector<360x4xbf16> to vector<312x4xbf16>
    %c3 = arith.constant 3 : index
    %c0_19 = arith.constant 0 : index
    %c0_20 = arith.constant 0 : index
    %32 = vector.load %arg2[%c3, %c0_19, %c0_20] : memref<9x4x4xbf16, #tpu.memory_space<vmem>>, vector<1x4x4xbf16>
    %33 = vector.shape_cast %32 : vector<1x4x4xbf16> to vector<4x4xbf16>
    %cst_21 = arith.constant dense<0.000000e+00> : vector<312x4xf32>
    %34 = tpu.matmul %31, %33, %cst_21 {dimension_numbers = #tpu.dot_dimension_numbers<[1], [0], [0], [1], [0, 0, 1, 1], [], []>} : vector<312x4xbf16>, vector<4x4xbf16>, vector<312x4xf32> -> vector<312x4xf32>
    %35 = arith.addf %30, %34 : vector<312x4xf32>
    %36 = vector.extract_strided_slice %16 {offsets = [24, 0], sizes = [312, 4], strides = [1, 1]} : vector<360x4xbf16> to vector<312x4xbf16>
    %c4 = arith.constant 4 : index
    %c0_22 = arith.constant 0 : index
    %c0_23 = arith.constant 0 : index
    %37 = vector.load %arg2[%c4, %c0_22, %c0_23] : memref<9x4x4xbf16, #tpu.memory_space<vmem>>, vector<1x4x4xbf16>
    %38 = vector.shape_cast %37 : vector<1x4x4xbf16> to vector<4x4xbf16>
    %cst_24 = arith.constant dense<0.000000e+00> : vector<312x4xf32>
    %39 = tpu.matmul %36, %38, %cst_24 {dimension_numbers = #tpu.dot_dimension_numbers<[1], [0], [0], [1], [0, 0, 1, 1], [], []>} : vector<312x4xbf16>, vector<4x4xbf16>, vector<312x4xf32> -> vector<312x4xf32>
    %40 = arith.addf %35, %39 : vector<312x4xf32>
    %41 = vector.extract_strided_slice %16 {offsets = [25, 0], sizes = [312, 4], strides = [1, 1]} : vector<360x4xbf16> to vector<312x4xbf16>
    %c5 = arith.constant 5 : index
    %c0_25 = arith.constant 0 : index
    %c0_26 = arith.constant 0 : index
    %42 = vector.load %arg2[%c5, %c0_25, %c0_26] : memref<9x4x4xbf16, #tpu.memory_space<vmem>>, vector<1x4x4xbf16>
    %43 = vector.shape_cast %42 : vector<1x4x4xbf16> to vector<4x4xbf16>
    %cst_27 = arith.constant dense<0.000000e+00> : vector<312x4xf32>
    %44 = tpu.matmul %41, %43, %cst_27 {dimension_numbers = #tpu.dot_dimension_numbers<[1], [0], [0], [1], [0, 0, 1, 1], [], []>} : vector<312x4xbf16>, vector<4x4xbf16>, vector<312x4xf32> -> vector<312x4xf32>
    %45 = arith.addf %40, %44 : vector<312x4xf32>
    %46 = vector.extract_strided_slice %16 {offsets = [40, 0], sizes = [312, 4], strides = [1, 1]} : vector<360x4xbf16> to vector<312x4xbf16>
    %c6 = arith.constant 6 : index
    %c0_28 = arith.constant 0 : index
    %c0_29 = arith.constant 0 : index
    %47 = vector.load %arg2[%c6, %c0_28, %c0_29] : memref<9x4x4xbf16, #tpu.memory_space<vmem>>, vector<1x4x4xbf16>
    %48 = vector.shape_cast %47 : vector<1x4x4xbf16> to vector<4x4xbf16>
    %cst_30 = arith.constant dense<0.000000e+00> : vector<312x4xf32>
    %49 = tpu.matmul %46, %48, %cst_30 {dimension_numbers = #tpu.dot_dimension_numbers<[1], [0], [0], [1], [0, 0, 1, 1], [], []>} : vector<312x4xbf16>, vector<4x4xbf16>, vector<312x4xf32> -> vector<312x4xf32>
    %50 = arith.addf %45, %49 : vector<312x4xf32>
    %51 = vector.extract_strided_slice %16 {offsets = [41, 0], sizes = [312, 4], strides = [1, 1]} : vector<360x4xbf16> to vector<312x4xbf16>
    %c7 = arith.constant 7 : index
    %c0_31 = arith.constant 0 : index
    %c0_32 = arith.constant 0 : index
    %52 = vector.load %arg2[%c7, %c0_31, %c0_32] : memref<9x4x4xbf16, #tpu.memory_space<vmem>>, vector<1x4x4xbf16>
    %53 = vector.shape_cast %52 : vector<1x4x4xbf16> to vector<4x4xbf16>
    %cst_33 = arith.constant dense<0.000000e+00> : vector<312x4xf32>
    %54 = tpu.matmul %51, %53, %cst_33 {dimension_numbers = #tpu.dot_dimension_numbers<[1], [0], [0], [1], [0, 0, 1, 1], [], []>} : vector<312x4xbf16>, vector<4x4xbf16>, vector<312x4xf32> -> vector<312x4xf32>
    %55 = arith.addf %50, %54 : vector<312x4xf32>
    %56 = vector.extract_strided_slice %16 {offsets = [42, 0], sizes = [312, 4], strides = [1, 1]} : vector<360x4xbf16> to vector<312x4xbf16>
    %c8 = arith.constant 8 : index
    %c0_34 = arith.constant 0 : index
    %c0_35 = arith.constant 0 : index
    %57 = vector.load %arg2[%c8, %c0_34, %c0_35] : memref<9x4x4xbf16, #tpu.memory_space<vmem>>, vector<1x4x4xbf16>
    %58 = vector.shape_cast %57 : vector<1x4x4xbf16> to vector<4x4xbf16>
    %cst_36 = arith.constant dense<0.000000e+00> : vector<312x4xf32>
    %59 = tpu.matmul %56, %58, %cst_36 {dimension_numbers = #tpu.dot_dimension_numbers<[1], [0], [0], [1], [0, 0, 1, 1], [], []>} : vector<312x4xbf16>, vector<4x4xbf16>, vector<312x4xf32> -> vector<312x4xf32>
    %60 = arith.addf %55, %59 : vector<312x4xf32>
    %c0_37 = arith.constant 0 : index
    %c0_38 = arith.constant 0 : index
    %61 = vector.load %arg3[%c0_37, %c0_38] : memref<312x1xf32, #tpu.memory_space<vmem>>, vector<312x1xf32>
    %62 = vector.broadcast %61 : vector<312x1xf32> to vector<312x4xf32>
    %63 = arith.mulf %60, %62 : vector<312x4xf32>
    %64 = arith.truncf %63 : vector<312x4xf32> to vector<312x4xbf16>
    %65 = vector.shape_cast %64 : vector<312x4xbf16> to vector<1x312x4xbf16>
    %c0_39 = arith.constant 0 : index
    %c0_40 = arith.constant 0 : index
    %c0_41 = arith.constant 0 : index
    %66 = vector.load %arg6[%c0_39, %c0_40, %c0_41] : memref<1x312x4xbf16, #tpu.memory_space<vmem>>, vector<1x312x4xbf16>
    tpu.vector_store %arg6[%c0_39, %c0_40, %c0_41], %65 {strides = array<i32>} : memref<1x312x4xbf16, #tpu.memory_space<vmem>>, vector<1x312x4xbf16>,
    %cst_42 = arith.constant dense<0.000000e+00> : vector<4xf32>
    %67 = vector.multi_reduction <add>, %63, %cst_42 [0] : vector<312x4xf32> to vector<4xf32>
    %68 = vector.shape_cast %67 : vector<4xf32> to vector<1x4xf32>
    %69 = arith.mulf %63, %63 : vector<312x4xf32>
    %cst_43 = arith.constant dense<0.000000e+00> : vector<4xf32>
    %70 = vector.multi_reduction <add>, %69, %cst_43 [0] : vector<312x4xf32> to vector<4xf32>
    %71 = vector.shape_cast %70 : vector<4xf32> to vector<1x4xf32>
    %72 = tpu.concatenate %68, %71 in 1 : vector<1x4xf32>, vector<1x4xf32> -> vector<1x8xf32>
    %73 = vector.shape_cast %72 : vector<1x8xf32> to vector<1x1x8xf32>
    %c0_44 = arith.constant 0 : index
    %c0_45 = arith.constant 0 : index
    %c0_46 = arith.constant 0 : index
    %74 = vector.load %arg7[%c0_44, %c0_45, %c0_46] : memref<1x1x8xf32, #tpu.memory_space<vmem>>, vector<1x1x8xf32>
    tpu.vector_store %arg7[%c0_44, %c0_45, %c0_46], %73 {strides = array<i32>} : memref<1x1x8xf32, #tpu.memory_space<vmem>>, vector<1x1x8xf32>,
    return
  }
  func.func @transform_0(%arg0: i32) -> (i32, i32, i32) {
    %c0_i32 = arith.constant 0 : i32
    %c0_i32_0 = arith.constant 0 : i32
    %c0_i32_1 = arith.constant 0 : i32
    return %arg0, %c0_i32, %c0_i32_0 : i32, i32, i32
  }
  func.func @transform_1(%arg0: i32) -> (i32, i32, i32) {
    %c0_i32 = arith.constant 0 : i32
    %c0_i32_0 = arith.constant 0 : i32
    %c0_i32_1 = arith.constant 0 : i32
    %c0_i32_2 = arith.constant 0 : i32
    return %c0_i32, %c0_i32_0, %c0_i32_1 : i32, i32, i32
  }
  func.func @transform_2(%arg0: i32) -> (i32, i32) {
    %c0_i32 = arith.constant 0 : i32
    %c0_i32_0 = arith.constant 0 : i32
    %c0_i32_1 = arith.constant 0 : i32
    return %c0_i32, %c0_i32_0 : i32, i32
  }
  func.func @transform_3(%arg0: i32) -> (i32, i32) {
    %c0_i32 = arith.constant 0 : i32
    %c0_i32_0 = arith.constant 0 : i32
    %c0_i32_1 = arith.constant 0 : i32
    return %c0_i32, %c0_i32_0 : i32, i32
  }
  func.func @transform_4(%arg0: i32) -> (i32, i32) {
    %c0_i32 = arith.constant 0 : i32
    %c0_i32_0 = arith.constant 0 : i32
    %c0_i32_1 = arith.constant 0 : i32
    return %c0_i32, %c0_i32_0 : i32, i32
  }
  func.func @transform_5(%arg0: i32) -> (i32, i32, i32) {
    %c0_i32 = arith.constant 0 : i32
    %c0_i32_0 = arith.constant 0 : i32
    %c0_i32_1 = arith.constant 0 : i32
    return %arg0, %c0_i32, %c0_i32_0 : i32, i32, i32
  }
  func.func @transform_6(%arg0: i32) -> (i32, i32, i32) {
    %c0_i32 = arith.constant 0 : i32
    %c0_i32_0 = arith.constant 0 : i32
    %c0_i32_1 = arith.constant 0 : i32
    return %arg0, %c0_i32, %c0_i32_0 : i32, i32, i32
  }
}

</mosaic_0001>

<bundles_post_ra>
// kernel: basic_block.5
= control target key start
LH: loop header
LB: loop body
LE: loop exit
PB: predicated region body
PF: predicated region fallthrough
CT: control target
= control target key end

     0   :  { %s761_s15 = smov 0   ;;  %s1213_s0 = inlined_call_operand.vmem [shape: bf16[2,312,4], index: 0, kind: input, shape index: {}]   ;;  %s1214_s1 = inlined_call_operand.vmem [shape: f32[2,312,4], index: 1, kind: input, shape index: {}, may-alias: {1,4}]   ;;  %s1215_s2 = inlined_call_operand.vmem [shape: f32[1,4], index: 2, kind: input, shape index: {}]   ;;  %s1216_s3 = inlined_call_operand.vmem [shape: f32[1,4], index: 3, kind: input, shape index: {}]   ;;  %s1217_s4 = inlined_call_operand.vmem [shape: f32[2,312,4], index: 4, kind: output, shape index: {}, may-alias: {1,4}]  }
   0x1 LB: > { %s612_s16 = sadd.s32 4294967295, %s734_s15   ;;  %p616_p0 = scmp.ge.s32.totalorder %s734_s15, 1  ;;  %s734_s15 = sphi %s761_s15, %s14_s15  }
   0x2   : > { %p172_p1 = scmp.lt.s32.totalorder %s734_s15, 3 }
   0x4   : > { %p173_p2 = pnand %p616_p0, %p172_p1 }
   0x6   : > { %176 = sbr.rel (%p173_p2) target bundleno = 81 (0x51), region = 36 }
   0xd   : > { %p203_p3 = scmp.lt.s32.totalorder %s612_s16, 1  ;;  %v620_v48 = vld [vmem:[%s1215_s2] ss:$0 sm:$0xff]  ;;  %vm505_vm0 = vcmask 31744  }
   0xf   : > { %s1229_s16 = smov (!%p203_p3, %s612_s16), 1 }
  0x10   : > { %s718_s17 = smul.u32 156, %s1229_s16 }
  0x11   : > { %s719_s25 = smul.u32 312, %s1229_s16 }
  0x12   : > { %s775_s20 = scalar_lea.vmem %s1213_s0, %s718_s17 }
  0x13   : > { %v625_v0 = vld [vmem:[%s775_s20] sm:$0xff]   ;;  %v779_v1 = vld [vmem:[%s775_s20 + $0x8] sm:$0xff]   ;;  %v782_v2 = vld [vmem:[%s775_s20 + $0x10] sm:$0xff]   ;;  %s835_s28 = scalar_lea.vmem %s1214_s1, %s719_s25  ;;  %s1080_s5 = scalar_lea.vmem %s1217_s4, %s719_s25 }
  0x14   : > { %v626_v3 = vunpack.c.l.bf16 %v625_v0  ;;  %v627_v4 = vunpack.c.h.bf16 %v625_v0  ;;  %v630_v5 = vunpack.c.l.bf16 %v779_v1  ;;  %v631_v6 = vunpack.c.h.bf16 %v779_v1  ;;  %v702_v7 = vld [vmem:[%s775_s20 + $0x18] sm:$0xff]   ;;  %v703_v8 = vld [vmem:[%s775_s20 + $0x20] sm:$0xff]   ;;  %v789_v9 = vld [vmem:[%s775_s20 + $0x28] sm:$0xff]  }
  0x15   : > { %v634_v10 = vunpack.c.l.bf16 %v782_v2  ;;  %v635_v11 = vunpack.c.h.bf16 %v782_v2  ;;  %v638_v12 = vunpack.c.l.bf16 %v702_v7  ;;  %v639_v13 = vunpack.c.h.bf16 %v702_v7  ;;  %v705_v14 = vld [vmem:[%s775_s20 + $0x30] sm:$0xff]   ;;  %v706_v15 = vld [vmem:[%s775_s20 + $0x38] sm:$0xff]   ;;  %v707_v16 = vld [vmem:[%s775_s20 + $0x40] sm:$0xff]  }
  0x16   : > { %v642_v17 = vunpack.c.l.bf16 %v703_v8  ;;  %v643_v18 = vunpack.c.h.bf16 %v703_v8  ;;  %v646_v19 = vunpack.c.l.bf16 %v789_v9  ;;  %v647_v20 = vunpack.c.h.bf16 %v789_v9  ;;  %v708_v21 = vld [vmem:[%s775_s20 + $0x48] sm:$0xff]   ;;  %v709_v22 = vld [vmem:[%s775_s20 + $0x50] sm:$0xff]   ;;  %v710_v23 = vld [vmem:[%s775_s20 + $0x58] sm:$0xff]  }
  0x17   : > { %v650_v24 = vunpack.c.l.bf16 %v705_v14  ;;  %v651_v25 = vunpack.c.h.bf16 %v705_v14  ;;  %v654_v26 = vunpack.c.l.bf16 %v706_v15  ;;  %v655_v27 = vunpack.c.h.bf16 %v706_v15  ;;  %v711_v28 = vld [vmem:[%s775_s20 + $0x60] sm:$0xff]   ;;  %v712_v29 = vld [vmem:[%s775_s20 + $0x68] sm:$0xff]   ;;  %v713_v34 = vld [vmem:[%s775_s20 + $0x70] sm:$0xff]  }
  0x18   : > { %v658_v30 = vunpack.c.l.bf16 %v707_v16  ;;  %v659_v31 = vunpack.c.h.bf16 %v707_v16  ;;  %v662_v32 = vunpack.c.l.bf16 %v708_v21  ;;  %v663_v33 = vunpack.c.h.bf16 %v708_v21  ;;  %v714_v35 = vld [vmem:[%s775_s20 + $0x78] sm:$0xff]   ;;  %v715_v40 = vld [vmem:[%s775_s20 + $0x80] sm:$0xff]   ;;  %v716_v41 = vld [vmem:[%s775_s20 + $0x88] sm:$0xff]  }
  0x19   : > { %v666_v36 = vunpack.c.l.bf16 %v709_v22  ;;  %v667_v37 = vunpack.c.h.bf16 %v709_v22  ;;  %v670_v38 = vunpack.c.l.bf16 %v710_v23  ;;  %v671_v39 = vunpack.c.h.bf16 %v710_v23  ;;  %v717_v46 = vld [vmem:[%s775_s20 + $0x90] sm:$0xff]   ;;  %v256_v47 = vld [vmem:[%s775_s20 + $0x98] sm:$0xf] }
  0x1a   : > { %v674_v42 = vunpack.c.l.bf16 %v711_v28  ;;  %v675_v43 = vunpack.c.h.bf16 %v711_v28  ;;  %v678_v44 = vunpack.c.l.bf16 %v712_v29  ;;  %v679_v45 = vunpack.c.h.bf16 %v712_v29 }
  0x1b   : > { %v682_v49 = vunpack.c.l.bf16 %v713_v34  ;;  %v683_v50 = vunpack.c.h.bf16 %v713_v34  ;;  %v686_v51 = vunpack.c.l.bf16 %v714_v35  ;;  %v687_v52 = vunpack.c.h.bf16 %v714_v35 }
  0x1c   : > { %v690_v53 = vunpack.c.l.bf16 %v715_v40  ;;  %v691_v54 = vunpack.c.h.bf16 %v715_v40  ;;  %v694_v55 = vunpack.c.l.bf16 %v716_v41  ;;  %v695_v56 = vunpack.c.h.bf16 %v716_v41 }
  0x1d   : > { %v698_v57 = vunpack.c.l.bf16 %v717_v46  ;;  %v699_v58 = vunpack.c.h.bf16 %v717_v46  ;;  %v295_v59 = vunpack.c.l.bf16 %v256_v47  ;;  %v303_v60 = vmul.f32 %v626_v3, %v620_v48 }
  0x1e   : > { %v304_v61 = vmul.f32 %v627_v4, %v620_v48  ;;  %v305_v62 = vmul.f32 %v630_v5, %v620_v48  ;;  %v306_v63 = vmul.f32 %v631_v6, %v620_v48  ;;  %v307_v0 = vmul.f32 %v634_v10, %v620_v48 }
  0x1f   : > { %v308_v1 = vmul.f32 %v635_v11, %v620_v48  ;;  %v309_v2 = vmul.f32 %v638_v12, %v620_v48  ;;  %v310_v7 = vmul.f32 %v639_v13, %v620_v48  ;;  %v311_v8 = vmul.f32 %v642_v17, %v620_v48 }
  0x20   : > { %v312_v9 = vmul.f32 %v643_v18, %v620_v48  ;;  %v313_v14 = vmul.f32 %v646_v19, %v620_v48  ;;  %v314_v15 = vmul.f32 %v647_v20, %v620_v48  ;;  %v315_v16 = vmul.f32 %v650_v24, %v620_v48  ;;  %v815_v19 = vld [vmem:[%s1216_s3] ss:$0 sm:$0xff] }
  0x21   : > { %v316_v21 = vmul.f32 %v651_v25, %v620_v48  ;;  %v317_v22 = vmul.f32 %v654_v26, %v620_v48  ;;  %v318_v23 = vmul.f32 %v655_v27, %v620_v48  ;;  %v319_v28 = vmul.f32 %v658_v30, %v620_v48 }
  0x22   : > { %v320_v29 = vmul.f32 %v659_v31, %v620_v48  ;;  %v321_v34 = vmul.f32 %v662_v32, %v620_v48  ;;  %v322_v3 = vmul.f32 %v663_v33, %v620_v48  ;;  %v323_v4 = vmul.f32 %v666_v36, %v620_v48 }
  0x23   : > { %v324_v5 = vmul.f32 %v667_v37, %v620_v48  ;;  %v325_v6 = vmul.f32 %v670_v38, %v620_v48  ;;  %v326_v10 = vmul.f32 %v671_v39, %v620_v48  ;;  %v327_v11 = vmul.f32 %v674_v42, %v620_v48 }
  0x24   : > { %v328_v12 = vmul.f32 %v675_v43, %v620_v48  ;;  %v329_v13 = vmul.f32 %v678_v44, %v620_v48  ;;  %v330_v17 = vmul.f32 %v679_v45, %v620_v48  ;;  %v331_v18 = vmul.f32 %v682_v49, %v620_v48 }
  0x25   : > { %v332_v20 = vmul.f32 %v683_v50, %v620_v48  ;;  %v333_v24 = vmul.f32 %v686_v51, %v620_v48  ;;  %v334_v25 = vmul.f32 %v687_v52, %v620_v48  ;;  %v335_v26 = vmul.f32 %v690_v53, %v620_v48 }
  0x26   : > { %v336_v27 = vmul.f32 %v691_v54, %v620_v48  ;;  %v337_v30 = vmul.f32 %v694_v55, %v620_v48  ;;  %v338_v31 = vmul.f32 %v695_v56, %v620_v48  ;;  %v339_v32 = vmul.f32 %v698_v57, %v620_v48 }
  0x27   : > { %v340_v33 = vmul.f32 %v699_v58, %v620_v48  ;;  %v341_v35 = vmul.f32 %v620_v48, %v295_v59  ;;  %v349_v36 = vadd.f32 %v815_v19, %v303_v60  ;;  %v350_v37 = vadd.f32 %v815_v19, %v304_v61  ;;  %v388_v58 = vld [vmem:[%s835_s28] sm:$0xff]  ;;  %v389_v59 = vld [vmem:[%s835_s28 + $0x8] sm:$0xff]  ;;  %v390_v60 = vld [vmem:[%s835_s28 + $0x10] sm:$0xff] }
  0x28   : > { %v351_v38 = vadd.f32 %v815_v19, %v305_v62  ;;  %v822_v39 = vadd.f32 %v815_v19, %v306_v63  ;;  %v825_v40 = vadd.f32 %v815_v19, %v307_v0  ;;  %v828_v41 = vadd.f32 %v815_v19, %v308_v1  ;;  %v391_v1 = vld [vmem:[%s835_s28 + $0x18] sm:$0xff] }
  0x29   : > { %v838_v42 = vadd.f32 %v815_v19, %v309_v2  ;;  %v841_v43 = vadd.f32 %v815_v19, %v310_v7  ;;  %v844_v44 = vadd.f32 %v815_v19, %v311_v8  ;;  %v847_v45 = vadd.f32 %v815_v19, %v312_v9  ;;  %v392_v2 = vld [vmem:[%s835_s28 + $0x20] sm:$0xff]  ;;  %v393_v7 = vld [vmem:[%s835_s28 + $0x28] sm:$0xff]  ;;  %v394_v8 = vld [vmem:[%s835_s28 + $0x30] sm:$0xff] }
  0x2a   : > { %v850_v46 = vadd.f32 %v815_v19, %v313_v14  ;;  %v853_v47 = vadd.f32 %v815_v19, %v314_v15  ;;  %v856_v48 = vadd.f32 %v815_v19, %v315_v16  ;;  %v859_v49 = vadd.f32 %v815_v19, %v316_v21  ;;  %v395_v21 = vld [vmem:[%s835_s28 + $0x38] sm:$0xff] }
  0x2b   : > { %v862_v50 = vadd.f32 %v815_v19, %v317_v22  ;;  %v865_v51 = vadd.f32 %v815_v19, %v318_v23  ;;  %v868_v52 = vadd.f32 %v815_v19, %v319_v28  ;;  %v871_v53 = vadd.f32 %v815_v19, %v320_v29  ;;  %v396_v22 = vld [vmem:[%s835_s28 + $0x40] sm:$0xff]  ;;  %v397_v23 = vld [vmem:[%s835_s28 + $0x48] sm:$0xff]  ;;  %v398_v28 = vld [vmem:[%s835_s28 + $0x50] sm:$0xff] }
  0x2c   : > { %v874_v54 = vadd.f32 %v815_v19, %v321_v34  ;;  %v877_v55 = vadd.f32 %v815_v19, %v322_v3  ;;  %v880_v56 = vadd.f32 %v815_v19, %v323_v4  ;;  %v883_v57 = vadd.f32 %v815_v19, %v324_v5  ;;  %v399_v5 = vld [vmem:[%s835_s28 + $0x58] sm:$0xff] }
  0x2d   : > { %v889_v61 = vadd.f32 %v815_v19, %v325_v6  ;;  %v892_v62 = vadd.f32 %v815_v19, %v326_v10  ;;  %v895_v63 = vadd.f32 %v815_v19, %v327_v11  ;;  %v898_v0 = vadd.f32 %v815_v19, %v328_v12  ;;  %v400_v6 = vld [vmem:[%s835_s28 + $0x60] sm:$0xff]  ;;  %v401_v10 = vld [vmem:[%s835_s28 + $0x68] sm:$0xff]  ;;  %v402_v11 = vld [vmem:[%s835_s28 + $0x70] sm:$0xff] }
  0x2e   : > { %v905_v9 = vadd.f32 %v815_v19, %v329_v13  ;;  %v908_v14 = vadd.f32 %v815_v19, %v330_v17  ;;  %v911_v15 = vadd.f32 %v815_v19, %v331_v18  ;;  %v914_v16 = vadd.f32 %v815_v19, %v332_v20  ;;  %v403_v20 = vld [vmem:[%s835_s28 + $0x78] sm:$0xff] }
  0x2f   : > { %v921_v29 = vadd.f32 %v815_v19, %v333_v24  ;;  %v924_v34 = vadd.f32 %v815_v19, %v334_v25  ;;  %v927_v3 = vadd.f32 %v815_v19, %v335_v26  ;;  %v930_v4 = vadd.f32 %v815_v19, %v336_v27  ;;  %v404_v24 = vld [vmem:[%s835_s28 + $0x80] sm:$0xff]  ;;  %v405_v25 = vld [vmem:[%s835_s28 + $0x88] sm:$0xff]  ;;  %v406_v27 = vld [vmem:[%s835_s28 + $0x90] sm:$0xff] }
  0x30   : > { %v937_v12 = vadd.f32 %v815_v19, %v337_v30  ;;  %v940_v13 = vadd.f32 %v815_v19, %v338_v31  ;;  %v943_v17 = vadd.f32 %v815_v19, %v339_v32  ;;  %v946_v18 = vadd.f32 %v815_v19, %v340_v33  ;;  %v407_v30 = vld [vmem:[%s835_s28 + $0x98] sm:$0xff]  ;;  %v409_v33 = vld [vmem:[%s835_s28 + $0xa8] sm:$0xff] }
  0x31   : > { %1218 = vst [vmem:[#allocation2_spill] sm:$0xff] %v930_v4  ;;  %v387_v26 = vadd.f32 %v815_v19, %v341_v35  ;;  %v955_v4 = vadd.f32 %v388_v58, %v349_v36  ;;  %v957_v31 = vadd.f32 %v389_v59, %v350_v37  ;;  %v959_v32 = vadd.f32 %v390_v60, %v351_v38  ;;  %v412_v37 = vld [vmem:[%s835_s28 + $0xc0] sm:$0xff]  ;;  %v413_v38 = vld [vmem:[%s835_s28 + $0xc8] sm:$0xff]  ;;  %v414_v58 = vld [vmem:[%s835_s28 + $0xd0] sm:$0xff] }
  0x32   : > { %1219 = vst [vmem:[#allocation3_spill] sm:$0xff] %v937_v12  ;;  %1220 = vst [vmem:[#allocation4_spill] sm:$0xff] %v940_v13  ;;  %v408_v12 = vld [vmem:[%s835_s28 + $0xa0] sm:$0xff]  ;;  %v965_v13 = vadd.f32 %v391_v1, %v822_v39  ;;  %v968_v19 = vadd.f32 %v392_v2, %v825_v40  ;;  %v971_v35 = vadd.f32 %v393_v7, %v828_v41  ;;  %v417_v1 = vld [vmem:[%s835_s28 + $0xe8] sm:$0xff] }
  0x33   : > { %1221 = vst [vmem:[#allocation5_spill] sm:$0xff] %v943_v17  ;;  %1222 = vst [vmem:[#allocation6_spill] sm:$0xff] %v946_v18  ;;  %v410_v18 = vld [vmem:[%s835_s28 + $0xb0] sm:$0xff]  ;;  %v411_v17 = vld [vmem:[%s835_s28 + $0xb8] sm:$0xff]  ;;  %v974_v36 = vadd.f32 %v394_v8, %v838_v42  ;;  %v980_v59 = vadd.f32 %v395_v21, %v841_v43  ;;  %v983_v39 = vadd.f32 %v396_v22, %v844_v44 }
  0x34   : > { %v986_v40 = vadd.f32 %v397_v23, %v847_v45  ;;  %v989_v41 = vadd.f32 %v398_v28, %v850_v46  ;;  %v415_v42 = vld [vmem:[%s835_s28 + $0xd8] sm:$0xff]  ;;  %v416_v60 = vld [vmem:[%s835_s28 + $0xe0] sm:$0xff]  ;;  %v995_v2 = vadd.f32 %v399_v5, %v853_v47  ;;  %v998_v43 = vadd.f32 %v400_v6, %v856_v48  ;;  %v418_v46 = vld [vmem:[%s835_s28 + $0xf0] sm:$0xff] }
  0x35   : > { %v1001_v44 = vadd.f32 %v401_v10, %v859_v49  ;;  %v1004_v45 = vadd.f32 %v402_v11, %v862_v50  ;;  %v419_v7 = vld [vmem:[%s835_s28 + $0xf8] sm:$0xff]  ;;  %v420_v8 = vld [vmem:[%s835_s28 + $0x100] sm:$0xff]  ;;  %v1010_v21 = vadd.f32 %v403_v20, %v865_v51  ;;  %v1013_v47 = vadd.f32 %v404_v24, %v868_v52  ;;  %v421_v22 = vld [vmem:[%s835_s28 + $0x108] sm:$0xff] }
  0x36   : > { %v1016_v48 = vadd.f32 %v405_v25, %v871_v53  ;;  %v1019_v49 = vadd.f32 %v406_v27, %v874_v54  ;;  %v422_v50 = vld [vmem:[%s835_s28 + $0x110] sm:$0xff]  ;;  %v423_v23 = vld [vmem:[%s835_s28 + $0x118] sm:$0xff]  ;;  %v1025_v28 = vadd.f32 %v407_v30, %v877_v55  ;;  %v1028_v5 = vadd.f32 %v408_v12, %v880_v56  ;;  %v424_v53 = vld [vmem:[%s835_s28 + $0x120] sm:$0xff] }
  0x37   : > { %v1031_v51 = vadd.f32 %v409_v33, %v883_v57  ;;  %v1034_v52 = vadd.f32 %v410_v18, %v889_v61  ;;  %v425_v6 = vld [vmem:[%s835_s28 + $0x128] sm:$0xff]  ;;  %v426_v54 = vld [vmem:[%s835_s28 + $0x130] sm:$0xff]  ;;  %v1040_v10 = vadd.f32 %v411_v17, %v892_v62  ;;  %v1043_v11 = vadd.f32 %v412_v37, %v895_v63 }
  0x38   : > { %v1046_v55 = vadd.f32 %v413_v38, %v898_v0  ;;  %v1049_v56 = vadd.f32 %v414_v58, %v905_v9  ;;  %v1052_v57 = vadd.f32 %v415_v42, %v908_v14  ;;  %v1055_v61 = vadd.f32 %v416_v60, %v911_v15  ;;  %v1223_v9 = vld [vmem:[#allocation2_spill] sm:$0xff] }
  0x39   : > { %v1058_v12 = vadd.f32 %v417_v1, %v914_v16  ;;  %v1061_v62 = vadd.f32 %v418_v46, %v921_v29  ;;  %v1064_v63 = vadd.f32 %v419_v7, %v924_v34  ;;  %v1067_v0 = vadd.f32 %v420_v8, %v927_v3  ;;  %v1224_v14 = vld [vmem:[#allocation3_spill] sm:$0xff]  ;;  %v1225_v15 = vld [vmem:[#allocation4_spill] sm:$0xff] }
  0x3a   : > { %v1070_v17 = vadd.f32 %v421_v22, %v1223_v9  ;;  %v1073_v18 = vadd.f32 %v422_v50, %v1224_v14  ;;  %v1083_v16 = vadd.f32 %v423_v23, %v1225_v15  ;;  %v1226_v29 = vld [vmem:[#allocation5_spill] sm:$0xff]  ;;  %v1227_v3 = vld [vmem:[#allocation6_spill] sm:$0xff]  ;;  %v1091_v24 = vadd.f32 %v426_v54, %v387_v26 }
  0x3b   : > { %v1086_v34 = vadd.f32 %v424_v53, %v1226_v29  ;;  %v1089_v20 = vadd.f32 %v425_v6, %v1227_v3  ;;  %v466_v25 = vmax.f32 %v955_v4, 0.0  ;;  %v467_v27 = vmax.f32 %v957_v31, 0.0 }
  0x3c   : > { %v468_v30 = vmax.f32 %v959_v32, 0.0  ;;  %v469_v33 = vmax.f32 %v965_v13, 0.0  ;;  %v470_v37 = vmax.f32 %v968_v19, 0.0  ;;  %v471_v38 = vmax.f32 %v971_v35, 0.0 }
  0x3d   : > { %v472_v58 = vmax.f32 %v974_v36, 0.0  ;;  %v473_v26 = vmax.f32 %v980_v59, 0.0  ;;  %v474_v4 = vmax.f32 %v983_v39, 0.0  ;;  %v475_v31 = vmax.f32 %v986_v40, 0.0  ;;  %506 = vst.msk [vmem:[%s1080_s5] sm:$0xff] %vm505_vm0, %v466_v25  ;;  %507 = vst.msk [vmem:[%s1080_s5 + $0x8] sm:$0xff] %vm505_vm0, %v467_v27 }
  0x3e   : > { %v476_v32 = vmax.f32 %v989_v41, 0.0  ;;  %v477_v13 = vmax.f32 %v995_v2, 0.0  ;;  %508 = vst.msk [vmem:[%s1080_s5 + $0x10] sm:$0xff] %vm505_vm0, %v468_v30  ;;  %509 = vst.msk [vmem:[%s1080_s5 + $0x18] sm:$0xff] %vm505_vm0, %v469_v33  ;;  %v478_v19 = vmax.f32 %v998_v43, 0.0  ;;  %v479_v35 = vmax.f32 %v1001_v44, 0.0 }
  0x3f   : > { %v480_v36 = vmax.f32 %v1004_v45, 0.0  ;;  %v481_v59 = vmax.f32 %v1010_v21, 0.0  ;;  %510 = vst.msk [vmem:[%s1080_s5 + $0x20] sm:$0xff] %vm505_vm0, %v470_v37  ;;  %511 = vst.msk [vmem:[%s1080_s5 + $0x28] sm:$0xff] %vm505_vm0, %v471_v38  ;;  %v482_v39 = vmax.f32 %v1013_v47, 0.0  ;;  %v483_v40 = vmax.f32 %v1016_v48, 0.0 }
  0x40   : > { %512 = vst.msk [vmem:[%s1080_s5 + $0x30] sm:$0xff] %vm505_vm0, %v472_v58  ;;  %513 = vst.msk [vmem:[%s1080_s5 + $0x38] sm:$0xff] %vm505_vm0, %v473_v26  ;;  %v484_v41 = vmax.f32 %v1019_v49, 0.0  ;;  %v485_v42 = vmax.f32 %v1025_v28, 0.0  ;;  %v486_v60 = vmax.f32 %v1028_v5, 0.0  ;;  %v487_v1 = vmax.f32 %v1031_v51, 0.0 }
  0x41   : > { %514 = vst.msk [vmem:[%s1080_s5 + $0x40] sm:$0xff] %vm505_vm0, %v474_v4  ;;  %515 = vst.msk [vmem:[%s1080_s5 + $0x48] sm:$0xff] %vm505_vm0, %v475_v31  ;;  %v488_v2 = vmax.f32 %v1034_v52, 0.0  ;;  %v489_v43 = vmax.f32 %v1040_v10, 0.0  ;;  %v490_v44 = vmax.f32 %v1043_v11, 0.0  ;;  %v491_v45 = vmax.f32 %v1046_v55, 0.0 }
  0x42   : > { %516 = vst.msk [vmem:[%s1080_s5 + $0x50] sm:$0xff] %vm505_vm0, %v476_v32  ;;  %517 = vst.msk [vmem:[%s1080_s5 + $0x58] sm:$0xff] %vm505_vm0, %v477_v13  ;;  %v492_v46 = vmax.f32 %v1049_v56, 0.0  ;;  %v493_v7 = vmax.f32 %v1052_v57, 0.0  ;;  %v494_v8 = vmax.f32 %v1055_v61, 0.0  ;;  %v495_v21 = vmax.f32 %v1058_v12, 0.0 }
  0x43   : > { %518 = vst.msk [vmem:[%s1080_s5 + $0x60] sm:$0xff] %vm505_vm0, %v478_v19  ;;  %519 = vst.msk [vmem:[%s1080_s5 + $0x68] sm:$0xff] %vm505_vm0, %v479_v35  ;;  %v496_v47 = vmax.f32 %v1061_v62, 0.0  ;;  %v497_v48 = vmax.f32 %v1064_v63, 0.0  ;;  %v498_v49 = vmax.f32 %v1067_v0, 0.0  ;;  %v499_v22 = vmax.f32 %v1070_v17, 0.0 }
  0x44   : > { %520 = vst.msk [vmem:[%s1080_s5 + $0x70] sm:$0xff] %vm505_vm0, %v480_v36  ;;  %521 = vst.msk [vmem:[%s1080_s5 + $0x78] sm:$0xff] %vm505_vm0, %v481_v59  ;;  %v500_v50 = vmax.f32 %v1073_v18, 0.0  ;;  %v501_v23 = vmax.f32 %v1083_v16, 0.0  ;;  %v502_v28 = vmax.f32 %v1086_v34, 0.0  ;;  %v503_v5 = vmax.f32 %v1089_v20, 0.0 }
  0x45   : > { %522 = vst.msk [vmem:[%s1080_s5 + $0x80] sm:$0xff] %vm505_vm0, %v482_v39  ;;  %523 = vst.msk [vmem:[%s1080_s5 + $0x88] sm:$0xff] %vm505_vm0, %v483_v40  ;;  %v504_v51 = vmax.f32 %v1091_v24, 0.0 }
  0x46   : > { %524 = vst.msk [vmem:[%s1080_s5 + $0x90] sm:$0xff] %vm505_vm0, %v484_v41  ;;  %525 = vst.msk [vmem:[%s1080_s5 + $0x98] sm:$0xff] %vm505_vm0, %v485_v42 }
  0x47   : > { %526 = vst.msk [vmem:[%s1080_s5 + $0xa0] sm:$0xff] %vm505_vm0, %v486_v60  ;;  %527 = vst.msk [vmem:[%s1080_s5 + $0xa8] sm:$0xff] %vm505_vm0, %v487_v1 }
  0x48   : > { %528 = vst.msk [vmem:[%s1080_s5 + $0xb0] sm:$0xff] %vm505_vm0, %v488_v2  ;;  %529 = vst.msk [vmem:[%s1080_s5 + $0xb8] sm:$0xff] %vm505_vm0, %v489_v43 }
  0x49   : > { %530 = vst.msk [vmem:[%s1080_s5 + $0xc0] sm:$0xff] %vm505_vm0, %v490_v44  ;;  %531 = vst.msk [vmem:[%s1080_s5 + $0xc8] sm:$0xff] %vm505_vm0, %v491_v45 }
  0x4a   : > { %532 = vst.msk [vmem:[%s1080_s5 + $0xd0] sm:$0xff] %vm505_vm0, %v492_v46  ;;  %533 = vst.msk [vmem:[%s1080_s5 + $0xd8] sm:$0xff] %vm505_vm0, %v493_v7 }
  0x4b   : > { %534 = vst.msk [vmem:[%s1080_s5 + $0xe0] sm:$0xff] %vm505_vm0, %v494_v8  ;;  %535 = vst.msk [vmem:[%s1080_s5 + $0xe8] sm:$0xff] %vm505_vm0, %v495_v21 }
  0x4c   : > { %536 = vst.msk [vmem:[%s1080_s5 + $0xf0] sm:$0xff] %vm505_vm0, %v496_v47  ;;  %537 = vst.msk [vmem:[%s1080_s5 + $0xf8] sm:$0xff] %vm505_vm0, %v497_v48 }
  0x4d   : > { %538 = vst.msk [vmem:[%s1080_s5 + $0x100] sm:$0xff] %vm505_vm0, %v498_v49  ;;  %539 = vst.msk [vmem:[%s1080_s5 + $0x108] sm:$0xff] %vm505_vm0, %v499_v22 }
  0x4e   : > { %540 = vst.msk [vmem:[%s1080_s5 + $0x110] sm:$0xff] %vm505_vm0, %v500_v50  ;;  %541 = vst.msk [vmem:[%s1080_s5 + $0x118] sm:$0xff] %vm505_vm0, %v501_v23 }
  0x4f   : > { %542 = vst.msk [vmem:[%s1080_s5 + $0x120] sm:$0xff] %vm505_vm0, %v502_v28  ;;  %543 = vst.msk [vmem:[%s1080_s5 + $0x128] sm:$0xff] %vm505_vm0, %v503_v5 }
  0x50   : > { %544 = vst.msk [vmem:[%s1080_s5 + $0x130] sm:$0xff] %vm505_vm0, %v504_v51 }
  0x51 PF: > { %s14_s15 = sadd.s32 1, %s734_s15  }
  0x52   : > { %p11_p4 = scmp.ge.s32.totalorder %s14_s15, 4  }
  0x54   :  { %13 = sbr.rel (!%p11_p4) target bundleno = 1 (0x1), region = 69 }

// kernel: basic_block.3
= control target key start
LH: loop header
LB: loop body
LE: loop exit
PB: predicated region body
PF: predicated region fallthrough
CT: control target
= control target key end

     0   :  { %s5047_s15 = smov 0   ;;  %s6451_s0 = inlined_call_operand.vmem [shape: f32[2,312,4], index: 0, kind: input, shape index: {}]   ;;  %s6452_s1 = inlined_call_operand.vmem [shape: bf16[9,4,4], index: 1, kind: input, shape index: {}]   ;;  %s6453_s2 = inlined_call_operand.vmem [shape: f32[312,1], index: 2, kind: input, shape index: {}]   ;;  %s6454_s3 = inlined_call_operand.vmem [shape: bf16[2,312,4], index: 3, kind: output, shape index: {0}]   ;;  %s6455_s4 = inlined_call_operand.vmem [shape: f32[2,1,8], index: 4, kind: output, shape index: {1}]  }
   0x1 LB: > { %s3821_s16 = sadd.s32 4294967295, %s5016_s15   ;;  %p3825_p0 = scmp.ge.s32.totalorder %s5016_s15, 1  ;;  %s5016_s15 = sphi %s5047_s15, %s15_s15  }
   0x2   : > { %p165_p1 = scmp.lt.s32.totalorder %s5016_s15, 3 }
   0x4   : > { %p166_p2 = pnand %p3825_p0, %p165_p1 }
   0x6   : > { %169 = sbr.rel (%p166_p2) target bundleno = 738 (0x2e2), region = 32 }
   0xd   : > { %vm512_vm0 = vcmask 1041408   ;;  %v5058_v0 = vld [vmem:[%s6452_s1 + $0x8] sm:$0x3]  ;;  %v3828_v1 = vld [vmem:[%s6452_s1 + $0x2] sm:$0x3]  ;;  %p194_p3 = scmp.lt.s32.totalorder %s3821_s16, 1 }
   0xe   : > { %4988 = vmatprep.subr.msk.bf16.mxu0 %vm512_vm0, %v5058_v0  ;;  %v5067_v2 = vsel %vm512_vm0, %v5058_v0, 0  ;;  %4984 = vmatprep.subr.msk.bf16.mxu1 %vm512_vm0, %v3828_v1  ;;  %v5073_v3 = vld [vmem:[%s6452_s1] sm:$0x3]  ;;  %v514_v4 = vsel %vm512_vm0, %v3828_v1, 0  ;;  %v3932_v5 = vld [vmem:[%s6452_s1 + $0xa] sm:$0x3] }
   0xf   : > { %4454 = vmatpush3.bf16.msra.mxu0 %v5067_v2  ;;  %s6586_s16 = smov (!%p194_p3, %s3821_s16), 1  ;;  %4286 = vmatpush3.bf16.msra.mxu1 %v514_v4  ;;  %v6457_v6 = vmov 0   ;;  %v5019_v12 = vmov 0.0   ;;  %vm451_vm1 = vcmask 31744   ;;  %vm1025_vm2 = vcmask 1043456  }
  0x10   : > { %5008 = vset.pattern.permute.xlu0 %v6457_v6  ;;  %s4994_s25 = smul.u32 312, %s6586_s16  ;;  %4985 = vmatprep.subr.msk.bf16.mxu1 %vm512_vm0, %v5073_v3  ;;  %v275_v7 = vrot.slane %v6457_v6, 3  ;;  %v5089_v8 = vrot.slane %v6457_v6, 4  ;;  %vm271_vm3 = vsmask.f32 4352  ;;  %v2000_v20 = vsel %vm512_vm0, %v3932_v5, 0 }
  0x11   : > { %4990 = vmatprep.subr.msk.bf16.mxu0 %vm512_vm0, %v3932_v5  ;;  %5009 = vset.pattern.permute.xlu1 %v6457_v6  ;;  %v5147_v40 = vld [vmem:[%s6452_s1 + $0xc] sm:$0x3]  ;;  %v829_v54 = vsel %vm512_vm0, %v5073_v3, 0  ;;  %v5185_v61 = vld [vmem:[%s6452_s1 + $0x4] sm:$0x3]  ;;  %vm728_vm5 = vcmask 1044480  }
  0x12   : > { %6505 = vst [vmem:[#allocation2_spill] sm:$0xff] %v5089_v8  ;;  %s5095_s28 = scalar_lea.vmem %s6451_s0, %s4994_s25  ;;  %v279_v19 = vor.u32 %v5089_v8, %v275_v7  ;;  %vm1857_vm4 = vsmask.f32 3328  ;;  %vm2724_vm6 = vcmask 1042432   ;;  %s4995_s21 = smul.u32 156, %s6586_s16  ;;  %vm3489_vm7 = vcmask 27648  }
  0x13   : > { %v208_v9 = vld [vmem:[%s5095_s28] sm:$0xff]  ;;  %v209_v10 = vld [vmem:[%s5095_s28 + $0x8] sm:$0xff]  ;;  %v210_v11 = vld [vmem:[%s5095_s28 + $0x10] sm:$0xff]  ;;  %s5021_s25 = smov 4   ;;  %vm3739_vm8 = vcmask 57344  }
  0x14   : > { %v5100_v13 = vpack.c.bf16 %v208_v9, %v5019_v12  ;;  %v5102_v14 = vpack.c.bf16 %v210_v11, %v209_v10  ;;  %v211_v15 = vld [vmem:[%s5095_s28 + $0x18] sm:$0xff]  ;;  %v212_v16 = vld [vmem:[%s5095_s28 + $0x20] sm:$0xff]  ;;  %v213_v17 = vld [vmem:[%s5095_s28 + $0x28] sm:$0xff]  ;;  %s6214_s24 = scalar_lea.vmem %s6454_s3, %s4995_s21 }
  0x15   : > { %v5107_v18 = vpack.c.bf16 %v212_v16, %v211_v15  ;;  %v214_v21 = vld [vmem:[%s5095_s28 + $0x30] sm:$0xff]  ;;  %v215_v22 = vld [vmem:[%s5095_s28 + $0x38] sm:$0xff]  ;;  %v216_v23 = vld [vmem:[%s5095_s28 + $0x40] sm:$0xff] }
  0x16   : > { %6506 = vst [vmem:[#allocation3_spill] sm:$0xff] %v5102_v14  ;;  %v6456_v24 = vrot.slane %v5100_v13, 4  ;;  %v1029_v25 = vrot.slane %v5102_v14, 4  ;;  %v281_v26 = vshrl.u32 %v5100_v13, 16  ;;  %v284_v27 = vshll.u32 %v5100_v13, 16  ;;  %v217_v45 = vld [vmem:[%s5095_s28 + $0x48] sm:$0xff] }
  0x17   : > { %6507 = vst [vmem:[#allocation4_spill] sm:$0xff] %v5107_v18  ;;  %v1031_v28 = vrot.slane %v5107_v18, 4  ;;  %v290_v29 = vshrl.u32 %v5102_v14, 16  ;;  %v293_v30 = vshll.u32 %v5102_v14, 16  ;;  %v5121_v31 = vpack.c.bf16 %v214_v21, %v213_v17  ;;  %v218_v50 = vld [vmem:[%s5095_s28 + $0x50] sm:$0xff]  ;;  %v219_v51 = vld [vmem:[%s5095_s28 + $0x58] sm:$0xff] }
  0x18   : > { %v5126_v32 = vsel %vm1025_vm2, %v6456_v24, %v1029_v25  ;;  %v283_v33 = vrot.slane %v281_v26, 3  ;;  %v286_v34 = vrot.slane %v284_v27, 4  ;;  %v5132_v35 = vpack.c.bf16 %v216_v23, %v215_v22  ;;  %v220_v52 = vld [vmem:[%s5095_s28 + $0x60] sm:$0xff]  ;;  %v221_v59 = vld [vmem:[%s5095_s28 + $0x68] sm:$0xff]  ;;  %v222_v60 = vld [vmem:[%s5095_s28 + $0x70] sm:$0xff] }
  0x19   : > { %6508 = vst [vmem:[#allocation5_spill] sm:$0xff] %v5121_v31  ;;  %4455 = vmatprep.mubr.msk.bf16.mxu0 %vm451_vm1, %v5126_v32  ;;  %v5137_v36 = vsel %vm1025_vm2, %v1029_v25, %v1031_v28  ;;  %v292_v37 = vrot.slane %v290_v29, 3  ;;  %v295_v38 = vrot.slane %v293_v30, 4  ;;  %v1033_v39 = vrot.slane %v5121_v31, 4  ;;  %v223_v22 = vld [vmem:[%s5095_s28 + $0x78] sm:$0xff]  ;;  %v224_v23 = vld [vmem:[%s5095_s28 + $0x80] sm:$0xff] }
  0x1a   : > { %6509 = vst [vmem:[#allocation6_spill] sm:$0xff] %v5132_v35  ;;  %4456 = vmatmul.mubr.msk.bf16.vlgmr.msra.gmra.mrb[0].mxu0 %vm451_vm1, %v5137_v36  ;;  %v287_v41 = vor.u32 %v286_v34, %v283_v33  ;;  %v1035_v42 = vrot.slane %v5132_v35, 4  ;;  %v299_v43 = vshrl.u32 %v5107_v18, 16  ;;  %v302_v44 = vshll.u32 %v5107_v18, 16  ;;  %v229_v24 = vld [vmem:[%s5095_s28 + $0xa8] sm:$0xff]  ;;  %v230_v6 = vld [vmem:[%s5095_s28 + $0xb0] sm:$0xff] }
  0x1b   : > { %v296_v46 = vor.u32 %v295_v38, %v292_v37  ;;  %4496 = vmatpush3.bf16.msra.mxu0 %v2000_v20  ;;  %v5156_v47 = vsel %vm1025_vm2, %v1031_v28, %v1033_v39  ;;  %v308_v48 = vshrl.u32 %v5121_v31, 16  ;;  %v311_v49 = vshll.u32 %v5121_v31, 16 }
  0x1c   : > { %v288_v53 = vsel %vm271_vm3, %v279_v19, %v287_v41  ;;  %4459 = vmatprep.mubr.msk.bf16.mxu0 %vm451_vm1, %v5156_v47  ;;  %v301_v55 = vrot.slane %v299_v43, 3  ;;  %v304_v56 = vrot.slane %v302_v44, 4  ;;  %4991 = vmatprep.subr.msk.bf16.mxu0 %vm512_vm0, %v5147_v40  ;;  %v5191_v1 = vpack.c.bf16 %v218_v50, %v217_v45 }
  0x1d   : > { %4287 = vmatprep.mubr.msk.bf16.mxu1 %vm451_vm1, %v288_v53  ;;  %v5176_v57 = vsel %vm271_vm3, %v287_v41, %v296_v46  ;;  %v310_v58 = vrot.slane %v308_v48, 3  ;;  %v313_v63 = vrot.slane %v311_v49, 4  ;;  %v5193_v3 = vpack.c.bf16 %v220_v52, %v219_v51  ;;  %v225_v41 = vld [vmem:[%s5095_s28 + $0x88] sm:$0xff] }
  0x1e   : > { %4288 = vmatmul.mubr.msk.bf16.vlgmr.msra.gmra.mrb[0].mxu1 %vm451_vm1, %v5176_v57  ;;  %v305_v62 = vor.u32 %v304_v56, %v301_v55  ;;  %v5196_v4 = vsel %vm1025_vm2, %v1033_v39, %v1035_v42  ;;  %v317_v5 = vshrl.u32 %v5132_v35, 16  ;;  %v320_v7 = vshll.u32 %v5132_v35, 16 }
  0x1f   : > { %4328 = vmatpush3.bf16.msra.mxu1 %v829_v54  ;;  %v314_v10 = vor.u32 %v313_v63, %v310_v58  ;;  %v1037_v11 = vrot.slane %v5191_v1, 4  ;;  %v5204_v12 = vpack.c.bf16 %v222_v60, %v221_v59  ;;  %v326_v17 = vshrl.u32 %v5191_v1, 16 }
  0x20   : > { %v5201_v9 = vsel %vm271_vm3, %v296_v46, %v305_v62  ;;  %4986 = vmatprep.subr.msk.bf16.mxu1 %vm512_vm0, %v5185_v61  ;;  %v319_v15 = vrot.slane %v317_v5, 3  ;;  %v322_v16 = vrot.slane %v320_v7, 4  ;;  %v329_v19 = vshll.u32 %v5191_v1, 16 }
  0x21   : > { %4291 = vmatprep.mubr.msk.bf16.mxu1 %vm451_vm1, %v5201_v9  ;;  %v5219_v20 = vsel %vm1025_vm2, %v1035_v42, %v1037_v11  ;;  %v1039_v21 = vrot.slane %v5193_v3, 4  ;;  %v5225_v25 = vsel %vm271_vm3, %v305_v62, %v314_v10  ;;  %v328_v33 = vrot.slane %v326_v17, 3  ;;  %v226_v42 = vld [vmem:[%s5095_s28 + $0x90] sm:$0xff] }
  0x22   : > { %4460 = vmatmul.mubr.msk.bf16.gmra.mrb[4].mxu0 %vm451_vm1, %v5196_v4  ;;  %v323_v28 = vor.u32 %v322_v16, %v319_v15  ;;  %v331_v34 = vrot.slane %v329_v19, 4  ;;  %v1041_v37 = vrot.slane %v5204_v12, 4  ;;  %v6468_v38 = vshrl.u32 %v5193_v3, 16  ;;  %v227_v15 = vld [vmem:[%s5095_s28 + $0x98] sm:$0xff]  ;;  %v228_v16 = vld [vmem:[%s5095_s28 + $0xa0] sm:$0xff] }
  0x23   : > { %4463 = vmatprep.mubr.msk.bf16.mxu0 %vm451_vm1, %v5219_v20  ;;  %v6462_v39 = vshll.u32 %v5193_v3, 16  ;;  %v5241_v46 = vpack.c.bf16 %v224_v23, %v223_v22  ;;  %v6461_v52 = vshrl.u32 %v5204_v12, 16  ;;  %v6460_v53 = vshll.u32 %v5204_v12, 16 }
  0x24   : > { %v5239_v45 = vsel %vm271_vm3, %v314_v10, %v323_v28  ;;  %v337_v50 = vrot.slane %v6468_v38, 3  ;;  %v5252_v54 = vsel %vm1025_vm2, %v1037_v11, %v1039_v21  ;;  %v332_v55 = vor.u32 %v331_v34, %v328_v33  ;;  %v236_v38 = vld [vmem:[%s5095_s28 + $0xe0] sm:$0xff] }
  0x25   : > { %6510 = vst [vmem:[#allocation7_spill] sm:$0xff] %v5239_v45  ;;  %v340_v51 = vrot.slane %v6462_v39, 4  ;;  %v5256_v56 = vpack.c.bf16 %v226_v42, %v225_v41  ;;  %v5259_v58 = vsel %vm1025_vm2, %v1039_v21, %v1041_v37  ;;  %v6459_v60 = vshrl.u32 %v5241_v46, 16 }
  0x26   : > { %4292 = vmatmul.mubr.msk.bf16.gmra.mrb[4].mxu1 %vm451_vm1, %v5225_v25  ;;  %v6458_v62 = vshll.u32 %v5241_v46, 16  ;;  %v1043_v63 = vrot.slane %v5241_v46, 4  ;;  %v346_v10 = vrot.slane %v6461_v52, 3  ;;  %v349_v11 = vrot.slane %v6460_v53, 4  ;;  %v232_v53 = vld [vmem:[%s5095_s28 + $0xc0] sm:$0xff] }
  0x27   : > { %4295 = vmatprep.mubr.msk.bf16.mxu1 %vm451_vm1, %v5239_v45  ;;  %v341_v59 = vor.u32 %v340_v51, %v337_v50  ;;  %v5273_v21 = vsel %vm271_vm3, %v323_v28, %v332_v55  ;;  %v1045_v22 = vrot.slane %v5256_v56, 4  ;;  %v355_v33 = vrot.slane %v6459_v60, 3  ;;  %v231_v60 = vld [vmem:[%s5095_s28 + $0xb8] sm:$0xff] }
  0x28   : > { %6511 = vst [vmem:[#allocation8_spill] sm:$0xff] %v5273_v21  ;;  %v358_v34 = vrot.slane %v6458_v62, 4  ;;  %v5285_v41 = vpack.c.bf16 %v228_v16, %v227_v15  ;;  %v5290_v28 = vsel %vm1025_vm2, %v1041_v37, %v1043_v63  ;;  %v350_v42 = vor.u32 %v349_v11, %v346_v10 }
  0x29   : > { %v5279_v23 = vsel %vm271_vm3, %v332_v55, %v341_v59  ;;  %v6463_v50 = vshrl.u32 %v5256_v56, 16  ;;  %v6466_v51 = vshll.u32 %v5256_v56, 16  ;;  %v5297_v55 = vsel %vm1025_vm2, %v1043_v63, %v1045_v22 }
  0x2a   : > { %4464 = vmatmul.mubr.msk.bf16.gmra.mrb[8].mxu0 %vm451_vm1, %v5252_v54  ;;  %6512 = vst [vmem:[#allocation9_spill] sm:$0xff] %v5279_v23  ;;  %v1858_v15 = vrot.slane %v281_v26, 4  ;;  %v6464_v16 = vshrl.u32 %v5285_v41, 16  ;;  %v6465_v37 = vshll.u32 %v5285_v41, 16  ;;  %v359_v10 = vor.u32 %v358_v34, %v355_v33 }
  0x2b   : > { %4467 = vmatprep.mubr.msk.bf16.mxu0 %vm451_vm1, %v5259_v58  ;;  %v1859_v11 = vrot.slane %v284_v27, 5  ;;  %v1861_v62 = vrot.slane %v290_v29, 4  ;;  %v1862_v63 = vrot.slane %v293_v30, 5  ;;  %v6467_v26 = vrot.slane %v5285_v41, 4 }
  0x2c   : > { %v364_v52 = vrot.slane %v6463_v50, 3  ;;  %v5318_v33 = vpack.c.bf16 %v230_v6, %v229_v24  ;;  %v5321_v27 = vsel %vm271_vm3, %v341_v59, %v350_v42  ;;  %v367_v29 = vrot.slane %v6466_v51, 4  ;;  %v233_v51 = vld [vmem:[%s5095_s28 + $0xc8] sm:$0xff] }
  0x2d   : > { %6513 = vst [vmem:[#allocation10_spill] sm:$0xff] %v5321_v27  ;;  %v373_v30 = vrot.slane %v6464_v16, 3  ;;  %v376_v34 = vrot.slane %v6465_v37, 4  ;;  %v5332_v39 = vsel %vm271_vm3, %v350_v42, %v359_v10  ;;  %v1860_v6 = vor.u32 %v1859_v11, %v1858_v15 }
  0x2e   : > { %4296 = vmatmul.mubr.msk.bf16.gmra.mrb[8].mxu1 %vm451_vm1, %v5273_v21  ;;  %6514 = vst [vmem:[#allocation11_spill] sm:$0xff] %v5332_v39  ;;  %v1863_v24 = vor.u32 %v1862_v63, %v1861_v62  ;;  %v5334_v50 = vpack.c.bf16 %v232_v53, %v231_v60  ;;  %v1865_v59 = vrot.slane %v299_v43, 4  ;;  %v1866_v16 = vrot.slane %v302_v44, 5 }
  0x2f   : > { %4299 = vmatprep.mubr.msk.bf16.mxu1 %vm451_vm1, %v5279_v23  ;;  %v6469_v42 = vshrl.u32 %v5318_v33, 16  ;;  %v6472_v62 = vshll.u32 %v5318_v33, 16  ;;  %v5347_v53 = vsel %vm1025_vm2, %v1045_v22, %v6467_v26  ;;  %v368_v43 = vor.u32 %v367_v29, %v364_v52  ;;  %v234_v22 = vld [vmem:[%s5095_s28 + $0xd0] sm:$0xff]  ;;  %v235_v26 = vld [vmem:[%s5095_s28 + $0xd8] sm:$0xff] }
  0x30   : > { %v377_v60 = vor.u32 %v376_v34, %v373_v30  ;;  %v1869_v44 = vrot.slane %v308_v48, 4  ;;  %v1864_v15 = vsel %vm1857_vm4, %v1860_v6, %v1863_v24  ;;  %v1870_v11 = vrot.slane %v311_v49, 5 }
  0x31   : > { %v6471_v63 = vshrl.u32 %v5334_v50, 16  ;;  %v6470_v37 = vshll.u32 %v5334_v50, 16  ;;  %v1867_v52 = vor.u32 %v1866_v16, %v1865_v59  ;;  %v382_v48 = vrot.slane %v6469_v42, 3 }
  0x32   : > { %4468 = vmatmul.mubr.msk.bf16.gmra.mrb[12].mxu0 %vm451_vm1, %v5290_v28  ;;  %v385_v29 = vrot.slane %v6472_v62, 4  ;;  %v5369_v49 = vsel %vm271_vm3, %v359_v10, %v368_v43  ;;  %v5373_v30 = vsel %vm271_vm3, %v368_v43, %v377_v60  ;;  %v5375_v34 = vpack.c.bf16 %v234_v22, %v233_v51  ;;  %v5414_v62 = vld [vmem:[%s6452_s1 + $0xe] sm:$0x3] }
  0x33   : > { %4471 = vmatprep.mubr.msk.bf16.mxu0 %vm451_vm1, %v5297_v55  ;;  %6515 = vst [vmem:[#allocation12_spill] sm:$0xff] %v5369_v49  ;;  %6516 = vst [vmem:[#allocation13_spill] sm:$0xff] %v5373_v30  ;;  %v1871_v6 = vor.u32 %v1870_v11, %v1869_v44  ;;  %v391_v16 = vrot.slane %v6471_v63, 3  ;;  %v394_v59 = vrot.slane %v6470_v37, 4  ;;  %v5381_v42 = vpack.c.bf16 %v236_v38, %v235_v26  ;;  %v239_v37 = vld [vmem:[%s5095_s28 + $0xf8] sm:$0xff]  ;;  %v240_v63 = vld [vmem:[%s5095_s28 + $0x100] sm:$0xff] }
  0x34   : > { %v2243_v10 = vsel %vm512_vm0, %v5147_v40, 0  ;;  %v5388_v51 = vsel %vm1857_vm4, %v1863_v24, %v1867_v52  ;;  %v386_v43 = vor.u32 %v385_v29, %v382_v48  ;;  %v1873_v44 = vrot.slane %v317_v5, 4  ;;  %v237_v48 = vld [vmem:[%s5095_s28 + $0xe8] sm:$0xff]  ;;  %v238_v29 = vld [vmem:[%s5095_s28 + $0xf0] sm:$0xff] }
  0x35   : > { %v1874_v38 = vrot.slane %v320_v7, 5  ;;  %v6475_v40 = vshrl.u32 %v5375_v34, 16  ;;  %v6474_v26 = vshll.u32 %v5375_v34, 16  ;;  %v1878_v24 = vrot.slane %v329_v19, 5 }
  0x36   : > { %4300 = vmatmul.mubr.msk.bf16.gmra.mrb[12].mxu1 %vm451_vm1, %v5321_v27  ;;  %v5403_v11 = vsel %vm1857_vm4, %v1867_v52, %v1871_v6  ;;  %v395_v5 = vor.u32 %v394_v59, %v391_v16  ;;  %v5427_v7 = vpack.c.bf16 %v238_v29, %v237_v48  ;;  %v6523_v29 = vshrl.u32 %v5204_v12, 16  ;;  %v244_v27 = vld [vmem:[%s5095_s28 + $0x120] sm:$0xff] }
  0x37   : > { %4303 = vmatprep.mubr.msk.bf16.mxu1 %vm451_vm1, %v5332_v39  ;;  %v1875_v19 = vor.u32 %v1874_v38, %v1873_v44  ;;  %v400_v52 = vrot.slane %v6475_v40, 3  ;;  %v403_v16 = vrot.slane %v6474_v26, 4  ;;  %v5436_v38 = vpack.c.bf16 %v240_v63, %v239_v37  ;;  %v242_v39 = vld [vmem:[%s5095_s28 + $0x110] sm:$0xff] }
  0x38   : > { %v5430_v22 = vsel %vm271_vm3, %v386_v43, %v395_v5  ;;  %v1885_v37 = vrot.slane %v6523_v29, 4  ;;  %v6524_v63 = vshll.u32 %v5204_v12, 16 }
  0x39   : > { %6518 = vst [vmem:[#allocation15_spill] sm:$0xff] %v5430_v22  ;;  %v404_v26 = vor.u32 %v403_v16, %v400_v52 }
  0x3a   : > { %4472 = vmatmul.mubr.msk.bf16.gmra.mrb[16].mxu0 %vm451_vm1, %v5347_v53 }
  0x3b   : > { %4497 = vmatprep.mubr.msk.bf16.mxu0 %vm451_vm1, %v1864_v15  ;;  %v1877_v15 = vrot.slane %v326_v17, 4  ;;  %v5419_v17 = vsel %vm271_vm3, %v377_v60, %v386_v43  ;;  %v6519_v60 = vshrl.u32 %v5381_v42, 16  ;;  %v5469_v40 = vsel %vm271_vm3, %v395_v5, %v404_v26 }
  0x3c   : > { %6517 = vst [vmem:[#allocation14_spill] sm:$0xff] %v5419_v17  ;;  %6525 = vst [vmem:[#allocation16_spill] sm:$0xff] %v5469_v40  ;;  %v6529_v5 = vshll.u32 %v5436_v38, 16 }
  0x3d   : > { %v1879_v59 = vor.u32 %v1878_v24, %v1877_v15  ;;  %v6521_v15 = vshrl.u32 %v5193_v3, 16  ;;  %v6522_v24 = vshll.u32 %v5193_v3, 16 }
  0x3e   : > { %4304 = vmatmul.mubr.msk.bf16.gmra.mrb[16].mxu1 %vm451_vm1, %v5369_v49 }
  0x3f   : > { %4307 = vmatprep.mubr.msk.bf16.mxu1 %vm451_vm1, %v5373_v30  ;;  %v409_v30 = vrot.slane %v6519_v60, 3  ;;  %v1881_v43 = vrot.slane %v6521_v15, 4  ;;  %v1882_v48 = vrot.slane %v6522_v24, 5  ;;  %v1886_v60 = vrot.slane %v6524_v63, 5  ;;  %v241_v63 = vld [vmem:[%s5095_s28 + $0x108] sm:$0xff] }
  0x40   : > { %v6480_v15 = vshll.u32 %v5427_v7, 16  ;;  %v5477_v49 = vpack.c.bf16 %v242_v39, %v241_v63 }
  0x41   : > { %v1883_v52 = vor.u32 %v1882_v48, %v1881_v43  ;;  %v1887_v16 = vor.u32 %v1886_v60, %v1885_v37  ;;  %v6528_v43 = vshrl.u32 %v5436_v38, 16  ;;  %v430_v37 = vrot.slane %v6529_v5, 4 }
  0x42   : > { %4498 = vmatmul.mubr.msk.bf16.vlgmr.msra.gmra.mrb[0].mxu0 %vm451_vm1, %v5388_v51  ;;  %v6485_v5 = vshll.u32 %v5477_v49, 16 }
  0x43   : > { %4538 = vmatpush3.bf16.msra.mxu0 %v2243_v10  ;;  %4501 = vmatprep.mubr.msk.bf16.mxu0 %vm451_vm1, %v5403_v11  ;;  %v6520_v10 = vshll.u32 %v5381_v42, 16  ;;  %v427_v48 = vrot.slane %v6528_v43, 3  ;;  %v5494_v39 = vsel %vm1857_vm4, %v1883_v52, %v1887_v16 }
  0x44   : > { %4992 = vmatprep.subr.msk.bf16.mxu0 %vm512_vm0, %v5414_v62 }
  0x45   : > { %v412_v44 = vrot.slane %v6520_v10, 4  ;;  %v5451_v10 = vsel %vm1857_vm4, %v1871_v6, %v1875_v19  ;;  %v243_v6 = vld [vmem:[%s5095_s28 + $0x118] sm:$0xff] }
  0x46   : > { %4308 = vmatmul.mubr.msk.bf16.gmra.mrb[20].mxu1 %vm451_vm1, %v5419_v17  ;;  %v5458_v17 = vsel %vm1857_vm4, %v1875_v19, %v1879_v59  ;;  %v5486_v60 = vpack.c.bf16 %v244_v27, %v243_v6  ;;  %v6488_v6 = vshrl.u32 %v5477_v49, 16 }
  0x47   : > { %4311 = vmatprep.mubr.msk.bf16.mxu1 %vm451_vm1, %v5430_v22  ;;  %v413_v24 = vor.u32 %v412_v44, %v409_v30  ;;  %v6526_v30 = vshrl.u32 %v5427_v7, 16  ;;  %v421_v44 = vrot.slane %v6480_v15, 4  ;;  %v6531_v15 = vshll.u32 %v5241_v46, 16 }
  0x48   : > { %v431_v22 = vor.u32 %v430_v37, %v427_v48  ;;  %v6487_v8 = vshll.u32 %v5486_v60, 16  ;;  %v439_v48 = vrot.slane %v6485_v5, 4 }
  0x49   : > { %v418_v19 = vrot.slane %v6526_v30, 3  ;;  %v5480_v29 = vsel %vm271_vm3, %v404_v26, %v413_v24  ;;  %v5491_v30 = vsel %vm1857_vm4, %v1879_v59, %v1883_v52  ;;  %v6530_v26 = vshrl.u32 %v5241_v46, 16 }
  0x4a   : > { %4502 = vmatmul.mubr.msk.bf16.gmra.mrb[4].mxu0 %vm451_vm1, %v5451_v10  ;;  %6527 = vst [vmem:[#allocation17_spill] sm:$0xff] %v5480_v29  ;;  %v1890_v43 = vrot.slane %v6531_v15, 5  ;;  %v6532_v59 = vshrl.u32 %v5256_v56, 16  ;;  %v6533_v52 = vshll.u32 %v5256_v56, 16 }
  0x4b   : > { %4505 = vmatprep.mubr.msk.bf16.mxu0 %vm451_vm1, %v5458_v17  ;;  %v1889_v63 = vrot.slane %v6530_v26, 4  ;;  %v422_v27 = vor.u32 %v421_v44, %v418_v19  ;;  %v6486_v26 = vshrl.u32 %v5486_v60, 16  ;;  %v436_v44 = vrot.slane %v6488_v6, 3 }
  0x4c   : > { %v1894_v23 = vrot.slane %v6533_v52, 5  ;;  %v6539_v6 = vshrl.u32 %v5318_v33, 16 }
  0x4d   : > { %v5513_v15 = vsel %vm271_vm3, %v413_v24, %v422_v27  ;;  %v1891_v19 = vor.u32 %v1890_v43, %v1889_v63  ;;  %v5522_v37 = vsel %vm271_vm3, %v422_v27, %v431_v22  ;;  %v445_v52 = vrot.slane %v6486_v26, 3 }
  0x4e   : > { %4312 = vmatmul.mubr.msk.bf16.gmra.mrb[24].mxu1 %vm451_vm1, %v5469_v40  ;;  %v1893_v40 = vrot.slane %v6532_v59, 4  ;;  %6534 = vst [vmem:[#allocation18_spill] sm:$0xff] %v5513_v15  ;;  %6535 = vst [vmem:[#allocation19_spill] sm:$0xff] %v5522_v37  ;;  %v448_v24 = vrot.slane %v6487_v8, 4  ;;  %v440_v43 = vor.u32 %v439_v48, %v436_v44  ;;  %v6536_v27 = vshrl.u32 %v5285_v41, 16 }
  0x4f   : > { %4315 = vmatprep.mubr.msk.bf16.mxu1 %vm451_vm1, %v5480_v29  ;;  %v5531_v63 = vsel %vm1857_vm4, %v1887_v16, %v1891_v19  ;;  %v6540_v16 = vshll.u32 %v5318_v33, 16 }
  0x50   : > { %v1895_v59 = vor.u32 %v1894_v23, %v1893_v40  ;;  %v1897_v5 = vrot.slane %v6536_v27, 4  ;;  %v6537_v23 = vshll.u32 %v5285_v41, 16  ;;  %v5542_v8 = vor.u32 %v448_v24, %v445_v52 }
  0x51   : > { %v1902_v29 = vrot.slane %v6540_v16, 5  ;;  %v5551_v44 = vsel %vm271_vm3, %v431_v22, %v440_v43  ;;  %v6543_v22 = vshrl.u32 %v5334_v50, 16  ;;  %v6544_v27 = vshll.u32 %v5334_v50, 16 }
  0x52   : > { %4506 = vmatmul.mubr.msk.bf16.gmra.mrb[8].mxu0 %vm451_vm1, %v5491_v30  ;;  %v1898_v40 = vrot.slane %v6537_v23, 5  ;;  %v5540_v26 = vsel %vm1857_vm4, %v1891_v19, %v1895_v59  ;;  %6538 = vst [vmem:[#allocation20_spill] sm:$0xff] %v5542_v8  ;;  %6541 = vst [vmem:[#allocation21_spill] sm:$0xff] %v5551_v44  ;;  %v5557_v19 = vsel %vm271_vm3, %v440_v43, %v5542_v8  ;;  %v6492_v23 = vmov 0.0|0.0  }
  0x53   : > { %4509 = vmatprep.mubr.msk.bf16.mxu0 %vm451_vm1, %v5494_v39  ;;  %6542 = vst [vmem:[#allocation22_spill] sm:$0xff] %v5557_v19  ;;  %v1905_v24 = vrot.slane %v6543_v22, 4  ;;  %v729_v43 = vrot.slane %v6492_v23, 3  ;;  %v6546_v16 = vshll.u32 %v5375_v34, 16 }
  0x54   : > { %v1899_v48 = vor.u32 %v1898_v40, %v1897_v5  ;;  %v1906_v5 = vrot.slane %v6544_v27, 5 }
  0x56   : > { %4316 = vmatmul.mubr.msk.bf16.gmra.mrb[28].mxu1 %vm451_vm1, %v5513_v15  ;;  %v1901_v15 = vrot.slane %v6539_v6, 4  ;;  %v5562_v6 = vsel %vm1857_vm4, %v1895_v59, %v1899_v48  ;;  %v6545_v59 = vshrl.u32 %v5375_v34, 16  ;;  %v1907_v22 = vor.u32 %v1906_v5, %v1905_v24 }
  0x57   : > { %4319 = vmatprep.mubr.msk.bf16.mxu1 %vm451_vm1, %v5522_v37  ;;  %v6548_v24 = vshll.u32 %v5381_v42, 16 }
  0x58   : > { %v1903_v52 = vor.u32 %v1902_v29, %v1901_v15  ;;  %v730_v15 = vrot.slane %v5100_v13, 3  ;;  %v1909_v40 = vrot.slane %v6545_v59, 4  ;;  %v732_v59 = vrot.slane %v5102_v14, 3  ;;  %v245_v14 = vld [vmem:[%s5095_s28 + $0x128] sm:$0xff] }
  0x59   : > { %v1914_v5 = vrot.slane %v6548_v24, 5 }
  0x5a   : > { %4510 = vmatmul.mubr.msk.bf16.gmra.mrb[12].mxu0 %vm451_vm1, %v5531_v63  ;;  %v5572_v29 = vsel %vm1857_vm4, %v1899_v48, %v1903_v52  ;;  %v731_v27 = vsel %vm728_vm5, %v729_v43, %v730_v15  ;;  %v5587_v23 = vsel %vm1857_vm4, %v1903_v52, %v1907_v22  ;;  %v734_v43 = vrot.slane %v5107_v18, 3 }
  0x5b   : > { %4513 = vmatprep.mubr.msk.bf16.mxu0 %vm451_vm1, %v5540_v26  ;;  %v6549_v52 = vshrl.u32 %v5427_v7, 16  ;;  %v733_v37 = vsel %vm728_vm5, %v730_v15, %v732_v59  ;;  %v736_v15 = vrot.slane %v5121_v31, 3 }
  0x5c   : > { %v735_v24 = vsel %vm728_vm5, %v732_v59, %v734_v43 }
  0x5e   : > { %4320 = vmatmul.mubr.msk.bf16.gmra.mrb[32].mxu1 %vm451_vm1, %v5551_v44 }
  0x5f   : > { %4323 = vmatprep.mubr.msk.bf16.mxu1 %vm451_vm1, %v5557_v19  ;;  %v1910_v19 = vrot.slane %v6546_v16, 5  ;;  %v6547_v16 = vshrl.u32 %v5381_v42, 16 }
  0x61   : > { %v1911_v48 = vor.u32 %v1910_v19, %v1909_v40  ;;  %v1913_v44 = vrot.slane %v6547_v16, 4  ;;  %v1917_v40 = vrot.slane %v6549_v52, 4  ;;  %v246_v52 = vld [vmem:[%s5095_s28 + $0x130] sm:$0xff]  ;;  %s206_s28 = scalar_lea.vmem %s6455_s4, %s6586_s16 }
  0x62   : > { %4514 = vmatmul.mubr.msk.bf16.gmra.mrb[16].mxu0 %vm451_vm1, %v5562_v6  ;;  %v5636_v45 = vpack.c.bf16 %v246_v52, %v245_v14 }
  0x63   : > { %4517 = vmatprep.mubr.msk.bf16.mxu0 %vm451_vm1, %v5572_v29  ;;  %v5596_v19 = vsel %vm1857_vm4, %v1907_v22, %v1911_v48  ;;  %v1915_v16 = vor.u32 %v1914_v5, %v1913_v44  ;;  %v1126_v22 = vsel %vm512_vm0, %v5185_v61, 0  ;;  %v6551_v61 = vshrl.u32 %v5436_v38, 16 }
  0x64   : > { %v6552_v5 = vshll.u32 %v5436_v38, 16  ;;  %v6503_v14 = vshll.u32 %v5636_v45, 16 }
  0x65   : > { %v5621_v44 = vsel %vm1857_vm4, %v1911_v48, %v1915_v16  ;;  %v1921_v59 = vrot.slane %v6551_v61, 4 }
  0x66   : > { %4324 = vmatmul.mubr.msk.bf16.gmra.mrb[36].mxu1 %vm451_vm1, %v5542_v8  ;;  %v6550_v8 = vshll.u32 %v5427_v7, 16 }
  0x67   : > { %4329 = vmatprep.mubr.msk.bf16.mxu1 %vm451_vm1, %v731_v27 }
  0x68   : > { %v1918_v27 = vrot.slane %v6550_v8, 5  ;;  %v5616_v8 = vld [vmem:[%s6452_s1 + $0x6] sm:$0x3] }
  0x6a   : > { %4518 = vmatmul.mubr.msk.bf16.gmra.mrb[20].mxu0 %vm451_vm1, %v5587_v23  ;;  %v1919_v18 = vor.u32 %v1918_v27, %v1917_v40  ;;  %v1922_v40 = vrot.slane %v6552_v5, 5  ;;  %v738_v27 = vrot.slane %v5132_v35, 3 }
  0x6b   : > { %4521 = vmatprep.mubr.msk.bf16.mxu0 %vm451_vm1, %v5596_v19 }
  0x6c   : > { %v5630_v21 = vsel %vm1857_vm4, %v1915_v16, %v1919_v18  ;;  %v1923_v16 = vor.u32 %v1922_v40, %v1921_v59  ;;  %v739_v61 = vsel %vm728_vm5, %v736_v15, %v738_v27  ;;  %v6556_v59 = vshll.u32 %v5486_v60, 16 }
  0x6d   : > { %v742_v40 = vrot.slane %v5193_v3, 3 }
  0x6e   : > { %4330 = vmatmul.mubr.msk.bf16.vlgmr.msra.gmra.mrb[0].mxu1 %vm451_vm1, %v733_v37  ;;  %v6553_v37 = vshrl.u32 %v5477_v49, 16  ;;  %v5650_v52 = vsel %vm1857_vm4, %v1919_v18, %v1923_v16  ;;  %v1934_v18 = vrot.slane %v6503_v14, 5  ;;  %v744_v14 = vrot.slane %v5204_v12, 3 }
  0x6f   : > { %4370 = vmatpush3.bf16.msra.mxu1 %v1126_v22  ;;  %4333 = vmatprep.mubr.msk.bf16.mxu1 %vm451_vm1, %v735_v24  ;;  %v6554_v22 = vshll.u32 %v5477_v49, 16  ;;  %v737_v24 = vsel %vm728_vm5, %v734_v43, %v736_v15  ;;  %v740_v43 = vrot.slane %v5191_v1, 3  ;;  %v1930_v15 = vrot.slane %v6556_v59, 5 }
  0x70   : > { %v1925_v31 = vrot.slane %v6553_v37, 4  ;;  %4987 = vmatprep.subr.msk.bf16.mxu1 %vm512_vm0, %v5616_v8  ;;  %v6504_v37 = vshrl.u32 %v5636_v45, 16 }
  0x71   : > { %v1926_v48 = vrot.slane %v6554_v22, 5  ;;  %v6555_v22 = vshrl.u32 %v5486_v60, 16 }
  0x72   : > { %4522 = vmatmul.mubr.msk.bf16.gmra.mrb[24].mxu0 %vm451_vm1, %v5621_v44 }
  0x73   : > { %4525 = vmatprep.mubr.msk.bf16.mxu0 %vm451_vm1, %v5630_v21  ;;  %v1927_v5 = vor.u32 %v1926_v48, %v1925_v31  ;;  %v1929_v35 = vrot.slane %v6555_v22, 4  ;;  %v1933_v48 = vrot.slane %v6504_v37, 4  ;;  %v746_v37 = vrot.slane %v5241_v46, 3 }
  0x75   : > { %v5659_v31 = vsel %vm1857_vm4, %v1923_v16, %v1927_v5  ;;  %v743_v16 = vsel %vm728_vm5, %v740_v43, %v742_v40  ;;  %v5672_v22 = vor.u32 %v1934_v18, %v1933_v48  ;;  %v748_v18 = vrot.slane %v5256_v56, 3 }
  0x76   : > { %4334 = vmatmul.mubr.msk.bf16.gmra.mrb[4].mxu1 %vm451_vm1, %v737_v24  ;;  %v741_v24 = vsel %vm728_vm5, %v738_v27, %v740_v43 }
  0x77   : > { %4337 = vmatprep.mubr.msk.bf16.mxu1 %vm451_vm1, %v739_v61  ;;  %v1931_v61 = vor.u32 %v1930_v15, %v1929_v35  ;;  %v745_v35 = vsel %vm728_vm5, %v742_v40, %v744_v14  ;;  %v747_v15 = vsel %vm728_vm5, %v744_v14, %v746_v37  ;;  %v750_v40 = vrot.slane %v5285_v41, 3 }
  0x79   : > { %v5676_v59 = vsel %vm1857_vm4, %v1927_v5, %v1931_v61  ;;  %v5682_v27 = vsel %vm1857_vm4, %v1931_v61, %v5672_v22  ;;  %v6557_v5 = vmov 0   ;;  %v751_v14 = vsel %vm728_vm5, %v748_v18, %v750_v40 }
  0x7a   : > { %4526 = vmatmul.mubr.msk.bf16.gmra.mrb[28].mxu0 %vm451_vm1, %v5650_v52  ;;  %v5691_v43 = vrot.slane %v6557_v5, 5  ;;  %v752_v61 = vrot.slane %v5318_v33, 3 }
  0x7b   : > { %4529 = vmatprep.mubr.msk.bf16.mxu0 %vm451_vm1, %v5659_v31 }
  0x7c   : > { %v1938_v48 = vsel %vm1857_vm4, %v5672_v22, %v5691_v43  ;;  %v753_v5 = vsel %vm728_vm5, %v750_v40, %v752_v61 }
  0x7e   : > { %4338 = vmatmul.mubr.msk.bf16.gmra.mrb[8].mxu1 %vm451_vm1, %v741_v24  ;;  %v749_v24 = vsel %vm728_vm5, %v746_v37, %v748_v18  ;;  %v5715_v37 = vld [vmem:[%s6452_s1 + $0x10] sm:$0x3] }
  0x7f   : > { %4341 = vmatprep.mubr.msk.bf16.mxu1 %vm451_vm1, %v743_v16  ;;  %v2489_v16 = vsel %vm512_vm0, %v5414_v62, 0  ;;  %v756_v62 = vrot.slane %v5375_v34, 3 }
  0x82   : > { %4530 = vmatmul.mubr.msk.bf16.gmra.mrb[32].mxu0 %vm451_vm1, %v5676_v59 }
  0x83   : > { %4533 = vmatprep.mubr.msk.bf16.mxu0 %vm451_vm1, %v5682_v27 }
  0x86   : > { %4342 = vmatmul.mubr.msk.bf16.gmra.mrb[12].mxu1 %vm451_vm1, %v745_v35  ;;  %v754_v35 = vrot.slane %v5334_v50, 3 }
  0x87   : > { %4345 = vmatprep.mubr.msk.bf16.mxu1 %vm451_vm1, %v747_v15 }
  0x88   : > { %v755_v15 = vsel %vm728_vm5, %v752_v61, %v754_v35  ;;  %v757_v18 = vsel %vm728_vm5, %v754_v35, %v756_v62  ;;  %v764_v35 = vrot.slane %v5477_v49, 3 }
  0x8a   : > { %4534 = vmatmul.mubr.msk.bf16.gmra.mrb[36].mxu0 %vm451_vm1, %v1938_v48  ;;  %v758_v48 = vrot.slane %v5381_v42, 3 }
  0x8b   : > { %4539 = vmatprep.mubr.msk.bf16.mxu0 %vm451_vm1, %v5137_v36 }
  0x8c   : > { %v759_v40 = vsel %vm728_vm5, %v756_v62, %v758_v48  ;;  %v1049_v62 = vrot.slane %v5318_v33, 4 }
  0x8e   : > { %4346 = vmatmul.mubr.msk.bf16.gmra.mrb[16].mxu1 %vm451_vm1, %v749_v24  ;;  %v760_v24 = vrot.slane %v5427_v7, 3 }
  0x8f   : > { %4349 = vmatprep.mubr.msk.bf16.mxu1 %vm451_vm1, %v751_v14  ;;  %v762_v14 = vrot.slane %v5436_v38, 3 }
  0x90   : > { %v761_v61 = vsel %vm728_vm5, %v758_v48, %v760_v24 }
  0x92   : > { %4540 = vmatmul.mubr.msk.bf16.vlgmr.msra.gmra.mrb[0].mxu0 %vm451_vm1, %v5156_v47 }
  0x93   : > { %4580 = vmatpush3.bf16.msra.mxu0 %v2489_v16  ;;  %4543 = vmatprep.mubr.msk.bf16.mxu0 %vm451_vm1, %v5196_v4  ;;  %v763_v16 = vsel %vm728_vm5, %v760_v24, %v762_v14 }
  0x94   : > { %4993 = vmatprep.subr.msk.bf16.mxu0 %vm512_vm0, %v5715_v37 }
  0x96   : > { %4350 = vmatmul.mubr.msk.bf16.gmra.mrb[20].mxu1 %vm451_vm1, %v753_v5  ;;  %v766_v5 = vrot.slane %v5486_v60, 3 }
  0x97   : > { %4353 = vmatprep.mubr.msk.bf16.mxu1 %vm451_vm1, %v755_v15  ;;  %v765_v15 = vsel %vm728_vm5, %v762_v14, %v764_v35 }
  0x98   : > { %v767_v48 = vsel %vm728_vm5, %v764_v35, %v766_v5  ;;  %v1053_v35 = vrot.slane %v5375_v34, 4 }
  0x9a   : > { %4544 = vmatmul.mubr.msk.bf16.gmra.mrb[4].mxu0 %vm451_vm1, %v5219_v20 }
  0x9b   : > { %4547 = vmatprep.mubr.msk.bf16.mxu0 %vm451_vm1, %v5252_v54 }
  0x9e   : > { %4354 = vmatmul.mubr.msk.bf16.gmra.mrb[24].mxu1 %vm451_vm1, %v757_v18  ;;  %v1051_v18 = vrot.slane %v5334_v50, 4 }
  0x9f   : > { %4357 = vmatprep.mubr.msk.bf16.mxu1 %vm451_vm1, %v759_v40  ;;  %v6558_v40 = vrot.slane %v5285_v41, 4 }
  0xa0   : > { %v5765_v14 = vsel %vm1025_vm2, %v1049_v62, %v1051_v18 }
  0xa1   : > { %v5761_v24 = vsel %vm1025_vm2, %v6558_v40, %v1049_v62  ;;  %v5782_v62 = vsel %vm1025_vm2, %v1051_v18, %v1053_v35  ;;  %v3059_v18 = vld [vmem:[%s6453_s2] sm:$0xff] }
  0xa2   : > { %4548 = vmatmul.mubr.msk.bf16.gmra.mrb[8].mxu0 %vm451_vm1, %v5259_v58  ;;  %3100 = vperm.xlu0 %5008, %v3059_v18   ;;  %v3064_v18 = vld [vmem:[%s6453_s2 + $0x28] sm:$0xff] }
  0xa3   : > { %4551 = vmatprep.mubr.msk.bf16.mxu0 %vm451_vm1, %v5290_v28 }
  0xa6   : > { %4358 = vmatmul.mubr.msk.bf16.gmra.mrb[28].mxu1 %vm451_vm1, %v761_v61  ;;  %v6559_v61 = vmov 0.0|0.0  }
  0xa7   : > { %4361 = vmatprep.mubr.msk.bf16.mxu1 %vm451_vm1, %v763_v16  ;;  %v5768_v16 = vrot.slane %v6559_v61, 4 }
  0xaa   : > { %4552 = vmatmul.mubr.msk.bf16.gmra.mrb[12].mxu0 %vm451_vm1, %v5297_v55 }
  0xab   : > { %4555 = vmatprep.mubr.msk.bf16.mxu0 %vm451_vm1, %v5347_v53 }
  0xae   : > { %4362 = vmatmul.mubr.msk.bf16.gmra.mrb[32].mxu1 %vm451_vm1, %v765_v15  ;;  %v6560_v15 = vrot.slane %v5100_v13, 4  ;;  %v1057_v13 = vrot.slane %v5427_v7, 4 }
  0xaf   : > { %4365 = vmatprep.mubr.msk.bf16.mxu1 %vm451_vm1, %v767_v48  ;;  %v1055_v48 = vrot.slane %v5381_v42, 4 }
  0xb0   : > { %v1028_v40 = vsel %vm1025_vm2, %v5768_v16, %v6560_v15  ;;  %v1377_v15 = vsel %vm512_vm0, %v5616_v8, 0  ;;  %v1061_v8 = vrot.slane %v5477_v49, 4 }
  0xb1   : > { %v5786_v61 = vsel %vm1025_vm2, %v1053_v35, %v1055_v48  ;;  %v5802_v35 = vsel %vm1025_vm2, %v1055_v48, %v1057_v13  ;;  %v3063_v48 = vld [vmem:[%s6453_s2 + $0x20] sm:$0xff] }
  0xb2   : > { %4556 = vmatmul.mubr.msk.bf16.gmra.mrb[16].mxu0 %vm451_vm1, %v5761_v24 }
  0xb3   : > { %4559 = vmatprep.mubr.msk.bf16.mxu0 %vm451_vm1, %v5765_v14 }
  0xb6   : > { %4366 = vmatmul.mubr.msk.bf16.gmra.mrb[36].mxu1 %vm451_vm1, %v766_v5  ;;  %v1059_v5 = vrot.slane %v5436_v38, 4 }
  0xb7   : > { %4371 = vmatprep.mubr.msk.bf16.mxu1 %vm451_vm1, %v1028_v40 }
  0xb8   : > { %v5807_v40 = vsel %vm1025_vm2, %v1057_v13, %v1059_v5  ;;  %v5831_v13 = vsel %vm1025_vm2, %v1059_v5, %v1061_v8  ;;  %v3065_v5 = vld [vmem:[%s6453_s2 + $0x30] sm:$0xff] }
  0xba   : > { %4560 = vmatmul.mubr.msk.bf16.gmra.mrb[20].mxu0 %vm451_vm1, %v5782_v62 }
  0xbb   : > { %4563 = vmatprep.mubr.msk.bf16.mxu0 %vm451_vm1, %v5786_v61 }
  0xbe   : > { %4372 = vmatmul.mubr.msk.bf16.vlgmr.msra.gmra.mrb[0].mxu1 %vm451_vm1, %v5126_v32  ;;  %v3060_v32 = vld [vmem:[%s6453_s2 + $0x8] sm:$0xff] }
  0xbf   : > { %4412 = vmatpush3.bf16.msra.mxu1 %v1377_v15  ;;  %4375 = vmatprep.mubr.msk.bf16.mxu1 %vm451_vm1, %v5137_v36  ;;  %v5820_v36 = vrot.slane %v5486_v60, 4 }
  0xc0   : > { %4989 = vmatprep.subr.msk.bf16.mxu1 %vm512_vm0, %v5058_v0  ;;  %3105 = vperm.xlu0 %5008, %v3060_v32   ;;  %v3061_v0 = vld [vmem:[%s6453_s2 + $0x10] sm:$0xff]  ;;  %v3067_v32 = vld [vmem:[%s6453_s2 + $0x40] sm:$0xff] }
  0xc1   : > { %3110 = vperm.xlu1 %5009, %v3061_v0   ;;  %v5837_v15 = vsel %vm1025_vm2, %v1061_v8, %v5820_v36  ;;  %v3066_v0 = vld [vmem:[%s6453_s2 + $0x38] sm:$0xff] }
  0xc2   : > { %4564 = vmatmul.mubr.msk.bf16.gmra.mrb[24].mxu0 %vm451_vm1, %v5802_v35 }
  0xc3   : > { %4567 = vmatprep.mubr.msk.bf16.mxu0 %vm451_vm1, %v5807_v40 }
  0xc4   : > { %3120 = vperm.xlu0 %5008, %v3063_v48   ;;  %v3069_v48 = vld [vmem:[%s6453_s2 + $0x50] sm:$0xff] }
  0xc6   : > { %4376 = vmatmul.mubr.msk.bf16.gmra.mrb[4].mxu1 %vm451_vm1, %v5156_v47  ;;  %v3062_v47 = vld [vmem:[%s6453_s2 + $0x18] sm:$0xff] }
  0xc7   : > { %4379 = vmatprep.mubr.msk.bf16.mxu1 %vm451_vm1, %v5196_v4  ;;  %v5850_v4 = vrot.slane %v5636_v45, 4  ;;  %3115 = vperm.xlu1 %5009, %v3062_v47   ;;  %v3071_v47 = vld [vmem:[%s6453_s2 + $0x60] sm:$0xff] }
  0xc8   : > { %3130 = vperm.xlu0 %5008, %v3065_v5   ;;  %v3073_v5 = vld [vmem:[%s6453_s2 + $0x70] sm:$0xff] }
  0xc9   : > { %v5863_v8 = vsel %vm1025_vm2, %v5820_v36, %v5850_v4 }
  0xca   : > { %4568 = vmatmul.mubr.msk.bf16.gmra.mrb[28].mxu0 %vm451_vm1, %v5831_v13 }
  0xcb   : > { %4571 = vmatprep.mubr.msk.bf16.mxu0 %vm451_vm1, %v5837_v15  ;;  %3125 = vperm.xlu1 %5009, %v3064_v18   ;;  %v3077_v18 = vld [vmem:[%s6453_s2 + $0x90] sm:$0xff] }
  0xcc   : > { %3140 = vperm.xlu0 %5008, %v3067_v32   ;;  %v3083_v32 = vld [vmem:[%s6453_s2 + $0xc0] sm:$0xff] }
  0xce   : > { %4380 = vmatmul.mubr.msk.bf16.gmra.mrb[8].mxu1 %vm451_vm1, %v5219_v20  ;;  %v2235_v20 = vsel %vm1025_vm2, %v5850_v4, %v5768_v16 }
  0xcf   : > { %4383 = vmatprep.mubr.msk.bf16.mxu1 %vm451_vm1, %v5252_v54  ;;  %3135 = vperm.xlu1 %5009, %v3066_v0   ;;  %v3068_v54 = vld [vmem:[%s6453_s2 + $0x48] sm:$0xff]  ;;  %v3087_v0 = vld [vmem:[%s6453_s2 + $0xe0] sm:$0xff] }
  0xd0   : > { %3150 = vperm.xlu0 %5008, %v3069_v48   ;;  %v3089_v48 = vld [vmem:[%s6453_s2 + $0xf0] sm:$0xff] }
  0xd2   : > { %4572 = vmatmul.mubr.msk.bf16.gmra.mrb[32].mxu0 %vm451_vm1, %v5863_v8 }
  0xd3   : > { %4575 = vmatprep.mubr.msk.bf16.mxu0 %vm451_vm1, %v2235_v20  ;;  %3145 = vperm.xlu1 %5009, %v3068_v54   ;;  %v3085_v20 = vld [vmem:[%s6453_s2 + $0xd0] sm:$0xff]  ;;  %v3091_v54 = vld [vmem:[%s6453_s2 + $0x100] sm:$0xff] }
  0xd4   : > { %3160 = vperm.xlu0 %5008, %v3071_v47   ;;  %v3093_v47 = vld [vmem:[%s6453_s2 + $0x110] sm:$0xff] }
  0xd6   : > { %4384 = vmatmul.mubr.msk.bf16.gmra.mrb[12].mxu1 %vm451_vm1, %v5259_v58  ;;  %v3070_v58 = vld [vmem:[%s6453_s2 + $0x58] sm:$0xff] }
  0xd7   : > { %4387 = vmatprep.mubr.msk.bf16.mxu1 %vm451_vm1, %v5290_v28  ;;  %3155 = vperm.xlu1 %5009, %v3070_v58   ;;  %v3072_v28 = vld [vmem:[%s6453_s2 + $0x68] sm:$0xff] }
  0xd8   : > { %3170 = vperm.xlu0 %5008, %v3073_v5   ;;  %v3092_v58 = vld [vmem:[%s6453_s2 + $0x108] sm:$0xff]  ;;  %v3095_v5 = vld [vmem:[%s6453_s2 + $0x120] sm:$0xff] }
  0xda   : > { %4576 = vmatmul.mubr.msk.bf16.gmra.mrb[36].mxu0 %vm451_vm1, %v5768_v16  ;;  %v3075_v16 = vld [vmem:[%s6453_s2 + $0x80] sm:$0xff] }
  0xdb   : > { %4581 = vmatprep.mubr.msk.bf16.mxu0 %vm451_vm1, %v5388_v51  ;;  %3165 = vperm.xlu1 %5009, %v3072_v28   ;;  %v2826_v51 = vsel %vm512_vm0, %v5715_v37, 0  ;;  %v3081_v37 = vld [vmem:[%s6453_s2 + $0xb0] sm:$0xff] }
  0xdc   : > { %3180 = vperm.xlu0 %5008, %v3075_v16   ;;  %v6568_v16 = vld [vmem:[#allocation11_spill] sm:$0xff] }
  0xde   : > { %4388 = vmatmul.mubr.msk.bf16.gmra.mrb[16].mxu1 %vm451_vm1, %v5297_v55  ;;  %v3074_v55 = vld [vmem:[%s6453_s2 + $0x78] sm:$0xff] }
  0xdf   : > { %4391 = vmatprep.mubr.msk.bf16.mxu1 %vm451_vm1, %v5347_v53  ;;  %3175 = vperm.xlu1 %5009, %v3074_v55   ;;  %v3076_v53 = vld [vmem:[%s6453_s2 + $0x88] sm:$0xff]  ;;  %v6569_v55 = vld [vmem:[#allocation12_spill] sm:$0xff] }
  0xe0   : > { %3190 = vperm.xlu0 %5008, %v3077_v18  }
  0xe2   : > { %4582 = vmatmul.mubr.msk.bf16.vlgmr.msra.gmra.mrb[0].mxu0 %vm451_vm1, %v5403_v11  ;;  %v3079_v11 = vld [vmem:[%s6453_s2 + $0xa0] sm:$0xff] }
  0xe3   : > { %4622 = vmatpush3.bf16.msra.mxu0 %v2826_v51  ;;  %4585 = vmatprep.mubr.msk.bf16.mxu0 %vm451_vm1, %v5451_v10  ;;  %v3078_v10 = vld [vmem:[%s6453_s2 + $0x98] sm:$0xff] }
  0xe4   : > { %3185 = vperm.xlu1 %5009, %v3076_v53   ;;  %3200 = vperm.xlu0 %5008, %v3079_v11   ;;  %v6571_v53 = vld [vmem:[#allocation6_spill] sm:$0xff] }
  0xe5   : > { %v2730_v11 = vrot.slane %v6571_v53, 5 }
  0xe6   : > { %4392 = vmatmul.mubr.msk.bf16.gmra.mrb[20].mxu1 %vm451_vm1, %v5761_v24 }
  0xe7   : > { %4395 = vmatprep.mubr.msk.bf16.mxu1 %vm451_vm1, %v5765_v14 }
  0xe8   : > { %3195 = vperm.xlu1 %5009, %v3078_v10   ;;  %3210 = vperm.xlu0 %5008, %v3081_v37   ;;  %v6572_v10 = vld [vmem:[#allocation13_spill] sm:$0xff] }
  0xea   : > { %4586 = vmatmul.mubr.msk.bf16.gmra.mrb[4].mxu0 %vm451_vm1, %v5458_v17  ;;  %v3080_v17 = vld [vmem:[%s6453_s2 + $0xa8] sm:$0xff] }
  0xeb   : > { %4589 = vmatprep.mubr.msk.bf16.mxu0 %vm451_vm1, %v5491_v30  ;;  %v3082_v30 = vld [vmem:[%s6453_s2 + $0xb8] sm:$0xff] }
  0xec   : > { %3205 = vperm.xlu1 %5009, %v3080_v17   ;;  %3220 = vperm.xlu0 %5008, %v3083_v32   ;;  %v6573_v17 = vld [vmem:[#allocation14_spill] sm:$0xff]  ;;  %v2732_v32 = vrot.slane %v5191_v1, 5  ;;  %v2738_v1 = vrot.slane %v5241_v46, 5  ;;  %v6578_v46 = vshrl.u32 %v5636_v45, 16 }
  0xee   : > { %4396 = vmatmul.mubr.msk.bf16.gmra.mrb[24].mxu1 %vm451_vm1, %v5782_v62 }
  0xef   : > { %4399 = vmatprep.mubr.msk.bf16.mxu1 %vm451_vm1, %v5786_v61 }
  0xf0   : > { %3215 = vperm.xlu1 %5009, %v3082_v30   ;;  %3230 = vperm.xlu0 %5008, %v3085_v20   ;;  %v2734_v30 = vrot.slane %v5193_v3, 5  ;;  %v6574_v20 = vld [vmem:[#allocation15_spill] sm:$0xff] }
  0xf2   : > { %4590 = vmatmul.mubr.msk.bf16.gmra.mrb[8].mxu0 %vm451_vm1, %v5494_v39  ;;  %v3084_v39 = vld [vmem:[%s6453_s2 + $0xc8] sm:$0xff] }
  0xf3   : > { %4593 = vmatprep.mubr.msk.bf16.mxu0 %vm451_vm1, %v5531_v63  ;;  %v3086_v63 = vld [vmem:[%s6453_s2 + $0xd8] sm:$0xff] }
  0xf4   : > { %3225 = vperm.xlu1 %5009, %v3084_v39   ;;  %3240 = vperm.xlu0 %5008, %v3087_v0   ;;  %v2733_v39 = vsel %vm2724_vm6, %v2730_v11, %v2732_v32  ;;  %v6575_v0 = vld [vmem:[#allocation16_spill] sm:$0xff] }
  0xf6   : > { %4400 = vmatmul.mubr.msk.bf16.gmra.mrb[28].mxu1 %vm451_vm1, %v5802_v35 }
  0xf7   : > { %4403 = vmatprep.mubr.msk.bf16.mxu1 %vm451_vm1, %v5807_v40 }
  0xf8   : > { %3235 = vperm.xlu1 %5009, %v3086_v63   ;;  %3250 = vperm.xlu0 %5008, %v3089_v48   ;;  %v2735_v63 = vsel %vm2724_vm6, %v2732_v32, %v2734_v30  ;;  %v2736_v48 = vrot.slane %v5204_v12, 5  ;;  %v2742_v12 = vrot.slane %v5285_v41, 5  ;;  %v6582_v41 = vld [vmem:[#allocation20_spill] sm:$0xff] }
  0xfa   : > { %4594 = vmatmul.mubr.msk.bf16.gmra.mrb[12].mxu0 %vm451_vm1, %v5540_v26  ;;  %v3088_v26 = vld [vmem:[%s6453_s2 + $0xe8] sm:$0xff]  ;;  %v2737_v3 = vsel %vm2724_vm6, %v2734_v30, %v2736_v48 }
  0xfb   : > { %4597 = vmatprep.mubr.msk.bf16.mxu0 %vm451_vm1, %v5562_v6  ;;  %v3090_v6 = vld [vmem:[%s6453_s2 + $0xf8] sm:$0xff] }
  0xfc   : > { %3245 = vperm.xlu1 %5009, %v3088_v26   ;;  %3260 = vperm.xlu0 %5008, %v3091_v54   ;;  %v6576_v26 = vld [vmem:[#allocation17_spill] sm:$0xff]  ;;  %v6577_v54 = vld [vmem:[#allocation18_spill] sm:$0xff] }
  0xfe   : > { %4404 = vmatmul.mubr.msk.bf16.gmra.mrb[32].mxu1 %vm451_vm1, %v5831_v13 }
  0xff   : > { %4407 = vmatprep.mubr.msk.bf16.mxu1 %vm451_vm1, %v5837_v15 }
 0x100   : > { %3255 = vperm.xlu1 %5009, %v3090_v6   ;;  %3270 = vperm.xlu0 %5008, %v3093_v47   ;;  %v2739_v6 = vsel %vm2724_vm6, %v2736_v48, %v2738_v1  ;;  %v2740_v47 = vrot.slane %v5256_v56, 5  ;;  %v2744_v56 = vrot.slane %v5318_v33, 5  ;;  %v2748_v33 = vrot.slane %v5375_v34, 5 }
 0x102   : > { %4598 = vmatmul.mubr.msk.bf16.gmra.mrb[16].mxu0 %vm451_vm1, %v5572_v29  ;;  %v3097_v29 = vld [vmem:[%s6453_s2 + $0x130] sm:$0xff] }
 0x103   : > { %4601 = vmatprep.mubr.msk.bf16.mxu0 %vm451_vm1, %v5587_v23  ;;  %v3094_v23 = vld [vmem:[%s6453_s2 + $0x118] sm:$0xff] }
 0x104   : > { %3265 = vperm.xlu1 %5009, %v3092_v58   ;;  %3280 = vperm.xlu0 %5008, %v3095_v5   ;;  %v1364_v58 = vrot.slane %v6578_v46, 3  ;;  %v6579_v5 = vshll.u32 %v5636_v45, 16 }
 0x106   : > { %4408 = vmatmul.mubr.msk.bf16.gmra.mrb[36].mxu1 %vm451_vm1, %v5820_v36 }
 0x107   : > { %4413 = vmatprep.mubr.msk.bf16.mxu1 %vm451_vm1, %v5176_v57  ;;  %v3096_v57 = vld [vmem:[%s6453_s2 + $0x128] sm:$0xff] }
 0x108   : > { %3275 = vperm.xlu1 %5009, %v3094_v23   ;;  %3290 = vperm.xlu0 %5008, %v3097_v29   ;;  %v1367_v23 = vrot.slane %v6579_v5, 4  ;;  %v6580_v29 = vld [vmem:[#allocation19_spill] sm:$0xff] }
 0x10a   : > { %4602 = vmatmul.mubr.msk.bf16.gmra.mrb[20].mxu0 %vm451_vm1, %v5596_v19  ;;  %v6561_v19 = vld [vmem:[#allocation7_spill] sm:$0xff] }
 0x10b   : > { %4605 = vmatprep.mubr.msk.bf16.mxu0 %vm451_vm1, %v5621_v44  ;;  %v6562_v44 = vld [vmem:[#allocation8_spill] sm:$0xff] }
 0x10c   : > { %3285 = vperm.xlu1 %5009, %v3096_v57   ;;  %v2741_v57 = vsel %vm2724_vm6, %v2738_v1, %v2740_v47 }
 0x10e   : > { %4414 = vmatmul.mubr.msk.bf16.vlgmr.msra.gmra.mrb[0].mxu1 %vm451_vm1, %v5201_v9 }
 0x10f   : > { %4664 = vmatpush3.bf16.msra.mxu1 %v5067_v2  ;;  %4417 = vmatprep.mubr.msk.bf16.mxu1 %vm451_vm1, %v5225_v25  ;;  %v6563_v2 = vld [vmem:[#allocation2_spill] sm:$0xff]  ;;  %v6564_v25 = vld [vmem:[#allocation9_spill] sm:$0xff] }
 0x110   : > { %v2479_v9 = vor.u32 %v5691_v43, %v6563_v2  ;;  %v1368_v2 = vor.u32 %v1367_v23, %v1364_v58 }
 0x112   : > { %4606 = vmatmul.mubr.msk.bf16.gmra.mrb[24].mxu0 %vm451_vm1, %v5630_v21  ;;  %v6565_v21 = vld [vmem:[#allocation10_spill] sm:$0xff]  ;;  %v2481_v51 = vsel %vm1857_vm4, %v2479_v9, %v5691_v43 }
 0x113   : > { %4609 = vmatprep.mubr.msk.bf16.mxu0 %vm451_vm1, %v5650_v52  ;;  %v2480_v52 = vsel %vm1857_vm4, %v5672_v22, %v2479_v9  ;;  %v1369_v9 = vsel %vm271_vm3, %v6582_v41, %v1368_v2 }
 0x116   : > { %4418 = vmatmul.mubr.msk.bf16.gmra.mrb[4].mxu1 %vm451_vm1, %v6561_v19  ;;  %v6581_v19 = vld [vmem:[#allocation21_spill] sm:$0xff] }
 0x117   : > { %4421 = vmatprep.mubr.msk.bf16.mxu1 %vm451_vm1, %v6562_v44  ;;  %v2743_v44 = vsel %vm2724_vm6, %v2740_v47, %v2742_v12 }
 0x11a   : > { %4610 = vmatmul.mubr.msk.bf16.gmra.mrb[28].mxu0 %vm451_vm1, %v5659_v31  ;;  %v6566_v31 = vld [vmem:[#allocation3_spill] sm:$0xff] }
 0x11b   : > { %4613 = vmatprep.mubr.msk.bf16.mxu0 %vm451_vm1, %v5676_v59  ;;  %v2725_v36 = vrot.slane %v6566_v31, 5  ;;  %v6567_v59 = vld [vmem:[#allocation4_spill] sm:$0xff] }
 0x11c   : > { %v2726_v28 = vrot.slane %v6567_v59, 5 }
 0x11e   : > { %4422 = vmatmul.mubr.msk.bf16.gmra.mrb[8].mxu1 %vm451_vm1, %v6564_v25  ;;  %v2727_v22 = vsel %vm2724_vm6, %v2725_v36, %v2726_v28  ;;  %v2746_v25 = vrot.slane %v5334_v50, 5  ;;  %v2750_v36 = vrot.slane %v5381_v42, 5 }
 0x11f   : > { %4425 = vmatprep.mubr.msk.bf16.mxu1 %vm451_vm1, %v6565_v21  ;;  %v6583_v21 = vld [vmem:[#allocation22_spill] sm:$0xff] }
 0x120   : > { %v2747_v31 = vsel %vm2724_vm6, %v2744_v56, %v2746_v25  ;;  %v2749_v50 = vsel %vm2724_vm6, %v2746_v25, %v2748_v33  ;;  %v2751_v59 = vsel %vm2724_vm6, %v2748_v33, %v2750_v36 }
 0x122   : > { %4614 = vmatmul.mubr.msk.bf16.gmra.mrb[32].mxu0 %vm451_vm1, %v5682_v27  ;;  %v6570_v27 = vld [vmem:[#allocation5_spill] sm:$0xff] }
 0x123   : > { %4617 = vmatprep.mubr.msk.bf16.mxu0 %vm451_vm1, %v2480_v52  ;;  %v2728_v18 = vrot.slane %v6570_v27, 5  ;;  %v2745_v52 = vsel %vm2724_vm6, %v2742_v12, %v2744_v56 }
 0x125   : > { %v2729_v37 = vsel %vm2724_vm6, %v2726_v28, %v2728_v18  ;;  %v2731_v43 = vsel %vm2724_vm6, %v2728_v18, %v2730_v11  ;;  %v2752_v28 = vrot.slane %v5427_v7, 5  ;;  %v2758_v7 = vrot.slane %v5486_v60, 5 }
 0x126   : > { %4426 = vmatmul.mubr.msk.bf16.gmra.mrb[12].mxu1 %vm451_vm1, %v6568_v16  ;;  %v2754_v16 = vrot.slane %v5436_v38, 5 }
 0x127   : > { %4429 = vmatprep.mubr.msk.bf16.mxu1 %vm451_vm1, %v6569_v55  ;;  %v2753_v42 = vsel %vm2724_vm6, %v2750_v36, %v2752_v28 }
 0x128   : > { %v2755_v34 = vsel %vm2724_vm6, %v2752_v28, %v2754_v16 }
 0x12a   : > { %4618 = vmatmul.mubr.msk.bf16.gmra.mrb[36].mxu0 %vm451_vm1, %v2481_v51  ;;  %v6584_v51 = vmov 0.0|0.0  }
 0x12b   : > { %4623 = vmatprep.mubr.msk.bf16.mxu0 %vm451_vm1, %v2727_v22 }
 0x12e   : > { %4430 = vmatmul.mubr.msk.bf16.gmra.mrb[16].mxu1 %vm451_vm1, %v6572_v10 }
 0x12f   : > { %4433 = vmatprep.mubr.msk.bf16.mxu1 %vm451_vm1, %v6573_v17 }
 0x132   : > { %4624 = vmatmul.mubr.msk.bf16.vlgmr.msra.gmra.mrb[0].mxu0 %vm451_vm1, %v2729_v37 }
 0x133   : > { %4627 = vmatprep.mubr.msk.bf16.mxu0 %vm451_vm1, %v2731_v43 }
 0x136   : > { %4434 = vmatmul.mubr.msk.bf16.gmra.mrb[20].mxu1 %vm451_vm1, %v6574_v20 }
 0x137   : > { %4437 = vmatprep.mubr.msk.bf16.mxu1 %vm451_vm1, %v6575_v0 }
 0x13a   : > { %4628 = vmatmul.mubr.msk.bf16.gmra.mrb[4].mxu0 %vm451_vm1, %v2733_v39 }
 0x13b   : > { %4631 = vmatprep.mubr.msk.bf16.mxu0 %vm451_vm1, %v2735_v63 }
 0x13e   : > { %4438 = vmatmul.mubr.msk.bf16.gmra.mrb[24].mxu1 %vm451_vm1, %v6576_v26 }
 0x13f   : > { %4441 = vmatprep.mubr.msk.bf16.mxu1 %vm451_vm1, %v6577_v54 }
 0x140   : > { %v3111_v22 = vpop.permute.xlu1 %3110 }
 0x142   : > { %4632 = vmatmul.mubr.msk.bf16.gmra.mrb[8].mxu0 %vm451_vm1, %v2737_v3 }
 0x143   : > { %4635 = vmatprep.mubr.msk.bf16.mxu0 %vm451_vm1, %v2739_v6 }
 0x146   : > { %4442 = vmatmul.mubr.msk.bf16.gmra.mrb[28].mxu1 %vm451_vm1, %v6580_v29 }
 0x147   : > { %4445 = vmatprep.mubr.msk.bf16.mxu1 %vm451_vm1, %v6581_v19 }
 0x14a   : > { %4636 = vmatmul.mubr.msk.bf16.gmra.mrb[12].mxu0 %vm451_vm1, %v2741_v57 }
 0x14b   : > { %4639 = vmatprep.mubr.msk.bf16.mxu0 %vm451_vm1, %v2743_v44 }
 0x14e   : > { %4446 = vmatmul.mubr.msk.bf16.gmra.mrb[32].mxu1 %vm451_vm1, %v6583_v21 }
 0x14f   : > { %4449 = vmatprep.mubr.msk.bf16.mxu1 %vm451_vm1, %v1369_v9 }
 0x152   : > { %4640 = vmatmul.mubr.msk.bf16.gmra.mrb[16].mxu0 %vm451_vm1, %v2745_v52 }
 0x153   : > { %4643 = vmatprep.mubr.msk.bf16.mxu0 %vm451_vm1, %v2747_v31 }
 0x156   : > { %4450 = vmatmul.mubr.msk.bf16.gmra.mrb[36].mxu1 %vm451_vm1, %v1368_v2 }
 0x157   : > { %4475 = vmatprep.mubr.msk.bf16.mxu1 %vm451_vm1, %v5761_v24  ;;  %v2756_v24 = vrot.slane %v5477_v49, 5  ;;  %v2762_v49 = vrot.slane %v6584_v51, 5 }
 0x159   : > { %v2757_v38 = vsel %vm2724_vm6, %v2754_v16, %v2756_v24 }
 0x15a   : > { %4644 = vmatmul.mubr.msk.bf16.gmra.mrb[20].mxu0 %vm451_vm1, %v2749_v50 }
 0x15b   : > { %4647 = vmatprep.mubr.msk.bf16.mxu0 %vm451_vm1, %v2751_v59 }
 0x15e   : > { %4476 = vmatmul.mubr.msk.bf16.vlgmr.msra.gmra.mrb[20].mxu1 %vm451_vm1, %v5765_v14  ;;  %v2759_v14 = vsel %vm2724_vm6, %v2756_v24, %v2758_v7 }
 0x15f   : > { %4479 = vmatprep.mubr.msk.bf16.mxu1 %vm451_vm1, %v5782_v62  ;;  %v2760_v62 = vrot.slane %v5636_v45, 5 }
 0x161   : > { %v2761_v60 = vsel %vm2724_vm6, %v2758_v7, %v2760_v62 }
 0x162   : > { %4648 = vmatmul.mubr.msk.bf16.gmra.mrb[24].mxu0 %vm451_vm1, %v2753_v42 }
 0x163   : > { %4651 = vmatprep.mubr.msk.bf16.mxu0 %vm451_vm1, %v2755_v34 }
 0x166   : > { %4480 = vmatmul.mubr.msk.bf16.gmra.mrb[24].mxu1 %vm451_vm1, %v5786_v61  ;;  %v2763_v61 = vsel %vm2724_vm6, %v2760_v62, %v2762_v49 }
 0x167   : > { %4483 = vmatprep.mubr.msk.bf16.mxu1 %vm451_vm1, %v5802_v35 }
 0x16a   : > { %4652 = vmatmul.mubr.msk.bf16.gmra.mrb[28].mxu0 %vm451_vm1, %v2757_v38 }
 0x16b   : > { %4655 = vmatprep.mubr.msk.bf16.mxu0 %vm451_vm1, %v2759_v14 }
 0x16e   : > { %4484 = vmatmul.mubr.msk.bf16.gmra.mrb[28].mxu1 %vm451_vm1, %v5807_v40 }
 0x16f   : > { %4487 = vmatprep.mubr.msk.bf16.mxu1 %vm451_vm1, %v5831_v13  ;;  %v3101_v13 = vpop.permute.xlu0 %3100 }
 0x172   : > { %4656 = vmatmul.mubr.msk.bf16.gmra.mrb[32].mxu0 %vm451_vm1, %v2761_v60 }
 0x173   : > { %4659 = vmatprep.mubr.msk.bf16.mxu0 %vm451_vm1, %v2763_v61  ;;  %v3106_v18 = vpop.permute.xlu0 %3105 }
 0x176   : > { %4488 = vmatmul.mubr.msk.bf16.gmra.mrb[32].mxu1 %vm451_vm1, %v5837_v15 }
 0x177   : > { %4491 = vmatprep.mubr.msk.bf16.mxu1 %vm451_vm1, %v5863_v8  ;;  %v3116_v8 = vpop.permute.xlu1 %3115  ;;  %v6170_v10 = vpop.permute.xlu0 %3120 }
 0x17a   : > { %4660 = vmatmul.mubr.msk.bf16.gmra.mrb[36].mxu0 %vm451_vm1, %v2762_v49 }
 0x17b   : > { %v6180_v32 = vpop.permute.xlu1 %3125  ;;  %v3131_v30 = vpop.permute.xlu0 %3130 }
 0x17e   : > { %4492 = vmatmul.mubr.msk.bf16.gmra.mrb[36].mxu1 %vm451_vm1, %v5850_v4 }
 0x17f   : > { %v6186_v0 = vpop.permute.xlu1 %3135  ;;  %v6190_v48 = vpop.permute.xlu0 %3140 }
 0x183   : > { %v6194_v26 = vpop.permute.xlu1 %3145  ;;  %v6198_v54 = vpop.permute.xlu0 %3150 }
 0x187   : > { %v6207_v23 = vpop.permute.xlu1 %3155  ;;  %v6209_v19 = vpop.permute.xlu0 %3160 }
 0x18b   : > { %v6218_v59 = vpop.permute.xlu1 %3165  ;;  %v6224_v7 = vpop.permute.xlu0 %3170 }
 0x1e1   : > { %v4415_v45 = vpop.f32.mrb[0].mxu1 }
 0x1e2   : > { %v1413_v35 = vpop.f32.mrb[1].mxu1 }
 0x1e3   : > { %v4416_v40 = vpop.f32.mrb[2].mxu1 }
 0x1e4   : > { %v1416_v55 = vpop.f32.mrb[3].mxu1 }
 0x1e9   : > { %v4419_v27 = vpop.f32.mrb[4].mxu1 }
 0x1ea   : > { %v6164_v53 = vpop.f32.mrb[5].mxu1 }
 0x1eb   : > { %v6166_v11 = vpop.f32.mrb[6].mxu1 }
 0x1ec   : > { %v6168_v15 = vpop.f32.mrb[7].mxu1 }
 0x1f1   : > { %v6172_v37 = vpop.f32.mrb[8].mxu1 }
 0x1f2   : > { %v6174_v4 = vpop.f32.mrb[9].mxu1 }
 0x1f3   : > { %v6176_v17 = vpop.f32.mrb[10].mxu1 }
 0x1f4   : > { %v6178_v43 = vpop.f32.mrb[11].mxu1 }
 0x1f9   : > { %v6182_v20 = vpop.f32.mrb[12].mxu1 }
 0x1fa   : > { %v6184_v39 = vpop.f32.mrb[13].mxu1 }
 0x1fb   : > { %v6188_v63 = vpop.f32.mrb[14].mxu1 }
 0x1fc   : > { %v6192_v1 = vpop.f32.mrb[15].mxu1 }
 0x201   : > { %v6196_v3 = vpop.f32.mrb[16].mxu1 }
 0x202   : > { %v6200_v6 = vpop.f32.mrb[17].mxu1 }
 0x203   : > { %v6202_v47 = vpop.f32.mrb[18].mxu1 }
 0x204   : > { %v6204_v12 = vpop.f32.mrb[19].mxu1 }
 0x205   : > { %v4625_v46 = vpop.f32.mrb[0].mxu0 }
 0x206   : > { %v4665_v58 = vadd.f32 %v4625_v46, %v4415_v45  ;;  %v2862_v5 = vpop.f32.mrb[1].mxu0 }
 0x207   : > { %v4666_v29 = vadd.f32 %v2862_v5, %v1413_v35  ;;  %v4626_v57 = vpop.f32.mrb[2].mxu0 }
 0x208   : > { %v3295_v44 = vmul.f32 %v4665_v58, %v3111_v22  ;;  %v4667_v2 = vadd.f32 %v4626_v57, %v4416_v40  ;;  %v2865_v56 = vpop.f32.mrb[3].mxu0  ;;  %v6240_v57 = vpop.permute.xlu1 %3175 }
 0x209   : > { %v3293_v41 = vmul.f32 %v4666_v29, %v3101_v13  ;;  %v4668_v9 = vadd.f32 %v2865_v56, %v1416_v55  ;;  %v6243_v56 = vpop.permute.xlu0 %3180 }
 0x20a   : > { %v4059_v25 = vpack.c.bf16 %v3295_v44, %v3295_v44  ;;  %v3296_v21 = vmul.f32 %v4667_v2, %v3116_v8  ;;  %v3614_v36 = vmul.f32 %v3295_v44, %v3295_v44  ;;  %v3532_v49 = vsel %vm451_vm1, %v3295_v44, 0.0 }
 0x20b   : > { %v4057_v52 = vpack.c.bf16 %v3293_v41, %v3293_v41  ;;  %v3612_v31 = vmul.f32 %v3293_v41, %v3293_v41  ;;  %v3294_v33 = vmul.f32 %v4668_v9, %v3106_v18  ;;  %v3529_v28 = vsel %vm451_vm1, %v3293_v41, 0.0 }
 0x20c   : > { %3492 = vst.msk [vmem:[%s6214_s24 + $0x8] sm:$0xf] %vm3489_vm7, %v4059_v25  ;;  %v4060_v50 = vpack.c.bf16 %v3296_v21, %v3296_v21  ;;  %v3615_v38 = vmul.f32 %v3296_v21, %v3296_v21  ;;  %v3534_v58 = vsel %vm451_vm1, %v3296_v21, 0.0 }
 0x20d   : > { %3490 = vst.msk [vmem:[%s6214_s24] sm:$0xf] %vm3489_vm7, %v4057_v52  ;;  %v4058_v16 = vpack.c.bf16 %v3294_v33, %v3294_v33  ;;  %v3530_v42 = vsel %vm451_vm1, %v3294_v33, 0.0  ;;  %v3613_v34 = vmul.f32 %v3294_v33, %v3294_v33  ;;  %v4629_v24 = vpop.f32.mrb[4].mxu0  ;;  %v3651_v60 = vsel %vm451_vm1, %v3612_v31, 0.0 }
 0x20e   : > { %3493 = vst.msk [vmem:[%s6214_s24 + $0xc] sm:$0xf] %vm3489_vm7, %v4060_v50  ;;  %v3531_v14 = vadd.f32 %v3530_v42, %v3529_v28  ;;  %v4669_v62 = vadd.f32 %v4629_v24, %v4419_v27  ;;  %v2878_v51 = vpop.f32.mrb[5].mxu0  ;;  %v3654_v27 = vsel %vm451_vm1, %v3614_v36, 0.0  ;;  %v3656_v5 = vsel %vm451_vm1, %v3615_v38, 0.0 }
 0x20f   : > { %3491 = vst.msk [vmem:[%s6214_s24 + $0x4] sm:$0xf] %vm3489_vm7, %v4058_v16  ;;  %v3652_v61 = vsel %vm451_vm1, %v3613_v34, 0.0  ;;  %v4670_v45 = vadd.f32 %v2878_v51, %v6164_v53  ;;  %v4630_v35 = vpop.f32.mrb[6].mxu0 }
 0x210   : > { %v3533_v40 = vadd.f32 %v3532_v49, %v3531_v14  ;;  %v3653_v13 = vadd.f32 %v3652_v61, %v3651_v60  ;;  %v3299_v55 = vmul.f32 %v4669_v62, %v3131_v30  ;;  %v4671_v22 = vadd.f32 %v4630_v35, %v6166_v11  ;;  %v2881_v18 = vpop.f32.mrb[7].mxu0  ;;  %v6259_v62 = vpop.permute.xlu1 %3185 }
 0x211   : > { %v3297_v8 = vmul.f32 %v4670_v45, %v6170_v10  ;;  %v4672_v46 = vadd.f32 %v2881_v18, %v6168_v15  ;;  %v6266_v61 = vpop.permute.xlu0 %3190 }
 0x212   : > { %v3655_v53 = vadd.f32 %v3654_v27, %v3653_v13  ;;  %v4063_v29 = vpack.c.bf16 %v3299_v55, %v3299_v55  ;;  %v3535_v44 = vadd.f32 %v3534_v58, %v3533_v40  ;;  %v3300_v15 = vmul.f32 %v4671_v22, %v6186_v0 }
 0x213   : > { %v4061_v30 = vpack.c.bf16 %v3297_v8, %v3297_v8  ;;  %v3536_v11 = vsel %vm451_vm1, %v3297_v8, 0.0  ;;  %v3616_v2 = vmul.f32 %v3297_v8, %v3297_v8  ;;  %v3298_v41 = vmul.f32 %v4672_v46, %v6180_v32 }
 0x214   : > { %3496 = vst.msk [vmem:[%s6214_s24 + $0x18] sm:$0xf] %vm3489_vm7, %v4063_v29  ;;  %v3657_v10 = vadd.f32 %v3656_v5, %v3655_v53  ;;  %v3537_v9 = vadd.f32 %v3536_v11, %v3535_v44  ;;  %v3618_v52 = vmul.f32 %v3299_v55, %v3299_v55  ;;  %v4064_v33 = vpack.c.bf16 %v3300_v15, %v3300_v15  ;;  %v6280_v44 = vpop.permute.xlu1 %3195 }
 0x215   : > { %3494 = vst.msk [vmem:[%s6214_s24 + $0x10] sm:$0xf] %vm3489_vm7, %v4061_v30  ;;  %v3658_v25 = vsel %vm451_vm1, %v3616_v2, 0.0  ;;  %v4633_v21 = vpop.f32.mrb[8].mxu0  ;;  %v4062_v50 = vpack.c.bf16 %v3298_v41, %v3298_v41  ;;  %v3538_v28 = vsel %vm451_vm1, %v3298_v41, 0.0  ;;  %v3617_v16 = vmul.f32 %v3298_v41, %v3298_v41 }
 0x216   : > { %v3659_v31 = vadd.f32 %v3658_v25, %v3657_v10  ;;  %v2894_v36 = vpop.f32.mrb[9].mxu0  ;;  %v4673_v0 = vadd.f32 %v4633_v21, %v6172_v37  ;;  %v3540_v32 = vsel %vm451_vm1, %v3299_v55, 0.0  ;;  %3497 = vst.msk [vmem:[%s6214_s24 + $0x1c] sm:$0xf] %vm3489_vm7, %v4064_v33  ;;  %v3539_v34 = vadd.f32 %v3538_v28, %v3537_v9  ;;  %v6287_v9 = vpop.permute.xlu0 %3200 }
 0x217   : > { %v4634_v42 = vpop.f32.mrb[10].mxu0  ;;  %v4674_v24 = vadd.f32 %v2894_v36, %v6174_v4  ;;  %v3619_v51 = vmul.f32 %v3300_v15, %v3300_v15  ;;  %3495 = vst.msk [vmem:[%s6214_s24 + $0x14] sm:$0xf] %vm3489_vm7, %v4062_v50  ;;  %v3660_v49 = vsel %vm451_vm1, %v3617_v16, 0.0  ;;  %v3662_v40 = vsel %vm451_vm1, %v3618_v52, 0.0 }
 0x218   : > { %v4675_v38 = vadd.f32 %v4634_v42, %v6176_v17  ;;  %v2897_v14 = vpop.f32.mrb[11].mxu0  ;;  %v3303_v37 = vmul.f32 %v4673_v0, %v6198_v54  ;;  %v3541_v45 = vadd.f32 %v3540_v32, %v3539_v34  ;;  %v3661_v35 = vadd.f32 %v3660_v49, %v3659_v31 }
 0x219   : > { %v4676_v60 = vadd.f32 %v2897_v14, %v6178_v43  ;;  %v3301_v4 = vmul.f32 %v4674_v24, %v6190_v48  ;;  %v3542_v13 = vsel %vm451_vm1, %v3300_v15, 0.0  ;;  %v3664_v8 = vsel %vm451_vm1, %v3619_v51, 0.0  ;;  %v6301_v51 = vpop.permute.xlu1 %3205 }
 0x21a   : > { %v3304_v17 = vmul.f32 %v4675_v38, %v6207_v23  ;;  %v4067_v55 = vpack.c.bf16 %v3303_v37, %v3303_v37  ;;  %v3663_v54 = vadd.f32 %v3662_v40, %v3661_v35  ;;  %v3543_v27 = vadd.f32 %v3542_v13, %v3541_v45 }
 0x21b   : > { %v3302_v22 = vmul.f32 %v4676_v60, %v6194_v26  ;;  %v4065_v18 = vpack.c.bf16 %v3301_v4, %v3301_v4  ;;  %v3544_v43 = vsel %vm451_vm1, %v3301_v4, 0.0  ;;  %v3548_v48 = vsel %vm451_vm1, %v3303_v37, 0.0  ;;  %v6306_v60 = vpop.permute.xlu0 %3210 }
 0x21c   : > { %3500 = vst.msk [vmem:[%s6214_s24 + $0x28] sm:$0xf] %vm3489_vm7, %v4067_v55  ;;  %v3620_v23 = vmul.f32 %v3301_v4, %v3301_v4  ;;  %v4068_v46 = vpack.c.bf16 %v3304_v17, %v3304_v17  ;;  %v3622_v5 = vmul.f32 %v3303_v37, %v3303_v37  ;;  %v3545_v26 = vadd.f32 %v3544_v43, %v3543_v27 }
 0x21d   : > { %v4637_v58 = vpop.f32.mrb[12].mxu0  ;;  %3498 = vst.msk [vmem:[%s6214_s24 + $0x20] sm:$0xf] %vm3489_vm7, %v4065_v18  ;;  %v3665_v53 = vadd.f32 %v3664_v8, %v3663_v54  ;;  %v4066_v29 = vpack.c.bf16 %v3302_v22, %v3302_v22  ;;  %v3546_v2 = vsel %vm451_vm1, %v3302_v22, 0.0  ;;  %v3621_v10 = vmul.f32 %v3302_v22, %v3302_v22 }
 0x21e   : > { %v2910_v30 = vpop.f32.mrb[13].mxu0  ;;  %v3666_v11 = vsel %vm451_vm1, %v3620_v23, 0.0  ;;  %3501 = vst.msk [vmem:[%s6214_s24 + $0x2c] sm:$0xf] %vm3489_vm7, %v4068_v46  ;;  %v4677_v15 = vadd.f32 %v4637_v58, %v6182_v20  ;;  %v3623_v21 = vmul.f32 %v3304_v17, %v3304_v17  ;;  %v3547_v52 = vadd.f32 %v3546_v2, %v3545_v26 }
 0x21f   : > { %v4638_v41 = vpop.f32.mrb[14].mxu0  ;;  %v3667_v25 = vadd.f32 %v3666_v11, %v3665_v53  ;;  %3499 = vst.msk [vmem:[%s6214_s24 + $0x24] sm:$0xf] %vm3489_vm7, %v4066_v29  ;;  %v4678_v31 = vadd.f32 %v2910_v30, %v6184_v39  ;;  %v3668_v36 = vsel %vm451_vm1, %v3621_v10, 0.0  ;;  %v3670_v32 = vsel %vm451_vm1, %v3622_v5, 0.0  ;;  %v6325_v5 = vpop.permute.xlu1 %3215 }
 0x220   : > { %v2913_v33 = vpop.f32.mrb[15].mxu0  ;;  %v3307_v50 = vmul.f32 %v4677_v15, %v6224_v7  ;;  %v4679_v28 = vadd.f32 %v4638_v41, %v6188_v63  ;;  %v3549_v16 = vadd.f32 %v3548_v48, %v3547_v52  ;;  %v3550_v34 = vsel %vm451_vm1, %v3304_v17, 0.0 }
 0x221   : > { %v4680_v20 = vadd.f32 %v2913_v33, %v6192_v1  ;;  %v3669_v0 = vadd.f32 %v3668_v36, %v3667_v25  ;;  %v3305_v42 = vmul.f32 %v4678_v31, %v6209_v19  ;;  %v3672_v1 = vsel %vm451_vm1, %v3623_v21, 0.0 }
 0x222   : > { %v4071_v39 = vpack.c.bf16 %v3307_v50, %v3307_v50  ;;  %v3308_v24 = vmul.f32 %v4679_v28, %v6240_v57  ;;  %v3551_v7 = vadd.f32 %v3550_v34, %v3549_v16  ;;  %v3626_v45 = vmul.f32 %v3307_v50, %v3307_v50 }
 0x223   : > { %v3671_v38 = vadd.f32 %v3670_v32, %v3669_v0  ;;  %v4069_v14 = vpack.c.bf16 %v3305_v42, %v3305_v42  ;;  %v3552_v63 = vsel %vm451_vm1, %v3305_v42, 0.0  ;;  %v3624_v19 = vmul.f32 %v3305_v42, %v3305_v42 }
 0x224   : > { %3504 = vst.msk [vmem:[%s6214_s24 + $0x38] sm:$0xf] %vm3489_vm7, %v4071_v39  ;;  %v4072_v49 = vpack.c.bf16 %v3308_v24, %v3308_v24  ;;  %v3553_v57 = vadd.f32 %v3552_v63, %v3551_v7  ;;  %v3306_v4 = vmul.f32 %v4680_v20, %v6218_v59  ;;  %v3556_v46 = vsel %vm451_vm1, %v3307_v50, 0.0 }
 0x225   : > { %v4641_v37 = vpop.f32.mrb[16].mxu0  ;;  %3502 = vst.msk [vmem:[%s6214_s24 + $0x30] sm:$0xf] %vm3489_vm7, %v4069_v14  ;;  %v3673_v35 = vadd.f32 %v3672_v1, %v3671_v38  ;;  %v3674_v40 = vsel %vm451_vm1, %v3624_v19, 0.0  ;;  %v3678_v58 = vsel %vm451_vm1, %v3626_v45, 0.0  ;;  %v3627_v26 = vmul.f32 %v3308_v24, %v3308_v24 }
 0x226   : > { %v2926_v17 = vpop.f32.mrb[17].mxu0  ;;  %3505 = vst.msk [vmem:[%s6214_s24 + $0x3c] sm:$0xf] %vm3489_vm7, %v4072_v49  ;;  %v4681_v13 = vadd.f32 %v4641_v37, %v6196_v3  ;;  %v4070_v18 = vpack.c.bf16 %v3306_v4, %v3306_v4  ;;  %v3554_v27 = vsel %vm451_vm1, %v3306_v4, 0.0  ;;  %v3625_v48 = vmul.f32 %v3306_v4, %v3306_v4 }
 0x227   : > { %v4682_v55 = vadd.f32 %v2926_v17, %v6200_v6  ;;  %v4642_v22 = vpop.f32.mrb[18].mxu0  ;;  %v3675_v54 = vadd.f32 %v3674_v40, %v3673_v35  ;;  %v3555_v8 = vadd.f32 %v3554_v27, %v3553_v57  ;;  %v3558_v30 = vsel %vm451_vm1, %v3308_v24, 0.0 }
 0x228   : > { %v2929_v43 = vpop.f32.mrb[19].mxu0  ;;  %v3311_v59 = vmul.f32 %v4681_v13, %v6266_v61  ;;  %3503 = vst.msk [vmem:[%s6214_s24 + $0x34] sm:$0xf] %vm3489_vm7, %v4070_v18  ;;  %v4683_v3 = vadd.f32 %v4642_v22, %v6202_v47  ;;  %v3676_v61 = vsel %vm451_vm1, %v3625_v48, 0.0  ;;  %v3680_v31 = vsel %vm451_vm1, %v3627_v26, 0.0 }
 0x229   : > { %v3309_v23 = vmul.f32 %v4682_v55, %v6243_v56  ;;  %v4684_v6 = vadd.f32 %v2929_v43, %v6204_v12  ;;  %v3557_v53 = vadd.f32 %v3556_v46, %v3555_v8  ;;  %v6328_v56 = vpop.permute.xlu0 %3220  ;;  %v3677_v11 = vadd.f32 %v3676_v61, %v3675_v54 }
 0x22a   : > { %v4075_v29 = vpack.c.bf16 %v3311_v59, %v3311_v59  ;;  %v3312_v15 = vmul.f32 %v4683_v3, %v6280_v44  ;;  %v3630_v42 = vmul.f32 %v3311_v59, %v3311_v59  ;;  %v3564_v38 = vsel %vm451_vm1, %v3311_v59, 0.0 }
 0x22b   : > { %v4073_v2 = vpack.c.bf16 %v3309_v23, %v3309_v23  ;;  %v3560_v10 = vsel %vm451_vm1, %v3309_v23, 0.0  ;;  %v3559_v47 = vadd.f32 %v3558_v30, %v3557_v53  ;;  %v3628_v12 = vmul.f32 %v3309_v23, %v3309_v23 }
 0x22c   : > { %3508 = vst.msk [vmem:[%s6214_s24 + $0x48] sm:$0xf] %vm3489_vm7, %v4075_v29  ;;  %v3310_v41 = vmul.f32 %v4684_v6, %v6259_v62  ;;  %v3679_v21 = vadd.f32 %v3678_v58, %v3677_v11  ;;  %v4076_v50 = vpack.c.bf16 %v3312_v15, %v3312_v15  ;;  %v6341_v62 = vpop.permute.xlu1 %3225  ;;  %v3631_v7 = vmul.f32 %v3312_v15, %v3312_v15 }
 0x22d   : > { %v4645_v25 = vpop.f32.mrb[20].mxu0  ;;  %3506 = vst.msk [vmem:[%s6214_s24 + $0x40] sm:$0xf] %vm3489_vm7, %v4073_v2  ;;  %v3561_v33 = vadd.f32 %v3560_v10, %v3559_v47  ;;  %v3682_v36 = vsel %vm451_vm1, %v3628_v12, 0.0  ;;  %v3231_v24 = vpop.permute.xlu0 %3230  ;;  %v3566_v57 = vsel %vm451_vm1, %v3312_v15, 0.0  ;;  %v3686_v13 = vsel %vm451_vm1, %v3630_v42, 0.0 }
 0x22e   : > { %v2942_v52 = vpop.f32.mrb[21].mxu0  ;;  %v3681_v20 = vadd.f32 %v3680_v31, %v3679_v21  ;;  %v4074_v16 = vpack.c.bf16 %v3310_v41, %v3310_v41  ;;  %v3562_v44 = vsel %vm451_vm1, %v3310_v41, 0.0  ;;  %3509 = vst.msk [vmem:[%s6214_s24 + $0x4c] sm:$0xf] %vm3489_vm7, %v4076_v50  ;;  %v3629_v34 = vmul.f32 %v3310_v41, %v3310_v41 }
 0x22f   : > { %v4646_v28 = vpop.f32.mrb[22].mxu0  ;;  %v3563_v32 = vadd.f32 %v3562_v44, %v3561_v33  ;;  %v3688_v27 = vsel %vm451_vm1, %v3631_v7, 0.0 }
 0x230   : > { %v2945_v0 = vpop.f32.mrb[23].mxu0  ;;  %v3683_v14 = vadd.f32 %v3682_v36, %v3681_v20  ;;  %3507 = vst.msk [vmem:[%s6214_s24 + $0x44] sm:$0xf] %vm3489_vm7, %v4074_v16  ;;  %v3684_v49 = vsel %vm451_vm1, %v3629_v34, 0.0  ;;  %v3236_v59 = vpop.permute.xlu1 %3235 }
 0x231   : > { %v4477_v39 = vpop.f32.mrb[20].mxu1  ;;  %v3565_v19 = vadd.f32 %v3564_v38, %v3563_v32  ;;  %v6356_v6 = vpop.permute.xlu0 %3240 }
 0x232   : > { %v4685_v63 = vadd.f32 %v4645_v25, %v4477_v39  ;;  %v1738_v1 = vpop.f32.mrb[21].mxu1  ;;  %v3685_v35 = vadd.f32 %v3684_v49, %v3683_v14 }
 0x233   : > { %v4686_v37 = vadd.f32 %v2942_v52, %v1738_v1  ;;  %v4478_v45 = vpop.f32.mrb[22].mxu1  ;;  %v3567_v22 = vadd.f32 %v3566_v57, %v3565_v19 }
 0x234   : > { %v3315_v4 = vmul.f32 %v4685_v63, %v6306_v60  ;;  %v4687_v17 = vadd.f32 %v4646_v28, %v4478_v45  ;;  %v1741_v40 = vpop.f32.mrb[23].mxu1  ;;  %v3687_v43 = vadd.f32 %v3686_v13, %v3685_v35  ;;  %v6371_v28 = vpop.permute.xlu1 %3245 }
 0x235   : > { %v3313_v55 = vmul.f32 %v4686_v37, %v6287_v9  ;;  %v4688_v54 = vadd.f32 %v2945_v0, %v1741_v40  ;;  %v4649_v18 = vpop.f32.mrb[24].mxu0  ;;  %v3251_v32 = vpop.permute.xlu0 %3250 }
 0x236   : > { %v4079_v8 = vpack.c.bf16 %v3315_v4, %v3315_v4  ;;  %v2958_v48 = vpop.f32.mrb[25].mxu0  ;;  %v3316_v58 = vmul.f32 %v4687_v17, %v6325_v5  ;;  %v3689_v26 = vadd.f32 %v3688_v27, %v3687_v43  ;;  %v3634_v29 = vmul.f32 %v3315_v4, %v3315_v4 }
 0x237   : > { %v4077_v23 = vpack.c.bf16 %v3313_v55, %v3313_v55  ;;  %v3568_v60 = vsel %vm451_vm1, %v3313_v55, 0.0  ;;  %v3632_v46 = vmul.f32 %v3313_v55, %v3313_v55  ;;  %v4650_v3 = vpop.f32.mrb[26].mxu0  ;;  %v3314_v53 = vmul.f32 %v4688_v54, %v6301_v51 }
 0x238   : > { %3512 = vst.msk [vmem:[%s6214_s24 + $0x58] sm:$0xf] %vm3489_vm7, %v4079_v8  ;;  %v3569_v9 = vadd.f32 %v3568_v60, %v3567_v22  ;;  %v2961_v61 = vpop.f32.mrb[27].mxu0  ;;  %v4080_v11 = vpack.c.bf16 %v3316_v58, %v3316_v58  ;;  %v3635_v41 = vmul.f32 %v3316_v58, %v3316_v58  ;;  %v3572_v31 = vsel %vm451_vm1, %v3315_v4, 0.0  ;;  %v3256_v54 = vpop.permute.xlu1 %3255 }
 0x239   : > { %3510 = vst.msk [vmem:[%s6214_s24 + $0x50] sm:$0xf] %vm3489_vm7, %v4077_v23  ;;  %v3690_v30 = vsel %vm451_vm1, %v3632_v46, 0.0  ;;  %v4481_v2 = vpop.f32.mrb[24].mxu1  ;;  %v4078_v10 = vpack.c.bf16 %v3314_v53, %v3314_v53  ;;  %v3570_v47 = vsel %vm451_vm1, %v3314_v53, 0.0  ;;  %v3633_v12 = vmul.f32 %v3314_v53, %v3314_v53 }
 0x23a   : > { %v3691_v5 = vadd.f32 %v3690_v30, %v3689_v26  ;;  %v1754_v15 = vpop.f32.mrb[25].mxu1  ;;  %3513 = vst.msk [vmem:[%s6214_s24 + $0x5c] sm:$0xf] %vm3489_vm7, %v4080_v11  ;;  %v3571_v25 = vadd.f32 %v3570_v47, %v3569_v9  ;;  %v4689_v51 = vadd.f32 %v4649_v18, %v4481_v2  ;;  %v3694_v34 = vsel %vm451_vm1, %v3634_v29, 0.0 }
 0x23b   : > { %v4690_v21 = vadd.f32 %v2958_v48, %v1754_v15  ;;  %v4482_v52 = vpop.f32.mrb[26].mxu1  ;;  %3511 = vst.msk [vmem:[%s6214_s24 + $0x54] sm:$0xf] %vm3489_vm7, %v4078_v10  ;;  %v3692_v33 = vsel %vm451_vm1, %v3633_v12, 0.0  ;;  %v3574_v7 = vsel %vm451_vm1, %v3316_v58, 0.0  ;;  %v3696_v63 = vsel %vm451_vm1, %v3635_v41, 0.0 }
 0x23c   : > { %v4691_v36 = vadd.f32 %v4650_v3, %v4482_v52  ;;  %v1757_v50 = vpop.f32.mrb[27].mxu1  ;;  %v3573_v20 = vadd.f32 %v3572_v31, %v3571_v25  ;;  %v3693_v16 = vadd.f32 %v3692_v33, %v3691_v5  ;;  %v3319_v44 = vmul.f32 %v4689_v51, %v3231_v24  ;;  %v3266_v52 = vpop.permute.xlu1 %3265 }
 0x23d   : > { %v3317_v0 = vmul.f32 %v4690_v21, %v6328_v56  ;;  %v4653_v42 = vpop.f32.mrb[28].mxu0  ;;  %v4692_v38 = vadd.f32 %v2961_v61, %v1757_v50 }
 0x23e   : > { %v3320_v39 = vmul.f32 %v4691_v36, %v3236_v59  ;;  %v2974_v14 = vpop.f32.mrb[29].mxu0  ;;  %v3695_v1 = vadd.f32 %v3694_v34, %v3693_v16  ;;  %v4083_v19 = vpack.c.bf16 %v3319_v44, %v3319_v44  ;;  %v3575_v24 = vadd.f32 %v3574_v7, %v3573_v20  ;;  %v6386_v59 = vpop.permute.xlu0 %3260 }
 0x23f   : > { %v4654_v49 = vpop.f32.mrb[30].mxu0  ;;  %v4081_v37 = vpack.c.bf16 %v3317_v0, %v3317_v0  ;;  %v3576_v56 = vsel %vm451_vm1, %v3317_v0, 0.0  ;;  %v3636_v45 = vmul.f32 %v3317_v0, %v3317_v0  ;;  %v3318_v55 = vmul.f32 %v4692_v38, %v6341_v62 }
 0x240   : > { %v2977_v57 = vpop.f32.mrb[31].mxu0  ;;  %3516 = vst.msk [vmem:[%s6214_s24 + $0x68] sm:$0xf] %vm3489_vm7, %v4083_v19  ;;  %v3697_v35 = vadd.f32 %v3696_v63, %v3695_v1  ;;  %v4084_v4 = vpack.c.bf16 %v3320_v39, %v3320_v39  ;;  %v3577_v40 = vadd.f32 %v3576_v56, %v3575_v24  ;;  %v3638_v18 = vmul.f32 %v3319_v44, %v3319_v44 }
 0x241   : > { %v4485_v17 = vpop.f32.mrb[28].mxu1  ;;  %3514 = vst.msk [vmem:[%s6214_s24 + $0x60] sm:$0xf] %vm3489_vm7, %v4081_v37  ;;  %v3698_v13 = vsel %vm451_vm1, %v3636_v45, 0.0  ;;  %v4082_v23 = vpack.c.bf16 %v3318_v55, %v3318_v55  ;;  %v3578_v60 = vsel %vm451_vm1, %v3318_v55, 0.0  ;;  %v3637_v46 = vmul.f32 %v3318_v55, %v3318_v55  ;;  %v3276_v55 = vpop.permute.xlu1 %3275 }
 0x242   : > { %v1770_v22 = vpop.f32.mrb[29].mxu1  ;;  %v3699_v27 = vadd.f32 %v3698_v13, %v3697_v35  ;;  %3517 = vst.msk [vmem:[%s6214_s24 + $0x6c] sm:$0xf] %vm3489_vm7, %v4084_v4  ;;  %v4693_v43 = vadd.f32 %v4653_v42, %v4485_v17  ;;  %v3579_v3 = vadd.f32 %v3578_v60, %v3577_v40  ;;  %v3580_v61 = vsel %vm451_vm1, %v3319_v44, 0.0  ;;  %v3271_v16 = vpop.permute.xlu0 %3270 }
 0x243   : > { %v4694_v8 = vadd.f32 %v2974_v14, %v1770_v22  ;;  %v4486_v48 = vpop.f32.mrb[30].mxu1  ;;  %v3639_v29 = vmul.f32 %v3320_v39, %v3320_v39  ;;  %3515 = vst.msk [vmem:[%s6214_s24 + $0x64] sm:$0xf] %vm3489_vm7, %v4082_v23  ;;  %v3700_v30 = vsel %vm451_vm1, %v3637_v46, 0.0  ;;  %v3702_v5 = vsel %vm451_vm1, %v3638_v18, 0.0 }
 0x244   : > { %v1773_v58 = vpop.f32.mrb[31].mxu1  ;;  %v3323_v9 = vmul.f32 %v4693_v43, %v3251_v32  ;;  %v4695_v26 = vadd.f32 %v4654_v49, %v4486_v48  ;;  %v3581_v10 = vadd.f32 %v3580_v61, %v3579_v3  ;;  %v3701_v47 = vadd.f32 %v3700_v30, %v3699_v27 }
 0x245   : > { %v3321_v62 = vmul.f32 %v4694_v8, %v6356_v6  ;;  %v4657_v53 = vpop.f32.mrb[32].mxu0  ;;  %v4696_v11 = vadd.f32 %v2977_v57, %v1773_v58  ;;  %v3582_v6 = vsel %vm451_vm1, %v3320_v39, 0.0  ;;  %v3704_v44 = vsel %vm451_vm1, %v3639_v29, 0.0 }
 0x246   : > { %v2990_v2 = vpop.f32.mrb[33].mxu0  ;;  %v4087_v12 = vpack.c.bf16 %v3323_v9, %v3323_v9  ;;  %v3703_v31 = vadd.f32 %v3702_v5, %v3701_v47  ;;  %v3583_v33 = vadd.f32 %v3582_v6, %v3581_v10  ;;  %v3324_v36 = vmul.f32 %v4695_v26, %v3256_v54  ;;  %v3281_v8 = vpop.permute.xlu0 %3280 }
 0x247   : > { %v4658_v15 = vpop.f32.mrb[34].mxu0  ;;  %v4085_v41 = vpack.c.bf16 %v3321_v62, %v3321_v62  ;;  %v3584_v25 = vsel %vm451_vm1, %v3321_v62, 0.0  ;;  %v3640_v51 = vmul.f32 %v3321_v62, %v3321_v62  ;;  %v3322_v50 = vmul.f32 %v4696_v11, %v6371_v28 }
 0x248   : > { %v2993_v21 = vpop.f32.mrb[35].mxu0  ;;  %3520 = vst.msk [vmem:[%s6214_s24 + $0x78] sm:$0xf] %vm3489_vm7, %v4087_v12  ;;  %v3642_v34 = vmul.f32 %v3323_v9, %v3323_v9  ;;  %v3585_v39 = vadd.f32 %v3584_v25, %v3583_v33  ;;  %v3705_v38 = vadd.f32 %v3704_v44, %v3703_v31  ;;  %v4088_v14 = vpack.c.bf16 %v3324_v36, %v3324_v36 }
 0x249   : > { %v4489_v20 = vpop.f32.mrb[32].mxu1  ;;  %3518 = vst.msk [vmem:[%s6214_s24 + $0x70] sm:$0xf] %vm3489_vm7, %v4085_v41  ;;  %v3706_v0 = vsel %vm451_vm1, %v3640_v51, 0.0  ;;  %v3588_v63 = vsel %vm451_vm1, %v3323_v9, 0.0  ;;  %v4086_v28 = vpack.c.bf16 %v3322_v50, %v3322_v50  ;;  %v3586_v1 = vsel %vm451_vm1, %v3322_v50, 0.0 }
 0x24a   : > { %v4697_v42 = vadd.f32 %v4657_v53, %v4489_v20  ;;  %v1786_v32 = vpop.f32.mrb[33].mxu1  ;;  %v3641_v19 = vmul.f32 %v3322_v50, %v3322_v50  ;;  %v3707_v37 = vadd.f32 %v3706_v0, %v3705_v38  ;;  %3521 = vst.msk [vmem:[%s6214_s24 + $0x7c] sm:$0xf] %vm3489_vm7, %v4088_v14  ;;  %v3587_v24 = vadd.f32 %v3586_v1, %v3585_v39  ;;  %v3286_v50 = vpop.permute.xlu1 %3285 }
 0x24b   : > { %v4490_v7 = vpop.f32.mrb[34].mxu1  ;;  %v4698_v45 = vadd.f32 %v2990_v2, %v1786_v32  ;;  %v3643_v35 = vmul.f32 %v3324_v36, %v3324_v36  ;;  %3519 = vst.msk [vmem:[%s6214_s24 + $0x74] sm:$0xf] %vm3489_vm7, %v4086_v28  ;;  %v3710_v22 = vsel %vm451_vm1, %v3642_v34, 0.0  ;;  %v3590_v48 = vsel %vm451_vm1, %v3324_v36, 0.0 }
 0x24c   : > { %v1789_v49 = vpop.f32.mrb[35].mxu1  ;;  %v3327_v56 = vmul.f32 %v4697_v42, %v3271_v16  ;;  %v3708_v4 = vsel %vm451_vm1, %v3641_v19, 0.0  ;;  %v4699_v17 = vadd.f32 %v4658_v15, %v4490_v7  ;;  %v3589_v54 = vadd.f32 %v3588_v63, %v3587_v24 }
 0x24d   : > { %v4661_v57 = vpop.f32.mrb[36].mxu0  ;;  %v4700_v40 = vadd.f32 %v2993_v21, %v1789_v49  ;;  %v3709_v18 = vadd.f32 %v3708_v4, %v3707_v37  ;;  %v3325_v23 = vmul.f32 %v4698_v45, %v6386_v59  ;;  %v3712_v26 = vsel %vm451_vm1, %v3643_v35, 0.0 }
 0x24e   : > { %v3006_v13 = vpop.f32.mrb[37].mxu0  ;;  %v4091_v27 = vpack.c.bf16 %v3327_v56, %v3327_v56  ;;  %v3328_v60 = vmul.f32 %v4699_v17, %v3276_v55  ;;  %v3591_v9 = vadd.f32 %v3590_v48, %v3589_v54  ;;  %v3646_v10 = vmul.f32 %v3327_v56, %v3327_v56 }
 0x24f   : > { %v4662_v43 = vpop.f32.mrb[38].mxu0  ;;  %v3326_v46 = vmul.f32 %v4700_v40, %v3266_v52  ;;  %v3711_v3 = vadd.f32 %v3710_v22, %v3709_v18  ;;  %v4089_v53 = vpack.c.bf16 %v3325_v23, %v3325_v23  ;;  %v3592_v61 = vsel %vm451_vm1, %v3325_v23, 0.0  ;;  %v3291_v52 = vpop.permute.xlu0 %3290 }
 0x250   : > { %v3009_v58 = vpop.f32.mrb[39].mxu0  ;;  %3524 = vst.msk [vmem:[%s6214_s24 + $0x88] sm:$0xf] %vm3489_vm7, %v4091_v27  ;;  %v3644_v29 = vmul.f32 %v3325_v23, %v3325_v23  ;;  %v3593_v11 = vadd.f32 %v3592_v61, %v3591_v9  ;;  %v4092_v59 = vpack.c.bf16 %v3328_v60, %v3328_v60  ;;  %v3596_v31 = vsel %vm451_vm1, %v3327_v56, 0.0 }
 0x251   : > { %v4493_v62 = vpop.f32.mrb[36].mxu1  ;;  %v3713_v2 = vadd.f32 %v3712_v26, %v3711_v3  ;;  %3522 = vst.msk [vmem:[%s6214_s24 + $0x80] sm:$0xf] %vm3489_vm7, %v4089_v53  ;;  %v4090_v12 = vpack.c.bf16 %v3326_v46, %v3326_v46  ;;  %v3594_v15 = vsel %vm451_vm1, %v3326_v46, 0.0  ;;  %v3645_v51 = vmul.f32 %v3326_v46, %v3326_v46 }
 0x252   : > { %v1802_v30 = vpop.f32.mrb[37].mxu1  ;;  %v3714_v47 = vsel %vm451_vm1, %v3644_v29, 0.0  ;;  %3525 = vst.msk [vmem:[%s6214_s24 + $0x8c] sm:$0xf] %vm3489_vm7, %v4092_v59  ;;  %v3595_v25 = vadd.f32 %v3594_v15, %v3593_v11  ;;  %v4701_v21 = vadd.f32 %v4661_v57, %v4493_v62  ;;  %v3647_v20 = vmul.f32 %v3328_v60, %v3328_v60 }
 0x253   : > { %v4494_v5 = vpop.f32.mrb[38].mxu1  ;;  %v3715_v41 = vadd.f32 %v3714_v47, %v3713_v2  ;;  %3523 = vst.msk [vmem:[%s6214_s24 + $0x84] sm:$0xf] %vm3489_vm7, %v4090_v12  ;;  %v4702_v33 = vadd.f32 %v3006_v13, %v1802_v30  ;;  %v3716_v44 = vsel %vm451_vm1, %v3645_v51, 0.0  ;;  %v3598_v42 = vsel %vm451_vm1, %v3328_v60, 0.0 }
 0x254   : > { %v1805_v6 = vpop.f32.mrb[39].mxu1  ;;  %v3597_v16 = vadd.f32 %v3596_v31, %v3595_v25  ;;  %v3331_v0 = vmul.f32 %v4701_v21, %v3291_v52  ;;  %v3718_v38 = vsel %vm451_vm1, %v3646_v10, 0.0  ;;  %v3720_v49 = vsel %vm451_vm1, %v3647_v20, 0.0 }
 0x255   : > { %v4703_v36 = vadd.f32 %v3009_v58, %v1805_v6  ;;  %v3717_v32 = vadd.f32 %v3716_v44, %v3715_v41  ;;  %v3329_v34 = vmul.f32 %v4702_v33, %v3281_v8 }
 0x256   : > { %v4095_v14 = vpack.c.bf16 %v3331_v0, %v3331_v0  ;;  %v3599_v7 = vadd.f32 %v3598_v42, %v3597_v16  ;;  %v3650_v4 = vmul.f32 %v3331_v0, %v3331_v0  ;;  %v3604_v40 = vsel %vm451_vm1, %v3331_v0, 0.0 }
 0x257   : > { %v3330_v39 = vmul.f32 %v4703_v36, %v3286_v50  ;;  %v3719_v63 = vadd.f32 %v3718_v38, %v3717_v32  ;;  %v4093_v28 = vpack.c.bf16 %v3329_v34, %v3329_v34  ;;  %v3600_v1 = vsel %vm451_vm1, %v3329_v34, 0.0 }
 0x258   : > { %v3648_v19 = vmul.f32 %v3329_v34, %v3329_v34  ;;  %3528 = vst.msk [vmem:[%s6214_s24 + $0x98] sm:$0xf] %vm3489_vm7, %v4095_v14  ;;  %v3601_v37 = vadd.f32 %v3600_v1, %v3599_v7  ;;  %v3726_v18 = vsel %vm451_vm1, %v3650_v4, 0.0 }
 0x259   : > { %v4094_v24 = vpack.c.bf16 %v3330_v39, %v3330_v39  ;;  %v3602_v56 = vsel %vm451_vm1, %v3330_v39, 0.0  ;;  %3526 = vst.msk [vmem:[%s6214_s24 + $0x90] sm:$0xf] %vm3489_vm7, %v4093_v28  ;;  %v3721_v45 = vadd.f32 %v3720_v49, %v3719_v63  ;;  %v3649_v35 = vmul.f32 %v3330_v39, %v3330_v39 }
 0x25a   : > { %v3722_v57 = vsel %vm451_vm1, %v3648_v19, 0.0  ;;  %v3603_v17 = vadd.f32 %v3602_v56, %v3601_v37 }
 0x25b   : > { %3527 = vst.msk [vmem:[%s6214_s24 + $0x94] sm:$0xf] %vm3489_vm7, %v4094_v24  ;;  %v3723_v13 = vadd.f32 %v3722_v57, %v3721_v45  ;;  %v3724_v55 = vsel %vm451_vm1, %v3649_v35, 0.0 }
 0x25c   : > { %v3605_v22 = vadd.f32 %v3604_v40, %v3603_v17 }
 0x25d   : > { %v3725_v54 = vadd.f32 %v3724_v55, %v3723_v13 }
 0x25e   : > { %v3606_v58 = vrot.slane %v3605_v22, 4 }
 0x25f   : > { %v3727_v27 = vadd.f32 %v3726_v18, %v3725_v54 }
 0x260   : > { %v3607_v3 = vadd.f32 %v3606_v58, %v3605_v22 }
 0x261   : > { %v3728_v43 = vrot.slane %v3727_v27, 4 }
 0x262   : > { %v3608_v9 = vrot.slane %v3607_v3, 2 }
 0x263   : > { %v3729_v8 = vadd.f32 %v3728_v43, %v3727_v27 }
 0x264   : > { %v3609_v62 = vadd.f32 %v3608_v9, %v3607_v3 }
 0x265   : > { %v3730_v48 = vrot.slane %v3729_v8, 2 }
 0x266   : > { %v3610_v26 = vrot.slane %v3609_v62, 1 }
 0x267   : > { %v3731_v23 = vadd.f32 %v3730_v48, %v3729_v8 }
 0x268   : > { %v3611_v53 = vadd.f32 %v3610_v26, %v3609_v62 }
 0x269   : > { %v3732_v60 = vrot.slane %v3731_v23, 1 }
 0x26b   : > { %v3733_v46 = vadd.f32 %v3732_v60, %v3731_v23 }
 0x26d   : > { %3735 = vrot.lane.b32.xlu1 %v3733_v46, %s5021_s25 }
 0x2df   : > { %v3736_v61 = vpop.permute.xlu1 %3735 }
 0x2e0   : > { %v3738_v29 = vsel %vm451_vm1, %v3611_v53, %v3736_v61 }
 0x2e1   : > { %3740 = vst.msk [vmem:[%s206_s28] sm:$0x1] %vm3739_vm8, %v3738_v29 }
 0x2e2 PF: > { %s15_s15 = sadd.s32 1, %s5016_s15  }
 0x2e3   : > { %p12_p4 = scmp.ge.s32.totalorder %s15_s15, 4  }
 0x2e5   :  { %14 = sbr.rel (!%p12_p4) target bundleno = 1 (0x1), region = 82 }

// kernel: basic_block.4
= control target key start
LH: loop header
LB: loop body
LE: loop exit
PB: predicated region body
PF: predicated region fallthrough
CT: control target
= control target key end

     0   :  { %s5416_s21 = smov 0   ;;  %s7286_s0 = inlined_call_operand.vmem [shape: bf16[2,312,4], index: 0, kind: input, shape index: {}]   ;;  %s7287_s1 = inlined_call_operand.vmem [shape: bf16[9,4,4], index: 1, kind: input, shape index: {}]   ;;  %s7288_s2 = inlined_call_operand.vmem [shape: f32[312,1], index: 2, kind: input, shape index: {}]   ;;  %s7289_s3 = inlined_call_operand.vmem [shape: f32[1,4], index: 3, kind: input, shape index: {}]   ;;  %s7290_s4 = inlined_call_operand.vmem [shape: f32[1,4], index: 4, kind: input, shape index: {}]   ;;  %s7291_s5 = inlined_call_operand.vmem [shape: bf16[2,312,4], index: 5, kind: output, shape index: {0}]   ;;  %s7292_s6 = inlined_call_operand.vmem [shape: f32[2,1,8], index: 6, kind: output, shape index: {1}]  }
   0x1 LB: > { %s4084_s22 = sadd.s32 4294967295, %s5375_s21   ;;  %p4088_p0 = scmp.ge.s32.totalorder %s5375_s21, 1  ;;  %s5375_s21 = sphi %s5416_s21, %s17_s21  }
   0x2   : > { %p215_p1 = scmp.lt.s32.totalorder %s5375_s21, 3 }
   0x4   : > { %p216_p2 = pnand %p4088_p0, %p215_p1 }
   0x6   : > { %219 = sbr.rel (%p216_p2) target bundleno = 882 (0x372), region = 40 }
   0xd   : > { %v473_v0 = vld [vmem:[%s7288_s2 + $0x10] sm:$0xff]  ;;  %v471_v1 = vld [vmem:[%s7288_s2] sm:$0xff]  ;;  %v7293_v2 = vmov 0   ;;  %v474_v3 = vld [vmem:[%s7288_s2 + $0x18] sm:$0xff]  ;;  %vm1009_vm0 = vcmask 1041408   ;;  %p248_p3 = scmp.lt.s32.totalorder %s4084_s22, 1 }
   0xe   : > { %5367 = vset.pattern.permute.xlu1 %v7293_v2  ;;  %5366 = vset.pattern.permute.xlu0 %v7293_v2  ;;  %v472_v4 = vld [vmem:[%s7288_s2 + $0x8] sm:$0xff]  ;;  %v475_v6 = vld [vmem:[%s7288_s2 + $0x20] sm:$0xff]  ;;  %v478_v7 = vld [vmem:[%s7288_s2 + $0x38] sm:$0xff]  ;;  %vm768_vm1 = vsmask.f32 4352  ;;  %vm948_vm2 = vcmask 31744  }
   0xf   : > { %522 = vperm.xlu1 %5367, %v473_v0   ;;  %512 = vperm.xlu0 %5366, %v471_v1   ;;  %v476_v5 = vld [vmem:[%s7288_s2 + $0x28] sm:$0xff]  ;;  %v477_v8 = vld [vmem:[%s7288_s2 + $0x30] sm:$0xff]  ;;  %v4093_v9 = vld [vmem:[%s7287_s1 + $0x2] sm:$0x3]  ;;  %s7675_s22 = smov (!%p248_p3, %s4084_s22), 1  ;;  %vm1522_vm3 = vcmask 1043456  }
  0x10   : > { %v480_v10 = vld [vmem:[%s7288_s2 + $0x48] sm:$0xff]  ;;  %v479_v11 = vld [vmem:[%s7288_s2 + $0x40] sm:$0xff]  ;;  %5343 = vmatprep.subr.msk.bf16.mxu1 %vm1009_vm0, %v4093_v9  ;;  %v1011_v13 = vsel %vm1009_vm0, %v4093_v9, 0  ;;  %v482_v17 = vld [vmem:[%s7288_s2 + $0x58] sm:$0xff]  ;;  %s5353_s15 = smul.u32 156, %s7675_s22  ;;  %vm1225_vm5 = vcmask 1044480   ;;  %s260_s27 = scalar_lea.vmem %s7292_s6, %s7675_s22 }
  0x11   : > { %v4176_v12 = vld [vmem:[%s7287_s1 + $0x8] sm:$0x3]  ;;  %4645 = vmatpush3.bf16.msra.mxu1 %v1011_v13  ;;  %v5471_v15 = vld [vmem:[%s7287_s1] sm:$0x3]  ;;  %v5476_v16 = vld [vmem:[%s7287_s1 + $0xa] sm:$0x3] }
  0x12   : > { %5347 = vmatprep.subr.msk.bf16.mxu0 %vm1009_vm0, %v4176_v12  ;;  %v5466_v14 = vsel %vm1009_vm0, %v4176_v12, 0  ;;  %v481_v18 = vld [vmem:[%s7288_s2 + $0x50] sm:$0xff]  ;;  %5344 = vmatprep.subr.msk.bf16.mxu1 %vm1009_vm0, %v5471_v15  ;;  %v484_v19 = vld [vmem:[%s7288_s2 + $0x68] sm:$0xff]  ;;  %v483_v20 = vld [vmem:[%s7288_s2 + $0x60] sm:$0xff]  ;;  %s5549_s24 = scalar_lea.vmem %s7286_s0, %s5353_s15  ;;  %vm2354_vm4 = vsmask.f32 3328  ;;  %s7070_s23 = scalar_lea.vmem %s7291_s5, %s5353_s15 }
  0x13   : > { %527 = vperm.xlu1 %5367, %v474_v3   ;;  %517 = vperm.xlu0 %5366, %v472_v4   ;;  %7420 = vst [vmem:[#allocation2_spill] sm:$0xff] %v5466_v14  ;;  %v486_v21 = vld [vmem:[%s7288_s2 + $0x78] sm:$0xff]  ;;  %v485_v22 = vld [vmem:[%s7288_s2 + $0x70] sm:$0xff]  ;;  %v488_v23 = vld [vmem:[%s7288_s2 + $0x88] sm:$0xff]  ;;  %vm3221_vm6 = vcmask 1042432   ;;  %vm3752_vm7 = vcmask 27648  }
  0x14   : > { %4813 = vmatpush3.bf16.msra.mxu0 %v5466_v14  ;;  %v487_v24 = vld [vmem:[%s7288_s2 + $0x80] sm:$0xff]  ;;  %v490_v25 = vld [vmem:[%s7288_s2 + $0x98] sm:$0xff]  ;;  %v489_v26 = vld [vmem:[%s7288_s2 + $0x90] sm:$0xff]  ;;  %s5380_s15 = smov 4   ;;  %vm4002_vm8 = vcmask 57344  }
  0x15   : > { %5349 = vmatprep.subr.msk.bf16.mxu0 %vm1009_vm0, %v5476_v16  ;;  %v492_v27 = vld [vmem:[%s7288_s2 + $0xa8] sm:$0xff]  ;;  %v491_v28 = vld [vmem:[%s7288_s2 + $0xa0] sm:$0xff]  ;;  %v494_v29 = vld [vmem:[%s7288_s2 + $0xb8] sm:$0xff] }
  0x16   : > { %v493_v30 = vld [vmem:[%s7288_s2 + $0xb0] sm:$0xff]  ;;  %v496_v31 = vld [vmem:[%s7288_s2 + $0xc8] sm:$0xff]  ;;  %v495_v32 = vld [vmem:[%s7288_s2 + $0xc0] sm:$0xff] }
  0x17   : > { %537 = vperm.xlu1 %5367, %v476_v5   ;;  %532 = vperm.xlu0 %5366, %v475_v6   ;;  %v498_v33 = vld [vmem:[%s7288_s2 + $0xd8] sm:$0xff]  ;;  %v497_v34 = vld [vmem:[%s7288_s2 + $0xd0] sm:$0xff]  ;;  %v500_v36 = vld [vmem:[%s7288_s2 + $0xe8] sm:$0xff] }
  0x18   : > { %v5552_v35 = vld [vmem:[%s5549_s24 + $0x78] sm:$0xff]   ;;  %v499_v37 = vld [vmem:[%s7288_s2 + $0xe0] sm:$0xff]  ;;  %v501_v44 = vld [vmem:[%s7288_s2 + $0xf0] sm:$0xff] }
  0x19   : > { %v4424_v38 = vunpack.c.h.bf16 %v5552_v35  ;;  %v5564_v39 = vld [vmem:[%s7289_s3] ss:$0 sm:$0xff]  ;;  %v502_v43 = vld [vmem:[%s7288_s2 + $0xf8] sm:$0xff]  ;;  %v4453_v50 = vld [vmem:[%s5549_s24 + $0x88] sm:$0xff]  }
  0x1a   : > { %v5570_v41 = vld [vmem:[%s7290_s4] ss:$0 sm:$0xff]  ;;  %v504_v51 = vld [vmem:[%s7288_s2 + $0x108] sm:$0xff]  ;;  %v4432_v55 = vunpack.c.h.bf16 %v4453_v50  ;;  %v4431_v56 = vunpack.c.l.bf16 %v4453_v50  ;;  %v4454_v59 = vld [vmem:[%s5549_s24 + $0x90] sm:$0xff]  }
  0x1b   : > { %547 = vperm.xlu1 %5367, %v478_v7   ;;  %542 = vperm.xlu0 %5366, %v477_v8   ;;  %v378_v40 = vmul.f32 %v4424_v38, %v5564_v39  ;;  %v4452_v42 = vld [vmem:[%s5549_s24 + $0x80] sm:$0xff]   ;;  %v506_v60 = vld [vmem:[%s7288_s2 + $0x118] sm:$0xff]  ;;  %v505_v61 = vld [vmem:[%s7288_s2 + $0x110] sm:$0xff]  ;;  %v4436_v0 = vunpack.c.h.bf16 %v4454_v59  ;;  %v4435_v1 = vunpack.c.l.bf16 %v4454_v59  ;;  %v5649_v38 = vrot.slane %v7293_v2, 3 }
  0x1c   : > { %v4428_v46 = vunpack.c.h.bf16 %v4452_v42  ;;  %v4427_v47 = vunpack.c.l.bf16 %v4452_v42  ;;  %v503_v52 = vld [vmem:[%s7288_s2 + $0x100] sm:$0xff]  ;;  %v382_v57 = vmul.f32 %v4432_v55, %v5564_v39  ;;  %v381_v58 = vmul.f32 %v4431_v56, %v5564_v39  ;;  %v300_v5 = vld [vmem:[%s5549_s24 + $0x98] sm:$0xf]  ;;  %v508_v6 = vld [vmem:[%s7288_s2 + $0x128] sm:$0xff] }
  0x1d   : > { %v5580_v45 = vadd.f32 %v5570_v41, %v378_v40  ;;  %v384_v3 = vmul.f32 %v4436_v0, %v5564_v39  ;;  %v383_v4 = vmul.f32 %v4435_v1, %v5564_v39  ;;  %v507_v7 = vld [vmem:[%s7288_s2 + $0x120] sm:$0xff]  ;;  %v509_v12 = vld [vmem:[%s7288_s2 + $0x130] sm:$0xff]  ;;  %v5652_v40 = vrot.slane %v7293_v2, 4  ;;  %v4441_v42 = vld [vmem:[%s5549_s24 + $0x28] sm:$0xff]  }
  0x1e   : > { %v380_v48 = vmul.f32 %v4428_v46, %v5564_v39  ;;  %v379_v49 = vmul.f32 %v4427_v47, %v5564_v39  ;;  %v5607_v62 = vadd.f32 %v5570_v41, %v382_v57  ;;  %v5610_v63 = vadd.f32 %v5570_v41, %v381_v58  ;;  %v4442_v59 = vld [vmem:[%s5549_s24 + $0x30] sm:$0xff]  }
  0x1f   : > { %557 = vperm.xlu1 %5367, %v480_v10   ;;  %552 = vperm.xlu0 %5366, %v479_v11   ;;  %v5622_v8 = vadd.f32 %v5570_v41, %v384_v3  ;;  %v5625_v9 = vadd.f32 %v5570_v41, %v383_v4  ;;  %v339_v10 = vunpack.c.l.bf16 %v300_v5  ;;  %7421 = vst [vmem:[#allocation3_spill] sm:$0xff] %v5652_v40  ;;  %v4384_v55 = vunpack.c.h.bf16 %v4441_v42  ;;  %v4443_v5 = vld [vmem:[%s5549_s24 + $0x38] sm:$0xff]  }
  0x20   : > { %v5592_v53 = vadd.f32 %v5570_v41, %v380_v48  ;;  %v5595_v54 = vadd.f32 %v5570_v41, %v379_v49  ;;  %v4383_v58 = vunpack.c.l.bf16 %v4441_v42 }
  0x21   : > { %v385_v11 = vmul.f32 %v5564_v39, %v339_v10 }
  0x23   : > { %567 = vperm.xlu1 %5367, %v482_v17   ;;  %562 = vperm.xlu0 %5366, %v481_v18   ;;  %v5632_v13 = vadd.f32 %v5570_v41, %v385_v11  ;;  %v4437_v17 = vld [vmem:[%s5549_s24 + $0x8] sm:$0xff]   ;;  %v4362_v18 = vld [vmem:[%s5549_s24] sm:$0xff]  }
  0x27   : > { %577 = vperm.xlu1 %5367, %v484_v19   ;;  %572 = vperm.xlu0 %5366, %v483_v20   ;;  %v4438_v19 = vld [vmem:[%s5549_s24 + $0x10] sm:$0xff]   ;;  %v4367_v20 = vunpack.c.l.bf16 %v4437_v17 }
  0x2b   : > { %587 = vperm.xlu1 %5367, %v486_v21   ;;  %582 = vperm.xlu0 %5366, %v485_v22   ;;  %v4363_v21 = vunpack.c.l.bf16 %v4362_v18  ;;  %v4368_v22 = vunpack.c.h.bf16 %v4437_v17 }
  0x2f   : > { %597 = vperm.xlu1 %5367, %v488_v23   ;;  %592 = vperm.xlu0 %5366, %v487_v24   ;;  %v4364_v23 = vunpack.c.h.bf16 %v4362_v18  ;;  %v4372_v24 = vunpack.c.h.bf16 %v4438_v19  ;;  %v358_v18 = vmul.f32 %v4384_v55, %v5564_v39 }
  0x33   : > { %607 = vperm.xlu1 %5367, %v490_v25   ;;  %602 = vperm.xlu0 %5366, %v489_v26   ;;  %v4439_v25 = vld [vmem:[%s5549_s24 + $0x18] sm:$0xff]   ;;  %v4371_v26 = vunpack.c.l.bf16 %v4438_v19  ;;  %v4388_v19 = vunpack.c.h.bf16 %v4442_v59 }
  0x37   : > { %617 = vperm.xlu1 %5367, %v492_v27   ;;  %612 = vperm.xlu0 %5366, %v491_v28   ;;  %v349_v27 = vmul.f32 %v4367_v20, %v5564_v39  ;;  %v347_v28 = vmul.f32 %v4363_v21, %v5564_v39  ;;  %v4387_v20 = vunpack.c.l.bf16 %v4442_v59  ;;  %v4445_v21 = vld [vmem:[%s5549_s24 + $0x48] sm:$0xff]  }
  0x39   : > { %v359_v42 = vmul.f32 %v4387_v20, %v5564_v39 }
  0x3b   : > { %627 = vperm.xlu1 %5367, %v494_v29   ;;  %622 = vperm.xlu0 %5366, %v493_v30   ;;  %v350_v29 = vmul.f32 %v4368_v22, %v5564_v39  ;;  %v4376_v30 = vunpack.c.h.bf16 %v4439_v25  ;;  %v5698_v22 = vsel %vm1009_vm0, %v5471_v15, 0 }
  0x3d   : > { %v354_v46 = vmul.f32 %v4376_v30, %v5564_v39  ;;  %v4446_v30 = vld [vmem:[%s5549_s24 + $0x50] sm:$0xff]  }
  0x3e   : > { %v4404_v55 = vunpack.c.h.bf16 %v4446_v30 }
  0x3f   : > { %637 = vperm.xlu1 %5367, %v496_v31   ;;  %632 = vperm.xlu0 %5366, %v495_v32   ;;  %v348_v31 = vmul.f32 %v4364_v23, %v5564_v39  ;;  %v352_v32 = vmul.f32 %v4372_v24, %v5564_v39  ;;  %v5682_v3 = vadd.f32 %v5570_v41, %v354_v46  ;;  %v5702_v23 = vsel %vm1009_vm0, %v5476_v16, 0 }
  0x40   : > { %v357_v24 = vmul.f32 %v4383_v58, %v5564_v39  ;;  %v4400_v16 = vunpack.c.h.bf16 %v4445_v21  ;;  %v4399_v46 = vunpack.c.l.bf16 %v4445_v21  ;;  %v4403_v58 = vunpack.c.l.bf16 %v4446_v30  ;;  %v4450_v21 = vld [vmem:[%s5549_s24 + $0x70] sm:$0xff]  }
  0x41   : > { %v5663_v48 = vadd.f32 %v5570_v41, %v348_v31  ;;  %v5666_v49 = vadd.f32 %v5570_v41, %v352_v32 }
  0x42   : > { %v365_v30 = vmul.f32 %v4399_v46, %v5564_v39 }
  0x43   : > { %647 = vperm.xlu1 %5367, %v498_v33   ;;  %642 = vperm.xlu0 %5366, %v497_v34   ;;  %v4375_v33 = vunpack.c.l.bf16 %v4439_v25  ;;  %v4440_v34 = vld [vmem:[%s5549_s24 + $0x20] sm:$0xff]   ;;  %v4392_v25 = vunpack.c.h.bf16 %v4443_v5 }
  0x44   : > { %v4380_v47 = vunpack.c.h.bf16 %v4440_v34 }
  0x45   : > { %v353_v50 = vmul.f32 %v4375_v33, %v5564_v39  ;;  %v4447_v33 = vld [vmem:[%s5549_s24 + $0x58] sm:$0xff]  }
  0x46   : > { %v356_v4 = vmul.f32 %v4380_v47, %v5564_v39  ;;  %v4448_v47 = vld [vmem:[%s5549_s24 + $0x60] sm:$0xff]  }
  0x47   : > { %657 = vperm.xlu1 %5367, %v500_v36   ;;  %652 = vperm.xlu0 %5366, %v499_v37   ;;  %v351_v36 = vmul.f32 %v4371_v26, %v5564_v39  ;;  %v5646_v37 = vadd.f32 %v5570_v41, %v349_v27  ;;  %v5689_v10 = vadd.f32 %v5570_v41, %v353_v50  ;;  %v4412_v20 = vunpack.c.h.bf16 %v4448_v47 }
  0x48   : > { %v5707_v27 = vadd.f32 %v5570_v41, %v356_v4  ;;  %v5722_v50 = vadd.f32 %v5570_v41, %v357_v24 }
  0x49   : > { %v434_v56 = vmax.f32 %v5646_v37, 0.0 }
  0x4b   : > { %667 = vperm.xlu1 %5367, %v502_v43   ;;  %662 = vperm.xlu0 %5366, %v501_v44   ;;  %v5656_v43 = vadd.f32 %v5570_v41, %v347_v28  ;;  %v5659_v44 = vadd.f32 %v5570_v41, %v350_v29  ;;  %v4391_v28 = vunpack.c.l.bf16 %v4443_v5 }
  0x4d   : > { %v432_v0 = vmax.f32 %v5656_v43, 0.0  ;;  %v435_v1 = vmax.f32 %v5659_v44, 0.0  ;;  %v361_v4 = vmul.f32 %v4391_v28, %v5564_v39 }
  0x4f   : > { %677 = vperm.xlu1 %5367, %v504_v51   ;;  %672 = vperm.xlu0 %5366, %v503_v52   ;;  %v4379_v51 = vunpack.c.l.bf16 %v4440_v34  ;;  %v5670_v52 = vadd.f32 %v5570_v41, %v351_v36  ;;  %v5716_v34 = vadd.f32 %v5570_v41, %v358_v18  ;;  %v360_v36 = vmul.f32 %v4388_v19, %v5564_v39 }
  0x50   : > { %v366_v18 = vmul.f32 %v4400_v16, %v5564_v39  ;;  %v4407_v19 = vunpack.c.l.bf16 %v4447_v33  ;;  %v4411_v16 = vunpack.c.l.bf16 %v4448_v47  ;;  %v5745_v2 = vadd.f32 %v5570_v41, %v361_v4 }
  0x51   : > { %v355_v11 = vmul.f32 %v4379_v51, %v5564_v39  ;;  %v436_v17 = vmax.f32 %v5670_v52, 0.0  ;;  %v362_v51 = vmul.f32 %v4392_v25, %v5564_v39  ;;  %v5732_v24 = vadd.f32 %v5570_v41, %v360_v36 }
  0x52   : > { %v5735_v25 = vadd.f32 %v5570_v41, %v359_v42  ;;  %v372_v47 = vmul.f32 %v4412_v20, %v5564_v39  ;;  %v371_v4 = vmul.f32 %v4411_v16, %v5564_v39 }
  0x53   : > { %687 = vperm.xlu1 %5367, %v506_v60   ;;  %682 = vperm.xlu0 %5366, %v505_v61   ;;  %v7294_v60 = vmov 0.0|0.0   ;;  %v5712_v15 = vadd.f32 %v5570_v41, %v355_v11  ;;  %v4408_v11 = vunpack.c.h.bf16 %v4447_v33  ;;  %v5739_v28 = vadd.f32 %v5570_v41, %v362_v51  ;;  %v4449_v33 = vld [vmem:[%s5549_s24 + $0x68] sm:$0xff]  }
  0x54   : > { %v5677_v61 = vrot.slane %v7294_v60, 3  ;;  %v5755_v51 = vadd.f32 %v5570_v41, %v366_v18  ;;  %v5763_v60 = vadd.f32 %v5570_v41, %v365_v30  ;;  %v5792_v43 = vadd.f32 %v5570_v41, %v372_v47 }
  0x55   : > { %v370_v42 = vmul.f32 %v4408_v11, %v5564_v39  ;;  %v4416_v59 = vunpack.c.h.bf16 %v4449_v33  ;;  %v5808_v26 = vadd.f32 %v5570_v41, %v371_v4  ;;  %v4415_v37 = vunpack.c.l.bf16 %v4449_v33 }
  0x56   : > { %v4419_v47 = vunpack.c.l.bf16 %v4450_v21 }
  0x57   : > { %697 = vperm.xlu1 %5367, %v508_v6   ;;  %692 = vperm.xlu0 %5366, %v507_v7   ;;  %v433_v6 = vmax.f32 %v5663_v48, 0.0  ;;  %v5784_v18 = vadd.f32 %v5570_v41, %v370_v42  ;;  %v4420_v7 = vunpack.c.h.bf16 %v4450_v21 }
  0x58   : > { %v375_v21 = vmul.f32 %v4419_v47, %v5564_v39 }
  0x5b   : > { %702 = vperm.xlu0 %5366, %v509_v12   ;;  %v4444_v12 = vld [vmem:[%s5549_s24 + $0x40] sm:$0xff]  }
  0x5c   : > { %v4396_v29 = vunpack.c.h.bf16 %v4444_v12  ;;  %v4395_v32 = vunpack.c.l.bf16 %v4444_v12 }
  0x5e   : > { %v364_v5 = vmul.f32 %v4396_v29, %v5564_v39  ;;  %v363_v12 = vmul.f32 %v4395_v32, %v5564_v39  ;;  %v368_v29 = vmul.f32 %v4404_v55, %v5564_v39  ;;  %v367_v32 = vmul.f32 %v4403_v58, %v5564_v39 }
  0x5f   : > { %v369_v55 = vmul.f32 %v4407_v19, %v5564_v39 }
  0x60   : > { %v5748_v36 = vadd.f32 %v5570_v41, %v364_v5  ;;  %v5752_v46 = vadd.f32 %v5570_v41, %v363_v12  ;;  %v5771_v19 = vadd.f32 %v5570_v41, %v368_v29  ;;  %v5774_v20 = vadd.f32 %v5570_v41, %v367_v32 }
  0x61   : > { %v5789_v16 = vadd.f32 %v5570_v41, %v369_v55  ;;  %v5379_v5 = vmov 0.0  }
  0x8e   : > { %v5765_v11 = vpop.permute.xlu1 %522  ;;  %v5767_v12 = vpop.permute.xlu0 %512 }
  0x8f   : > { %7422 = vst [vmem:[#allocation4_spill] sm:$0xff] %v5765_v11  ;;  %7423 = vst [vmem:[#allocation5_spill] sm:$0xff] %v5767_v12  ;;  %v705_v30 = vmul.f32 %v5767_v12, %v432_v0  ;;  %v707_v0 = vmul.f32 %v5765_v11, %v434_v56 }
  0x91   : > { %v5797_v58 = vpack.c.bf16 %v705_v30, %v5379_v5 }
  0x92   : > { %v5801_v29 = vpop.permute.xlu1 %527  ;;  %v5803_v32 = vpop.permute.xlu0 %517 }
  0x93   : > { %7424 = vst [vmem:[#allocation6_spill] sm:$0xff] %v5801_v29  ;;  %7425 = vst [vmem:[#allocation7_spill] sm:$0xff] %v5803_v32  ;;  %v706_v56 = vmul.f32 %v5803_v32, %v433_v6  ;;  %v7297_v5 = vshrl.u32 %v5797_v58, 16  ;;  %v7296_v30 = vshll.u32 %v5797_v58, 16  ;;  %v374_v6 = vmul.f32 %v4416_v59, %v5564_v39 }
  0x94   : > { %v708_v4 = vmul.f32 %v5801_v29, %v435_v1  ;;  %v7299_v59 = vrot.slane %v5797_v58, 4  ;;  %v376_v32 = vmul.f32 %v4420_v7, %v5564_v39 }
  0x95   : > { %v5818_v57 = vpack.c.bf16 %v707_v0, %v706_v56  ;;  %v780_v33 = vrot.slane %v7297_v5, 3  ;;  %v783_v48 = vrot.slane %v7296_v30, 4  ;;  %v373_v0 = vmul.f32 %v4415_v37, %v5564_v39 }
  0x96   : > { %v5828_v42 = vpop.permute.xlu1 %537  ;;  %v5830_v31 = vpop.permute.xlu0 %532  ;;  %v4423_v56 = vunpack.c.l.bf16 %v5552_v35  ;;  %v7429_v35 = vor.u32 %v5652_v40, %v5649_v38  ;;  %v7459_v40 = vmax.f32 %v5745_v2, 0.0 }
  0x97   : > { %7426 = vst [vmem:[#allocation8_spill] sm:$0xff] %v5818_v57  ;;  %7427 = vst [vmem:[#allocation9_spill] sm:$0xff] %v5828_v42  ;;  %v709_v55 = vmul.f32 %v5830_v31, %v436_v17  ;;  %v784_v30 = vor.u32 %v783_v48, %v780_v33  ;;  %v1526_v44 = vrot.slane %v5818_v57, 4  ;;  %v7301_v1 = vshrl.u32 %v5818_v57, 16 }
  0x98   : > { %7428 = vst [vmem:[#allocation10_spill] sm:$0xff] %v5830_v31  ;;  %v7303_v5 = vshll.u32 %v5818_v57, 16  ;;  %v5856_v33 = vadd.f32 %v5570_v41, %v374_v6  ;;  %v5870_v47 = vadd.f32 %v5570_v41, %v373_v0  ;;  %v377_v6 = vmul.f32 %v4423_v56, %v5564_v39 }
  0x99   : > { %v5844_v37 = vpack.c.bf16 %v709_v55, %v708_v4  ;;  %v785_v52 = vsel %vm768_vm1, %v7429_v35, %v784_v30  ;;  %v5853_v17 = vsel %vm1522_vm3, %v7299_v59, %v1526_v44  ;;  %v789_v38 = vrot.slane %v7301_v1, 3 }
  0x9a   : > { %7430 = vst [vmem:[#allocation11_spill] sm:$0xff] %v5853_v17  ;;  %v5858_v48 = vpop.permute.xlu1 %547  ;;  %v5860_v7 = vpop.permute.xlu0 %542  ;;  %4646 = vmatprep.mubr.msk.bf16.mxu1 %vm948_vm2, %v785_v52  ;;  %4814 = vmatprep.mubr.msk.bf16.mxu0 %vm948_vm2, %v5853_v17  ;;  %v792_v55 = vrot.slane %v7303_v5, 4  ;;  %v7433_v4 = vmax.f32 %v5666_v49, 0.0  ;;  %v7434_v52 = vmax.f32 %v5689_v10, 0.0  ;;  %v5883_v0 = vadd.f32 %v5570_v41, %v376_v32 }
  0x9b   : > { %7431 = vst [vmem:[#allocation12_spill] sm:$0xff] %v5858_v48  ;;  %7432 = vst [vmem:[#allocation13_spill] sm:$0xff] %v5860_v7  ;;  %v1528_v31 = vrot.slane %v5844_v37, 4  ;;  %v7304_v1 = vshrl.u32 %v5844_v37, 16  ;;  %v7306_v5 = vshll.u32 %v5844_v37, 16  ;;  %v5886_v39 = vadd.f32 %v5570_v41, %v375_v21 }
  0x9c   : > { %v710_v35 = vmul.f32 %v5828_v42, %v7433_v4  ;;  %v711_v59 = vmul.f32 %v5860_v7, %v7434_v52  ;;  %v793_v29 = vor.u32 %v792_v55, %v789_v38  ;;  %v4218_v38 = vld [vmem:[%s7287_s1 + $0xc] sm:$0x3]  ;;  %v5917_v52 = vld [vmem:[%s7287_s1 + $0x4] sm:$0x3]  ;;  %v7438_v4 = vmax.f32 %v5682_v3, 0.0 }
  0x9d   : > { %v5891_v56 = vsel %vm1522_vm3, %v1526_v44, %v1528_v31  ;;  %v798_v10 = vrot.slane %v7304_v1, 3  ;;  %v7439_v1 = vmax.f32 %v5712_v15, 0.0 }
  0x9e   : > { %v5888_v49 = vpack.c.bf16 %v711_v59, %v710_v35  ;;  %v5899_v55 = vpop.permute.xlu1 %557  ;;  %v5901_v32 = vpop.permute.xlu0 %552  ;;  %v5904_v21 = vsel %vm768_vm1, %v784_v30, %v793_v29  ;;  %4815 = vmatmul.mubr.msk.bf16.vlgmr.msra.gmra.mrb[0].mxu0 %vm948_vm2, %v5891_v56  ;;  %v801_v59 = vrot.slane %v7306_v5, 4  ;;  %v5912_v35 = vadd.f32 %v5570_v41, %v377_v6 }
  0x9f   : > { %7435 = vst [vmem:[#allocation14_spill] sm:$0xff] %v5899_v55  ;;  %7436 = vst [vmem:[#allocation15_spill] sm:$0xff] %v5901_v32  ;;  %v712_v30 = vmul.f32 %v5858_v48, %v7438_v4  ;;  %v713_v42 = vmul.f32 %v5901_v32, %v7439_v1  ;;  %4647 = vmatmul.mubr.msk.bf16.vlgmr.msra.gmra.mrb[0].mxu1 %vm948_vm2, %v5904_v21  ;;  %4855 = vmatpush3.bf16.msra.mxu0 %v5702_v23  ;;  %v5943_v32 = vsel %vm1009_vm0, %v4218_v38, 0 }
  0xa0   : > { %7437 = vst [vmem:[#allocation16_spill] sm:$0xff] %v5904_v21  ;;  %v1530_v41 = vrot.slane %v5888_v49, 4  ;;  %v7308_v6 = vshrl.u32 %v5888_v49, 16  ;;  %4687 = vmatpush3.bf16.msra.mxu1 %v5698_v22  ;;  %v802_v44 = vor.u32 %v801_v59, %v798_v10  ;;  %v7310_v3 = vshll.u32 %v5888_v49, 16  ;;  %5350 = vmatprep.subr.msk.bf16.mxu0 %vm1009_vm0, %v4218_v38 }
  0xa1   : > { %v5935_v4 = vpack.c.bf16 %v713_v42, %v712_v30  ;;  %5345 = vmatprep.subr.msk.bf16.mxu1 %vm1009_vm0, %v5917_v52  ;;  %v7443_v30 = vmax.f32 %v5707_v27, 0.0  ;;  %v7444_v1 = vmax.f32 %v5722_v50, 0.0  ;;  %v7449_v38 = vmax.f32 %v5735_v25, 0.0 }
  0xa2   : > { %v5938_v5 = vsel %vm1522_vm3, %v1528_v31, %v1530_v41  ;;  %v807_v23 = vrot.slane %v7308_v6, 3  ;;  %v5947_v22 = vpop.permute.xlu1 %567  ;;  %v5949_v10 = vpop.permute.xlu0 %562  ;;  %v5952_v59 = vsel %vm768_vm1, %v793_v29, %v802_v44  ;;  %v810_v31 = vrot.slane %v7310_v3, 4 }
  0xa3   : > { %7440 = vst [vmem:[#allocation17_spill] sm:$0xff] %v5947_v22  ;;  %7441 = vst [vmem:[#allocation18_spill] sm:$0xff] %v5949_v10  ;;  %4818 = vmatprep.mubr.msk.bf16.mxu0 %vm948_vm2, %v5938_v5  ;;  %v714_v15 = vmul.f32 %v5899_v55, %v7443_v30  ;;  %v715_v6 = vmul.f32 %v5949_v10, %v7444_v1  ;;  %4650 = vmatprep.mubr.msk.bf16.mxu1 %vm948_vm2, %v5952_v59  ;;  %v1532_v29 = vrot.slane %v5935_v4, 4 }
  0xa4   : > { %7442 = vst [vmem:[#allocation19_spill] sm:$0xff] %v5952_v59  ;;  %v7314_v48 = vshrl.u32 %v5935_v4, 16  ;;  %v811_v3 = vor.u32 %v810_v31, %v807_v23  ;;  %v7315_v42 = vshll.u32 %v5935_v4, 16  ;;  %v7448_v31 = vmax.f32 %v5716_v34, 0.0 }
  0xa5   : > { %v5973_v7 = vpack.c.bf16 %v715_v6, %v714_v15  ;;  %v5976_v50 = vsel %vm1522_vm3, %v1530_v41, %v1532_v29  ;;  %v7450_v15 = vshrl.u32 %v5797_v58, 16  ;;  %v7477_v21 = vmax.f32 %v5763_v60, 0.0 }
  0xa6   : > { %v816_v1 = vrot.slane %v7314_v48, 3  ;;  %v5981_v55 = vpop.permute.xlu1 %577  ;;  %v5983_v10 = vpop.permute.xlu0 %572  ;;  %v5986_v23 = vsel %vm768_vm1, %v802_v44, %v811_v3  ;;  %4819 = vmatmul.mubr.msk.bf16.gmra.mrb[4].mxu0 %vm948_vm2, %v5976_v50  ;;  %v819_v6 = vrot.slane %v7315_v42, 4  ;;  %v716_v30 = vmul.f32 %v5947_v22, %v7448_v31 }
  0xa7   : > { %7445 = vst [vmem:[#allocation20_spill] sm:$0xff] %v5981_v55  ;;  %7446 = vst [vmem:[#allocation21_spill] sm:$0xff] %v5983_v10  ;;  %v717_v27 = vmul.f32 %v5983_v10, %v7449_v38  ;;  %4651 = vmatmul.mubr.msk.bf16.gmra.mrb[4].mxu1 %vm948_vm2, %v5986_v23  ;;  %v1534_v44 = vrot.slane %v5973_v7, 4  ;;  %v7318_v48 = vshrl.u32 %v5973_v7, 16  ;;  %v6007_v12 = vrot.slane %v7450_v15, 4 }
  0xa8   : > { %7447 = vst [vmem:[#allocation22_spill] sm:$0xff] %v5986_v23  ;;  %v820_v42 = vor.u32 %v819_v6, %v816_v1  ;;  %v7451_v10 = vshll.u32 %v5797_v58, 16 }
  0xa9   : > { %v6010_v31 = vpack.c.bf16 %v717_v27, %v716_v30  ;;  %v6013_v25 = vsel %vm1522_vm3, %v1532_v29, %v1534_v44  ;;  %v825_v38 = vrot.slane %v7318_v48, 3  ;;  %v7455_v29 = vshll.u32 %v5973_v7, 16 }
  0xaa   : > { %v2356_v1 = vrot.slane %v7451_v10, 5  ;;  %v6019_v6 = vpop.permute.xlu1 %587  ;;  %v6021_v41 = vpop.permute.xlu0 %582  ;;  %v6024_v15 = vsel %vm768_vm1, %v811_v3, %v820_v42  ;;  %4822 = vmatprep.mubr.msk.bf16.mxu0 %vm948_vm2, %v6013_v25  ;;  %v7456_v30 = vshrl.u32 %v5818_v57, 16  ;;  %v7457_v48 = vshll.u32 %v5818_v57, 16 }
  0xab   : > { %7452 = vst [vmem:[#allocation23_spill] sm:$0xff] %v6019_v6  ;;  %7453 = vst [vmem:[#allocation24_spill] sm:$0xff] %v6021_v41  ;;  %v828_v27 = vrot.slane %v7455_v29, 4  ;;  %v7458_v10 = vmax.f32 %v5732_v24, 0.0  ;;  %v719_v3 = vmul.f32 %v6021_v41, %v7459_v40  ;;  %4654 = vmatprep.mubr.msk.bf16.mxu1 %vm948_vm2, %v6024_v15  ;;  %v1536_v23 = vrot.slane %v6010_v31, 4 }
  0xac   : > { %7454 = vst [vmem:[#allocation25_spill] sm:$0xff] %v6024_v15  ;;  %v2358_v34 = vrot.slane %v7456_v30, 4  ;;  %v2359_v22 = vrot.slane %v7457_v48, 5  ;;  %v7327_v29 = vshrl.u32 %v6010_v31, 16  ;;  %v7329_v30 = vshll.u32 %v6010_v31, 16 }
  0xad   : > { %v718_v11 = vmul.f32 %v5981_v55, %v7458_v10  ;;  %v829_v14 = vor.u32 %v828_v27, %v825_v38  ;;  %v6050_v2 = vsel %vm1522_vm3, %v1534_v44, %v1536_v23  ;;  %v2357_v10 = vor.u32 %v2356_v1, %v6007_v12 }
  0xae   : > { %7460 = vst [vmem:[#allocation26_spill] sm:$0xff] %v6050_v2  ;;  %v834_v40 = vrot.slane %v7327_v29, 3  ;;  %v7461_v55 = vshrl.u32 %v5844_v37, 16  ;;  %v6057_v38 = vpop.permute.xlu1 %597  ;;  %v6059_v27 = vpop.permute.xlu0 %592  ;;  %4823 = vmatmul.mubr.msk.bf16.gmra.mrb[8].mxu0 %vm948_vm2, %v6050_v2  ;;  %v2360_v44 = vor.u32 %v2359_v22, %v2358_v34  ;;  %v7467_v29 = vshll.u32 %v5844_v37, 16 }
  0xaf   : > { %v6047_v59 = vpack.c.bf16 %v719_v3, %v718_v11  ;;  %7462 = vst [vmem:[#allocation27_spill] sm:$0xff] %v6057_v38  ;;  %7463 = vst [vmem:[#allocation28_spill] sm:$0xff] %v6059_v27  ;;  %v6062_v48 = vsel %vm768_vm1, %v820_v42, %v829_v14  ;;  %v837_v11 = vrot.slane %v7329_v30, 4  ;;  %v7465_v3 = vmax.f32 %v5739_v28, 0.0 }
  0xb0   : > { %v2362_v41 = vrot.slane %v7461_v55, 4  ;;  %7464 = vst [vmem:[#allocation29_spill] sm:$0xff] %v6062_v48  ;;  %v7466_v55 = vmax.f32 %v5752_v46, 0.0  ;;  %4655 = vmatmul.mubr.msk.bf16.gmra.mrb[8].mxu1 %vm948_vm2, %v6062_v48  ;;  %v2363_v15 = vrot.slane %v7467_v29, 5  ;;  %v7468_v28 = vshrl.u32 %v5888_v49, 16 }
  0xb1   : > { %v720_v12 = vmul.f32 %v6019_v6, %v7465_v3  ;;  %v1538_v42 = vrot.slane %v6047_v59, 4  ;;  %v7333_v24 = vshrl.u32 %v6047_v59, 16  ;;  %v838_v30 = vor.u32 %v837_v11, %v834_v40 }
  0xb2   : > { %v721_v1 = vmul.f32 %v6059_v27, %v7466_v55  ;;  %v7336_v22 = vshll.u32 %v6047_v59, 16  ;;  %v2366_v34 = vrot.slane %v7468_v28, 4  ;;  %v7470_v27 = vshll.u32 %v5888_v49, 16  ;;  %v6092_v48 = vpop.permute.xlu1 %607  ;;  %v6094_v29 = vpop.permute.xlu0 %602 }
  0xb3   : > { %v6086_v46 = vsel %vm1522_vm3, %v1536_v23, %v1538_v42  ;;  %v843_v55 = vrot.slane %v7333_v24, 3  ;;  %7471 = vst [vmem:[#allocation31_spill] sm:$0xff] %v6092_v48  ;;  %7472 = vst [vmem:[#allocation32_spill] sm:$0xff] %v6094_v29  ;;  %v6097_v40 = vsel %vm768_vm1, %v829_v14, %v838_v30  ;;  %v7474_v11 = vshrl.u32 %v5935_v4, 16 }
  0xb4   : > { %v6083_v3 = vpack.c.bf16 %v721_v1, %v720_v12  ;;  %7469 = vst [vmem:[#allocation30_spill] sm:$0xff] %v6086_v46  ;;  %v2367_v6 = vrot.slane %v7470_v27, 5  ;;  %7473 = vst [vmem:[#allocation33_spill] sm:$0xff] %v6097_v40  ;;  %4826 = vmatprep.mubr.msk.bf16.mxu0 %vm948_vm2, %v6086_v46  ;;  %v846_v23 = vrot.slane %v7336_v22, 4  ;;  %v7475_v1 = vshll.u32 %v5935_v4, 16  ;;  %4658 = vmatprep.mubr.msk.bf16.mxu1 %vm948_vm2, %v6097_v40 }
  0xb5   : > { %v2370_v12 = vrot.slane %v7474_v11, 4  ;;  %v7476_v27 = vmax.f32 %v5748_v36, 0.0  ;;  %v723_v14 = vmul.f32 %v6094_v29, %v7477_v21  ;;  %v7512_v40 = vmax.f32 %v5870_v47, 0.0 }
  0xb6   : > { %v2371_v28 = vrot.slane %v7475_v1, 5  ;;  %v1540_v17 = vrot.slane %v6083_v3, 4  ;;  %v7343_v22 = vshrl.u32 %v6083_v3, 16  ;;  %v847_v46 = vor.u32 %v846_v23, %v843_v55  ;;  %v6129_v29 = vpop.permute.xlu0 %612 }
  0xb7   : > { %v722_v24 = vmul.f32 %v6057_v38, %v7476_v27  ;;  %v7344_v11 = vshll.u32 %v6083_v3, 16  ;;  %v2361_v1 = vsel %vm2354_vm4, %v2357_v10, %v2360_v44  ;;  %v2364_v27 = vor.u32 %v2363_v15, %v2362_v41  ;;  %v6127_v38 = vpop.permute.xlu1 %617  ;;  %7480 = vst [vmem:[#allocation36_spill] sm:$0xff] %v6129_v29 }
  0xb8   : > { %v6123_v60 = vsel %vm1522_vm3, %v1538_v42, %v1540_v17  ;;  %v852_v21 = vrot.slane %v7343_v22, 3  ;;  %7479 = vst [vmem:[#allocation35_spill] sm:$0xff] %v6127_v38  ;;  %v6132_v55 = vsel %vm768_vm1, %v838_v30, %v847_v46  ;;  %v2368_v10 = vor.u32 %v2367_v6, %v2366_v34 }
  0xb9   : > { %v6120_v2 = vpack.c.bf16 %v723_v14, %v722_v24  ;;  %7478 = vst [vmem:[#allocation34_spill] sm:$0xff] %v6123_v60  ;;  %7481 = vst [vmem:[#allocation37_spill] sm:$0xff] %v6132_v55  ;;  %4827 = vmatmul.mubr.msk.bf16.gmra.mrb[12].mxu0 %vm948_vm2, %v6123_v60  ;;  %v855_v24 = vrot.slane %v7344_v11, 4  ;;  %v2372_v42 = vor.u32 %v2371_v28, %v2370_v12  ;;  %v7482_v23 = vmax.f32 %v5755_v51, 0.0 }
  0xba   : > { %v7483_v41 = vmax.f32 %v5774_v20, 0.0  ;;  %4659 = vmatmul.mubr.msk.bf16.gmra.mrb[12].mxu1 %vm948_vm2, %v6132_v55  ;;  %v7484_v6 = vshrl.u32 %v5973_v7, 16  ;;  %v7485_v51 = vshll.u32 %v5973_v7, 16 }
  0xbb   : > { %v724_v14 = vmul.f32 %v6092_v48, %v7482_v23  ;;  %v1542_v30 = vrot.slane %v6120_v2, 4  ;;  %v7346_v36 = vshrl.u32 %v6120_v2, 16  ;;  %v856_v22 = vor.u32 %v855_v24, %v852_v21  ;;  %v6163_v21 = vpop.permute.xlu0 %622 }
  0xbc   : > { %v725_v15 = vmul.f32 %v6129_v29, %v7483_v41  ;;  %v7347_v11 = vshll.u32 %v6120_v2, 16  ;;  %v2374_v34 = vrot.slane %v7484_v6, 4  ;;  %v2375_v12 = vrot.slane %v7485_v51, 5  ;;  %v6161_v29 = vpop.permute.xlu1 %627  ;;  %7488 = vst [vmem:[#allocation40_spill] sm:$0xff] %v6163_v21 }
  0xbd   : > { %v6156_v20 = vsel %vm1522_vm3, %v1540_v17, %v1542_v30  ;;  %v861_v23 = vrot.slane %v7346_v36, 3  ;;  %7487 = vst [vmem:[#allocation39_spill] sm:$0xff] %v6161_v29  ;;  %v6166_v24 = vsel %vm768_vm1, %v847_v46, %v856_v22  ;;  %v6173_v17 = vsel %vm2354_vm4, %v2360_v44, %v2364_v27 }
  0xbe   : > { %v6153_v28 = vpack.c.bf16 %v725_v15, %v724_v14  ;;  %7486 = vst [vmem:[#allocation38_spill] sm:$0xff] %v6156_v20  ;;  %7489 = vst [vmem:[#allocation41_spill] sm:$0xff] %v6166_v24  ;;  %4830 = vmatprep.mubr.msk.bf16.mxu0 %vm948_vm2, %v6156_v20  ;;  %v864_v14 = vrot.slane %v7347_v11, 4  ;;  %v6176_v15 = vsel %vm2354_vm4, %v2364_v27, %v2368_v10  ;;  %v7492_v6 = vmax.f32 %v5771_v19, 0.0 }
  0xbf   : > { %7490 = vst [vmem:[#allocation42_spill] sm:$0xff] %v6173_v17  ;;  %7491 = vst [vmem:[#allocation43_spill] sm:$0xff] %v6176_v15  ;;  %v7493_v41 = vmax.f32 %v5789_v16, 0.0  ;;  %4662 = vmatprep.mubr.msk.bf16.mxu1 %vm948_vm2, %v6166_v24  ;;  %v6190_v48 = vsel %vm2354_vm4, %v2368_v10, %v2372_v42  ;;  %v2376_v19 = vor.u32 %v2375_v12, %v2374_v34  ;;  %v7500_v34 = vshll.u32 %v6010_v31, 16 }
  0xc0   : > { %v726_v51 = vmul.f32 %v6127_v38, %v7492_v6  ;;  %v7351_v36 = vrot.slane %v6153_v28, 4  ;;  %v7352_v11 = vshrl.u32 %v6153_v28, 16  ;;  %v865_v44 = vor.u32 %v864_v14, %v861_v23  ;;  %7494 = vst [vmem:[#allocation44_spill] sm:$0xff] %v6190_v48  ;;  %v6203_v23 = vpop.permute.xlu1 %637  ;;  %v6205_v14 = vpop.permute.xlu0 %632 }
  0xc1   : > { %v727_v46 = vmul.f32 %v6163_v21, %v7493_v41  ;;  %v7353_v27 = vshll.u32 %v6153_v28, 16  ;;  %v7496_v38 = vshrl.u32 %v6010_v31, 16  ;;  %7497 = vst [vmem:[#allocation46_spill] sm:$0xff] %v6203_v23  ;;  %7498 = vst [vmem:[#allocation47_spill] sm:$0xff] %v6205_v14  ;;  %v2379_v12 = vrot.slane %v7500_v34, 5 }
  0xc2   : > { %v6197_v16 = vsel %vm1522_vm3, %v1542_v30, %v7351_v36  ;;  %v870_v41 = vrot.slane %v7352_v11, 3  ;;  %v6208_v10 = vsel %vm768_vm1, %v856_v22, %v865_v44  ;;  %v7503_v11 = vmax.f32 %v5808_v26, 0.0 }
  0xc3   : > { %v6192_v6 = vpack.c.bf16 %v727_v46, %v726_v51  ;;  %7495 = vst [vmem:[#allocation45_spill] sm:$0xff] %v6197_v16  ;;  %v2378_v21 = vrot.slane %v7496_v38, 4  ;;  %7499 = vst [vmem:[#allocation48_spill] sm:$0xff] %v6208_v10  ;;  %4831 = vmatmul.mubr.msk.bf16.gmra.mrb[16].mxu0 %vm948_vm2, %v6197_v16  ;;  %v873_v30 = vrot.slane %v7353_v27, 4  ;;  %v7501_v51 = vshrl.u32 %v6047_v59, 16  ;;  %4663 = vmatmul.mubr.msk.bf16.gmra.mrb[16].mxu1 %vm948_vm2, %v6208_v10 }
  0xc4   : > { %v7502_v38 = vmax.f32 %v5784_v18, 0.0  ;;  %v729_v22 = vmul.f32 %v6205_v14, %v7503_v11  ;;  %4856 = vmatprep.mubr.msk.bf16.mxu0 %vm948_vm2, %v2361_v1  ;;  %v7505_v18 = vshrl.u32 %v6083_v3, 16  ;;  %v1241_v26 = vrot.slane %v6047_v59, 3 }
  0xc5   : > { %v2382_v46 = vrot.slane %v7501_v51, 4  ;;  %v7359_v27 = vshrl.u32 %v6192_v6, 16  ;;  %v7360_v34 = vshll.u32 %v6192_v6, 16  ;;  %v874_v24 = vor.u32 %v873_v30, %v870_v41  ;;  %v6242_v41 = vpop.permute.xlu1 %647  ;;  %v6244_v30 = vpop.permute.xlu0 %642 }
  0xc6   : > { %v728_v36 = vmul.f32 %v6161_v29, %v7502_v38  ;;  %v7504_v51 = vshll.u32 %v6047_v59, 16  ;;  %v2386_v38 = vrot.slane %v7505_v18, 4  ;;  %v7506_v14 = vshll.u32 %v6083_v3, 16  ;;  %7507 = vst [vmem:[#allocation49_spill] sm:$0xff] %v6242_v41  ;;  %7508 = vst [vmem:[#allocation50_spill] sm:$0xff] %v6244_v30 }
  0xc7   : > { %v879_v11 = vrot.slane %v7359_v27, 3  ;;  %v882_v1 = vrot.slane %v7360_v34, 4  ;;  %v6250_v18 = vsel %vm2354_vm4, %v2372_v42, %v2376_v19  ;;  %v7511_v27 = vmax.f32 %v5792_v43, 0.0 }
  0xc8   : > { %v2383_v55 = vrot.slane %v7504_v51, 5  ;;  %v6234_v29 = vpack.c.bf16 %v729_v22, %v728_v36  ;;  %v2387_v10 = vrot.slane %v7506_v14, 5  ;;  %v6247_v51 = vsel %vm768_vm1, %v865_v44, %v874_v24  ;;  %7510 = vst [vmem:[#allocation52_spill] sm:$0xff] %v6250_v18 }
  0xc9   : > { %7509 = vst [vmem:[#allocation51_spill] sm:$0xff] %v6247_v51  ;;  %v2380_v36 = vor.u32 %v2379_v12, %v2378_v21  ;;  %v7366_v22 = vrot.slane %v6010_v31, 3  ;;  %v730_v34 = vmul.f32 %v6203_v23, %v7511_v27  ;;  %v731_v14 = vmul.f32 %v6244_v30, %v7512_v40  ;;  %4666 = vmatprep.mubr.msk.bf16.mxu1 %vm948_vm2, %v6247_v51 }
  0xca   : > { %v883_v16 = vor.u32 %v882_v1, %v879_v11  ;;  %v7367_v44 = vshrl.u32 %v6234_v29, 16  ;;  %v7370_v42 = vshll.u32 %v6234_v29, 16  ;;  %v2384_v20 = vor.u32 %v2383_v55, %v2382_v46  ;;  %v6279_v55 = vld [vmem:[%s7287_s1 + $0xe] sm:$0x3]  ;;  %v6281_v46 = vpop.permute.xlu1 %657  ;;  %v6283_v11 = vpop.permute.xlu0 %652 }
  0xcb   : > { %v6266_v21 = vsel %vm1225_vm5, %v7366_v22, %v1241_v26  ;;  %v1243_v43 = vrot.slane %v6083_v3, 3  ;;  %v6269_v27 = vpack.c.bf16 %v731_v14, %v730_v34  ;;  %v2388_v12 = vor.u32 %v2387_v10, %v2386_v38  ;;  %7514 = vst [vmem:[#allocation54_spill] sm:$0xff] %v6281_v46  ;;  %7515 = vst [vmem:[#allocation55_spill] sm:$0xff] %v6283_v11 }
  0xcc   : > { %v6272_v47 = vsel %vm768_vm1, %v874_v24, %v883_v16  ;;  %v888_v40 = vrot.slane %v7367_v44, 3  ;;  %4857 = vmatmul.mubr.msk.bf16.vlgmr.msra.gmra.mrb[0].mxu0 %vm948_vm2, %v6173_v17  ;;  %v891_v24 = vrot.slane %v7370_v42, 4  ;;  %v7516_v34 = vshrl.u32 %v6120_v2, 16 }
  0xcd   : > { %7513 = vst [vmem:[#allocation53_spill] sm:$0xff] %v6272_v47  ;;  %v7517_v10 = vshll.u32 %v6120_v2, 16  ;;  %v6294_v14 = vsel %vm1225_vm5, %v1241_v26, %v1243_v43  ;;  %v7518_v22 = vmax.f32 %v5856_v33, 0.0  ;;  %v7519_v23 = vmax.f32 %v5886_v39, 0.0  ;;  %4667 = vmatmul.mubr.msk.bf16.gmra.mrb[20].mxu1 %vm948_vm2, %v6272_v47  ;;  %4897 = vmatpush3.bf16.msra.mxu0 %v5943_v32 }
  0xce   : > { %v2390_v1 = vrot.slane %v7516_v34, 4  ;;  %v7374_v34 = vshrl.u32 %v6269_v27, 16  ;;  %4860 = vmatprep.mubr.msk.bf16.mxu0 %vm948_vm2, %v6176_v15  ;;  %v892_v26 = vor.u32 %v891_v24, %v888_v40  ;;  %v6310_v33 = vsel %vm2354_vm4, %v2376_v19, %v2380_v36  ;;  %5351 = vmatprep.subr.msk.bf16.mxu0 %vm1009_vm0, %v6279_v55  ;;  %v6325_v19 = vpop.permute.xlu1 %667  ;;  %v6327_v24 = vpop.permute.xlu0 %662 }
  0xcf   : > { %v2391_v38 = vrot.slane %v7517_v10, 5  ;;  %v732_v44 = vmul.f32 %v6242_v41, %v7518_v22  ;;  %v733_v30 = vmul.f32 %v6283_v11, %v7519_v23  ;;  %v7373_v10 = vshll.u32 %v6269_v27, 16  ;;  %7520 = vst [vmem:[#allocation56_spill] sm:$0xff] %v6310_v33  ;;  %7522 = vst [vmem:[#allocation58_spill] sm:$0xff] %v6325_v19 }
  0xd0   : > { %v1245_v39 = vrot.slane %v6120_v2, 3  ;;  %v1247_v23 = vrot.slane %v6153_v28, 3  ;;  %v897_v32 = vrot.slane %v7374_v34, 3  ;;  %v6323_v40 = vsel %vm2354_vm4, %v2380_v36, %v2384_v20  ;;  %7523 = vst [vmem:[#allocation59_spill] sm:$0xff] %v6327_v24 }
  0xd1   : > { %v6316_v22 = vpack.c.bf16 %v733_v30, %v732_v44  ;;  %v900_v42 = vrot.slane %v7373_v10, 4  ;;  %7521 = vst [vmem:[#allocation57_spill] sm:$0xff] %v6323_v40  ;;  %v6330_v11 = vsel %vm768_vm1, %v883_v16, %v892_v26  ;;  %v6333_v41 = vsel %vm2354_vm4, %v2384_v20, %v2388_v12 }
  0xd2   : > { %7524 = vst [vmem:[#allocation60_spill] sm:$0xff] %v6330_v11  ;;  %7525 = vst [vmem:[#allocation61_spill] sm:$0xff] %v6333_v41  ;;  %v6335_v30 = vor.u32 %v2391_v38, %v2390_v1  ;;  %v6338_v44 = vsel %vm1225_vm5, %v1243_v43, %v1245_v39  ;;  %v7526_v10 = vmax.f32 %v5883_v0, 0.0  ;;  %v7527_v34 = vmax.f32 %v5912_v35, 0.0  ;;  %4670 = vmatprep.mubr.msk.bf16.mxu1 %vm948_vm2, %v6330_v11  ;;  %v6365_v1 = vpop.permute.xlu1 %677 }
  0xd3   : > { %v901_v16 = vor.u32 %v900_v42, %v897_v32  ;;  %v7379_v20 = vshrl.u32 %v6316_v22, 16  ;;  %v7528_v38 = vshrl.u32 %v6153_v28, 16  ;;  %v6353_v51 = vsel %vm1225_vm5, %v1245_v39, %v1247_v23  ;;  %7531 = vst [vmem:[#allocation63_spill] sm:$0xff] %v6365_v1 }
  0xd4   : > { %v734_v36 = vmul.f32 %v6281_v46, %v7526_v10  ;;  %v735_v47 = vmul.f32 %v6327_v24, %v7527_v34  ;;  %v1249_v0 = vrot.slane %v6192_v6, 3  ;;  %v7530_v34 = vshll.u32 %v6153_v28, 16  ;;  %v6367_v46 = vpop.permute.xlu0 %672  ;;  %4861 = vmatmul.mubr.msk.bf16.gmra.mrb[4].mxu0 %vm948_vm2, %v6190_v48 }
  0xd5   : > { %v2394_v43 = vrot.slane %v7528_v38, 4  ;;  %v6359_v35 = vsel %vm768_vm1, %v892_v26, %v901_v16  ;;  %v906_v42 = vrot.slane %v7379_v20, 3  ;;  %7532 = vst [vmem:[#allocation64_spill] sm:$0xff] %v6367_v46  ;;  %v7533_v39 = vshll.u32 %v6316_v22, 16  ;;  %4864 = vmatprep.mubr.msk.bf16.mxu0 %vm948_vm2, %v6250_v18 }
  0xd6   : > { %v6356_v10 = vpack.c.bf16 %v735_v47, %v734_v36  ;;  %7529 = vst [vmem:[#allocation62_spill] sm:$0xff] %v6359_v35  ;;  %v2395_v32 = vrot.slane %v7530_v34, 5  ;;  %v7534_v36 = vshrl.u32 %v6192_v6, 16  ;;  %v7535_v38 = vshll.u32 %v6192_v6, 16  ;;  %4671 = vmatmul.mubr.msk.bf16.gmra.mrb[24].mxu1 %vm948_vm2, %v6359_v35  ;;  %v6406_v35 = vpop.permute.xlu1 %687 }
  0xd7   : > { %v909_v47 = vrot.slane %v7533_v39, 4  ;;  %v6378_v20 = vsel %vm1225_vm5, %v1247_v23, %v1249_v0  ;;  %v7536_v34 = vmax.f32 %v5580_v45, 0.0  ;;  %v7537_v15 = vmax.f32 %v5595_v54, 0.0  ;;  %7539 = vst [vmem:[#allocation66_spill] sm:$0xff] %v6406_v35 }
  0xd8   : > { %v2398_v26 = vrot.slane %v7534_v36, 4  ;;  %v2399_v24 = vrot.slane %v7535_v38, 5  ;;  %v7386_v39 = vshrl.u32 %v6356_v10, 16  ;;  %v7387_v36 = vshll.u32 %v6356_v10, 16 }
  0xd9   : > { %v736_v11 = vmul.f32 %v6325_v19, %v7536_v34  ;;  %v737_v48 = vmul.f32 %v6367_v46, %v7537_v15  ;;  %v910_v23 = vor.u32 %v909_v47, %v906_v42  ;;  %v6394_v45 = vsel %vm2354_vm4, %v2388_v12, %v6335_v30  ;;  %v6408_v42 = vpop.permute.xlu0 %682 }
  0xda   : > { %7538 = vst [vmem:[#allocation65_spill] sm:$0xff] %v6394_v45  ;;  %v1251_v38 = vrot.slane %v6234_v29, 3  ;;  %v1253_v54 = vrot.slane %v6269_v27, 3  ;;  %v915_v34 = vrot.slane %v7386_v39, 3  ;;  %v918_v46 = vrot.slane %v7387_v36, 4  ;;  %7540 = vst [vmem:[#allocation67_spill] sm:$0xff] %v6408_v42 }
  0xdb   : > { %v6398_v15 = vpack.c.bf16 %v737_v48, %v736_v11  ;;  %v6404_v19 = vor.u32 %v2395_v32, %v2394_v43  ;;  %v6411_v12 = vsel %vm768_vm1, %v901_v16, %v910_v23  ;;  %v6413_v47 = vor.u32 %v2399_v24, %v2398_v26 }
  0xdc   : > { %7541 = vst [vmem:[#allocation68_spill] sm:$0xff] %v6411_v12  ;;  %v7542_v48 = vshrl.u32 %v6234_v29, 16  ;;  %v6420_v39 = vsel %vm1225_vm5, %v1249_v0, %v1251_v38  ;;  %v7543_v36 = vmax.f32 %v5592_v53, 0.0  ;;  %v7544_v32 = vmax.f32 %v5610_v63, 0.0  ;;  %4674 = vmatprep.mubr.msk.bf16.mxu1 %vm948_vm2, %v6411_v12  ;;  %4865 = vmatmul.mubr.msk.bf16.gmra.mrb[8].mxu0 %vm948_vm2, %v6310_v33 }
  0xdd   : > { %v919_v24 = vor.u32 %v918_v46, %v915_v34  ;;  %v922_v16 = vshrl.u32 %v6398_v15, 16  ;;  %v925_v26 = vshll.u32 %v6398_v15, 16  ;;  %v6437_v53 = vsel %vm1225_vm5, %v1251_v38, %v1253_v54  ;;  %v6451_v12 = vpop.permute.xlu0 %692  ;;  %4868 = vmatprep.mubr.msk.bf16.mxu0 %vm948_vm2, %v6323_v40 }
  0xde   : > { %v6417_v11 = vrot.slane %v7542_v48, 4  ;;  %v738_v43 = vmul.f32 %v6365_v1, %v7543_v36  ;;  %v739_v18 = vmul.f32 %v6408_v42, %v7544_v32  ;;  %v7545_v48 = vshll.u32 %v6234_v29, 16  ;;  %7546 = vst [vmem:[#allocation69_spill] sm:$0xff] %v6437_v53  ;;  %v6449_v42 = vpop.permute.xlu1 %697  ;;  %7550 = vst [vmem:[#allocation72_spill] sm:$0xff] %v6451_v12 }
  0xdf   : > { %v1255_v36 = vrot.slane %v6316_v22, 3  ;;  %v6443_v32 = vsel %vm768_vm1, %v910_v23, %v919_v24  ;;  %v924_v1 = vrot.slane %v922_v16, 3  ;;  %v7548_v46 = vshrl.u32 %v6269_v27, 16  ;;  %7549 = vst [vmem:[#allocation71_spill] sm:$0xff] %v6449_v42 }
  0xe0   : > { %v6434_v0 = vrot.slane %v7545_v48, 5  ;;  %v6440_v63 = vpack.c.bf16 %v739_v18, %v738_v43  ;;  %7547 = vst [vmem:[#allocation70_spill] sm:$0xff] %v6443_v32  ;;  %v927_v38 = vrot.slane %v925_v26, 4  ;;  %v2418_v48 = vrot.slane %v922_v16, 4  ;;  %4675 = vmatmul.mubr.msk.bf16.gmra.mrb[28].mxu1 %vm948_vm2, %v6443_v32 }
  0xe1   : > { %v6447_v34 = vrot.slane %v7548_v46, 4  ;;  %v2419_v17 = vrot.slane %v925_v26, 5  ;;  %v6456_v18 = vsel %vm1225_vm5, %v1253_v54, %v1255_v36  ;;  %v7552_v23 = vmax.f32 %v5607_v62, 0.0 }
  0xe2   : > { %7551 = vst [vmem:[#allocation73_spill] sm:$0xff] %v6456_v18  ;;  %v7553_v46 = vmax.f32 %v5625_v9, 0.0  ;;  %v931_v16 = vshrl.u32 %v6440_v63, 16  ;;  %v934_v26 = vshll.u32 %v6440_v63, 16  ;;  %v7554_v54 = vmax.f32 %v5622_v8, 0.0  ;;  %v6477_v18 = vpop.permute.xlu0 %702 }
  0xe3   : > { %v740_v43 = vmul.f32 %v6406_v35, %v7552_v23  ;;  %v928_v33 = vor.u32 %v927_v38, %v924_v1  ;;  %v1257_v23 = vrot.slane %v6356_v10, 3  ;;  %v1259_v9 = vrot.slane %v6398_v15, 3  ;;  %7555 = vst [vmem:[#allocation74_spill] sm:$0xff] %v6477_v18 }
  0xe4   : > { %v741_v60 = vmul.f32 %v6451_v12, %v7553_v46  ;;  %v742_v62 = vmul.f32 %v6449_v42, %v7554_v54  ;;  %v933_v12 = vrot.slane %v931_v16, 3  ;;  %v936_v35 = vrot.slane %v934_v26, 4  ;;  %4869 = vmatmul.mubr.msk.bf16.gmra.mrb[12].mxu0 %vm948_vm2, %v6333_v41 }
  0xe5   : > { %v2422_v32 = vrot.slane %v931_v16, 4  ;;  %v6480_v40 = vsel %vm768_vm1, %v919_v24, %v928_v33  ;;  %v6482_v53 = vor.u32 %v2419_v17, %v2418_v48  ;;  %v2423_v8 = vrot.slane %v934_v26, 5  ;;  %4872 = vmatprep.mubr.msk.bf16.mxu0 %vm948_vm2, %v6394_v45 }
  0xe6   : > { %v6475_v46 = vpack.c.bf16 %v741_v60, %v740_v43  ;;  %7556 = vst [vmem:[#allocation75_spill] sm:$0xff] %v6480_v40  ;;  %v6485_v54 = vsel %vm1225_vm5, %v1255_v36, %v1257_v23  ;;  %v7557_v1 = vmax.f32 %v5632_v13, 0.0  ;;  %4678 = vmatprep.mubr.msk.bf16.mxu1 %vm948_vm2, %v6480_v40  ;;  %v937_v60 = vor.u32 %v936_v35, %v933_v12 }
  0xe7   : > { %v2424_v24 = vor.u32 %v2423_v8, %v2422_v32  ;;  %v6495_v17 = vsel %vm1225_vm5, %v1257_v23, %v1259_v9  ;;  %v1261_v48 = vrot.slane %v6440_v63, 3  ;;  %v1548_v40 = vrot.slane %v6234_v29, 4 }
  0xe8   : > { %v743_v38 = vmul.f32 %v6477_v18, %v7557_v1  ;;  %v940_v43 = vshrl.u32 %v6475_v46, 16  ;;  %v943_v16 = vshll.u32 %v6475_v46, 16  ;;  %v7405_v36 = vrot.slane %v6475_v46, 3 }
  0xe9   : > { %v6502_v13 = vsel %vm768_vm1, %v928_v33, %v937_v60  ;;  %v6508_v35 = vsel %vm2354_vm4, %v6482_v53, %v2424_v24  ;;  %v6511_v23 = vsel %vm1225_vm5, %v1259_v9, %v1261_v48  ;;  %v7560_v9 = vshll.u32 %v6269_v27, 16 }
  0xea   : > { %v6499_v26 = vpack.c.bf16 %v743_v38, %v742_v62  ;;  %7558 = vst [vmem:[#allocation76_spill] sm:$0xff] %v6502_v13  ;;  %v942_v1 = vrot.slane %v940_v43, 3  ;;  %v945_v42 = vrot.slane %v943_v16, 4  ;;  %v2426_v12 = vrot.slane %v940_v43, 4  ;;  %4679 = vmatmul.mubr.msk.bf16.gmra.mrb[32].mxu1 %vm948_vm2, %v6502_v13 }
  0xeb   : > { %v2427_v32 = vrot.slane %v943_v16, 5  ;;  %v6524_v38 = vsel %vm1225_vm5, %v1261_v48, %v7405_v36  ;;  %v2407_v43 = vrot.slane %v7560_v9, 5  ;;  %v1546_v18 = vrot.slane %v6192_v6, 4 }
  0xec   : > { %v1859_v62 = vshrl.u32 %v6499_v26, 16  ;;  %v1862_v8 = vshll.u32 %v6499_v26, 16  ;;  %v6519_v33 = vor.u32 %v945_v42, %v942_v1  ;;  %7559 = vst [vmem:[#allocation77_spill] sm:$0xff] %v6524_v38  ;;  %v1550_v1 = vrot.slane %v6269_v27, 4 }
  0xed   : > { %v2428_v16 = vor.u32 %v2427_v32, %v2426_v12  ;;  %v7562_v12 = vrot.slane %v6153_v28, 4  ;;  %v6546_v9 = vsel %vm1522_vm3, %v1546_v18, %v1548_v40  ;;  %v2404_v38 = vor.u32 %v6434_v0, %v6417_v11 }
  0xee   : > { %v6532_v13 = vsel %vm768_vm1, %v937_v60, %v6519_v33  ;;  %v2430_v45 = vrot.slane %v1859_v62, 4  ;;  %v2431_v42 = vrot.slane %v1862_v8, 5  ;;  %7563 = vst [vmem:[#allocation79_spill] sm:$0xff] %v6546_v9  ;;  %v1552_v60 = vrot.slane %v6316_v22, 4 }
  0xef   : > { %7561 = vst [vmem:[#allocation78_spill] sm:$0xff] %v6532_v13  ;;  %4682 = vmatprep.mubr.msk.bf16.mxu1 %vm948_vm2, %v6532_v13  ;;  %v6538_v48 = vsel %vm2354_vm4, %v2424_v24, %v2428_v16  ;;  %v6543_v32 = vsel %vm1522_vm3, %v7562_v12, %v1546_v18  ;;  %v6552_v41 = vsel %vm1522_vm3, %v1548_v40, %v1550_v1  ;;  %v1554_v13 = vrot.slane %v6356_v10, 4 }
  0xf0   : > { %v6549_v36 = vor.u32 %v2431_v42, %v2430_v45  ;;  %v1556_v24 = vrot.slane %v6398_v15, 4  ;;  %v6559_v12 = vsel %vm1522_vm3, %v1550_v1, %v1552_v60  ;;  %v1558_v18 = vrot.slane %v6440_v63, 4 }
  0xf1   : > { %7564 = vst [vmem:[#allocation80_spill] sm:$0xff] %v6559_v12  ;;  %v6563_v9 = vrot.slane %v6475_v46, 4  ;;  %v6568_v40 = vsel %vm2354_vm4, %v6335_v30, %v6404_v19  ;;  %v6575_v42 = vsel %vm1522_vm3, %v1552_v60, %v1554_v13  ;;  %v6585_v0 = vsel %vm2354_vm4, %v6404_v19, %v6413_v47 }
  0xf2   : > { %7566 = vst [vmem:[#allocation82_spill] sm:$0xff] %v6568_v40  ;;  %v6572_v45 = vsel %vm2354_vm4, %v2428_v16, %v6549_v36  ;;  %7567 = vst [vmem:[#allocation83_spill] sm:$0xff] %v6575_v42  ;;  %v6578_v11 = vsel %vm1522_vm3, %v1554_v13, %v1556_v24  ;;  %4873 = vmatmul.mubr.msk.bf16.gmra.mrb[16].mxu0 %vm948_vm2, %v6568_v40  ;;  %v2408_v30 = vor.u32 %v2407_v43, %v6447_v34 }
  0xf3   : > { %7565 = vst [vmem:[#allocation81_spill] sm:$0xff] %v6563_v9  ;;  %7568 = vst [vmem:[#allocation84_spill] sm:$0xff] %v6578_v11  ;;  %v6589_v1 = vsel %vm1522_vm3, %v1556_v24, %v1558_v18  ;;  %v6593_v16 = vsel %vm1522_vm3, %v1558_v18, %v6563_v9  ;;  %4683 = vmatmul.mubr.msk.bf16.gmra.mrb[36].mxu1 %vm948_vm2, %v6519_v33  ;;  %v7572_v13 = vrot.slane %v5797_v58, 3  ;;  %4876 = vmatprep.mubr.msk.bf16.mxu0 %vm948_vm2, %v6585_v0 }
  0xf4   : > { %7569 = vst [vmem:[#allocation85_spill] sm:$0xff] %v6585_v0  ;;  %7570 = vst [vmem:[#allocation86_spill] sm:$0xff] %v6589_v1  ;;  %v1623_v19 = vsel %vm1009_vm0, %v5917_v52, 0  ;;  %v7573_v34 = vrot.slane %v5818_v57, 3  ;;  %v6613_v18 = vsel %vm2354_vm4, %v6413_v47, %v2404_v38  ;;  %v7577_v52 = vshrl.u32 %v6316_v22, 16 }
  0xf5   : > { %7571 = vst [vmem:[#allocation87_spill] sm:$0xff] %v6593_v16  ;;  %v1228_v60 = vsel %vm1225_vm5, %v5677_v61, %v7572_v13  ;;  %v7574_v43 = vmov %v7572_v13  ;;  %v7575_v61 = vrot.slane %v5844_v37, 3  ;;  %v3233_v9 = vrot.slane %v6047_v59, 5 }
  0xf6   : > { %4688 = vmatprep.mubr.msk.bf16.mxu1 %vm948_vm2, %v1228_v60  ;;  %v1230_v24 = vsel %vm1225_vm5, %v7574_v43, %v7573_v34  ;;  %v7576_v13 = vmov %v7573_v34  ;;  %v2410_v40 = vrot.slane %v7577_v52, 4  ;;  %v7419_v60 = vrot.slane %v6010_v31, 5 }
  0xf7   : > { %v1232_v0 = vsel %vm1225_vm5, %v7576_v13, %v7575_v61  ;;  %v3235_v16 = vrot.slane %v6083_v3, 5  ;;  %v3237_v34 = vrot.slane %v6120_v2, 5  ;;  %v6627_v47 = vsel %vm2354_vm4, %v2404_v38, %v2408_v30 }
  0xf8   : > { %v7578_v43 = vshll.u32 %v6316_v22, 16  ;;  %v7579_v57 = vshrl.u32 %v6356_v10, 16  ;;  %v7580_v13 = vshll.u32 %v6356_v10, 16  ;;  %v6638_v59 = vsel %vm3221_vm6, %v7419_v60, %v3233_v9 }
  0xf9   : > { %v6641_v3 = vsel %vm3221_vm6, %v3233_v9, %v3235_v16  ;;  %v6644_v2 = vsel %vm3221_vm6, %v3235_v16, %v3237_v34  ;;  %v1861_v38 = vrot.slane %v1859_v62, 3  ;;  %v1864_v11 = vrot.slane %v1862_v8, 4  ;;  %v6658_v62 = vld [vmem:[%s7287_s1 + $0x6] sm:$0x3] }
  0xfa   : > { %v2411_v1 = vrot.slane %v7578_v43, 5  ;;  %v2414_v61 = vrot.slane %v7579_v57, 4  ;;  %v2415_v52 = vrot.slane %v7580_v13, 5  ;;  %v3239_v43 = vrot.slane %v6153_v28, 5  ;;  %4877 = vmatmul.mubr.msk.bf16.gmra.mrb[20].mxu0 %vm948_vm2, %v6613_v18 }
  0xfb   : > { %v3241_v57 = vrot.slane %v6192_v6, 5  ;;  %v3243_v42 = vrot.slane %v6234_v29, 5  ;;  %v3245_v13 = vrot.slane %v6269_v27, 5  ;;  %v3247_v12 = vrot.slane %v6316_v22, 5  ;;  %4689 = vmatmul.mubr.msk.bf16.vlgmr.msra.gmra.mrb[0].mxu1 %vm948_vm2, %v1230_v24  ;;  %4880 = vmatprep.mubr.msk.bf16.mxu0 %vm948_vm2, %v6627_v47 }
  0xfc   : > { %v3249_v60 = vrot.slane %v6356_v10, 5  ;;  %v3251_v9 = vrot.slane %v6398_v15, 5  ;;  %v6660_v28 = vor.u32 %v1864_v11, %v1861_v38  ;;  %v6663_v29 = vsel %vm3221_vm6, %v3237_v34, %v3239_v43  ;;  %4729 = vmatpush3.bf16.msra.mxu1 %v1623_v19  ;;  %4692 = vmatprep.mubr.msk.bf16.mxu1 %vm948_vm2, %v1232_v0 }
  0xfd   : > { %v6666_v6 = vsel %vm3221_vm6, %v3239_v43, %v3241_v57  ;;  %v6669_v27 = vsel %vm3221_vm6, %v3241_v57, %v3243_v42  ;;  %v6675_v22 = vsel %vm3221_vm6, %v3243_v42, %v3245_v13  ;;  %v6678_v10 = vsel %vm3221_vm6, %v3245_v13, %v3247_v12  ;;  %5346 = vmatprep.subr.msk.bf16.mxu1 %vm1009_vm0, %v6658_v62 }
  0xfe   : > { %v6681_v15 = vsel %vm3221_vm6, %v3247_v12, %v3249_v60  ;;  %v3253_v8 = vrot.slane %v6440_v63, 5  ;;  %v6688_v11 = vsel %vm768_vm1, %v6519_v33, %v6660_v28  ;;  %v6691_v16 = vsel %vm3221_vm6, %v3249_v60, %v3251_v9 }
  0xff   : > { %v3255_v42 = vrot.slane %v6475_v46, 5  ;;  %v3257_v24 = vrot.slane %v6499_v26, 5  ;;  %v2412_v34 = vor.u32 %v2411_v1, %v2410_v40  ;;  %v7581_v12 = vmov 0.0|0.0  }
 0x100   : > { %v6698_v63 = vsel %vm3221_vm6, %v3251_v9, %v3253_v8  ;;  %v6701_v0 = vrot.slane %v7581_v12, 5  ;;  %v1233_v33 = vrot.slane %v5888_v49, 3  ;;  %v2416_v19 = vor.u32 %v2415_v52, %v2414_v61 }
 0x101   : > { %v6705_v60 = vsel %vm3221_vm6, %v3253_v8, %v3255_v42  ;;  %v6708_v38 = vsel %vm3221_vm6, %v3255_v42, %v3257_v24  ;;  %v1235_v40 = vrot.slane %v5935_v4, 3  ;;  %v6716_v43 = vsel %vm2354_vm4, %v2408_v30, %v2412_v34 }
 0x102   : > { %v6713_v1 = vsel %vm3221_vm6, %v3257_v24, %v6701_v0  ;;  %v7582_v57 = vrot.slane %v5844_v37, 3  ;;  %4881 = vmatmul.mubr.msk.bf16.gmra.mrb[24].mxu0 %vm948_vm2, %v6716_v43  ;;  %v6724_v61 = vsel %vm2354_vm4, %v2412_v34, %v2416_v19  ;;  %v1237_v30 = vrot.slane %v5973_v7, 3 }
 0x103   : > { %v1236_v52 = vsel %vm1225_vm5, %v1233_v33, %v1235_v40  ;;  %4884 = vmatprep.mubr.msk.bf16.mxu0 %vm948_vm2, %v6724_v61  ;;  %v6734_v9 = vsel %vm2354_vm4, %v2416_v19, %v6482_v53  ;;  %v7583_v42 = vrot.slane %v6010_v31, 3  ;;  %v7584_v53 = vmov 0   ;;  %v7590_v19 = vld [vmem:[#allocation38_spill] sm:$0xff] }
 0x104   : > { %v1234_v13 = vsel %vm1225_vm5, %v7582_v57, %v1233_v33  ;;  %v1238_v8 = vsel %vm1225_vm5, %v1235_v40, %v1237_v30  ;;  %v6755_v34 = vrot.slane %v7584_v53, 5  ;;  %v7591_v40 = vld [vmem:[#allocation45_spill] sm:$0xff] }
 0x105   : > { %4693 = vmatmul.mubr.msk.bf16.gmra.mrb[4].mxu1 %vm948_vm2, %v1234_v13  ;;  %v1240_v24 = vsel %vm1225_vm5, %v1237_v30, %v7583_v42  ;;  %v7592_v57 = vld [vmem:[#allocation77_spill] sm:$0xff]  ;;  %v7593_v13 = vrot.slane %v6475_v46, 3  ;;  %v1874_v30 = vsel %vm1009_vm0, %v6658_v62, 0  ;;  %v7597_v46 = vld [vmem:[#allocation80_spill] sm:$0xff]  ;;  %v7598_v62 = vld [vmem:[#allocation83_spill] sm:$0xff] }
 0x106   : > { %4696 = vmatprep.mubr.msk.bf16.mxu1 %vm948_vm2, %v1236_v52  ;;  %v2435_v33 = vsel %vm2354_vm4, %v6549_v36, %v6755_v34  ;;  %v7600_v42 = vld [vmem:[#allocation86_spill] sm:$0xff] }
 0x10a   : > { %4885 = vmatmul.mubr.msk.bf16.gmra.mrb[28].mxu0 %vm948_vm2, %v6734_v9 }
 0x10b   : > { %4888 = vmatprep.mubr.msk.bf16.mxu0 %vm948_vm2, %v6508_v35 }
 0x10d   : > { %4697 = vmatmul.mubr.msk.bf16.gmra.mrb[8].mxu1 %vm948_vm2, %v1238_v8  ;;  %v7599_v8 = vld [vmem:[#allocation84_spill] sm:$0xff] }
 0x10e   : > { %4700 = vmatprep.mubr.msk.bf16.mxu1 %vm948_vm2, %v1240_v24  ;;  %v7602_v24 = vld [vmem:[#allocation81_spill] sm:$0xff] }
 0x112   : > { %4889 = vmatmul.mubr.msk.bf16.gmra.mrb[32].mxu0 %vm948_vm2, %v6538_v48 }
 0x113   : > { %4892 = vmatprep.mubr.msk.bf16.mxu0 %vm948_vm2, %v6572_v45 }
 0x115   : > { %4701 = vmatmul.mubr.msk.bf16.gmra.mrb[12].mxu1 %vm948_vm2, %v6266_v21  ;;  %v2986_v21 = vsel %vm1009_vm0, %v6279_v55, 0  ;;  %v7586_v55 = vld [vmem:[#allocation26_spill] sm:$0xff] }
 0x116   : > { %4704 = vmatprep.mubr.msk.bf16.mxu1 %vm948_vm2, %v6294_v14  ;;  %v4260_v14 = vld [vmem:[%s7287_s1 + $0x10] sm:$0x3] }
 0x11a   : > { %4893 = vmatmul.mubr.msk.bf16.gmra.mrb[36].mxu0 %vm948_vm2, %v2435_v33  ;;  %v7604_v33 = vld [vmem:[#allocation43_spill] sm:$0xff] }
 0x11b   : > { %4898 = vmatprep.mubr.msk.bf16.mxu0 %vm948_vm2, %v5891_v56 }
 0x11d   : > { %4705 = vmatmul.mubr.msk.bf16.gmra.mrb[16].mxu1 %vm948_vm2, %v6338_v44  ;;  %v7587_v44 = vld [vmem:[#allocation73_spill] sm:$0xff] }
 0x11e   : > { %4708 = vmatprep.mubr.msk.bf16.mxu1 %vm948_vm2, %v6353_v51  ;;  %v7585_v51 = vld [vmem:[#allocation69_spill] sm:$0xff] }
 0x122   : > { %4899 = vmatmul.mubr.msk.bf16.vlgmr.msra.gmra.mrb[0].mxu0 %vm948_vm2, %v5938_v5 }
 0x123   : > { %4939 = vmatpush3.bf16.msra.mxu0 %v2986_v21  ;;  %4902 = vmatprep.mubr.msk.bf16.mxu0 %vm948_vm2, %v5976_v50  ;;  %v7605_v21 = vld [vmem:[#allocation44_spill] sm:$0xff] }
 0x124   : > { %5352 = vmatprep.subr.msk.bf16.mxu0 %vm1009_vm0, %v4260_v14 }
 0x125   : > { %4709 = vmatmul.mubr.msk.bf16.gmra.mrb[20].mxu1 %vm948_vm2, %v6378_v20  ;;  %v7588_v20 = vld [vmem:[#allocation30_spill] sm:$0xff] }
 0x126   : > { %4712 = vmatprep.mubr.msk.bf16.mxu1 %vm948_vm2, %v6420_v39  ;;  %v7589_v39 = vld [vmem:[#allocation34_spill] sm:$0xff] }
 0x12a   : > { %4903 = vmatmul.mubr.msk.bf16.gmra.mrb[4].mxu0 %vm948_vm2, %v6013_v25 }
 0x12b   : > { %4906 = vmatprep.mubr.msk.bf16.mxu0 %vm948_vm2, %v7586_v55 }
 0x12d   : > { %4713 = vmatmul.mubr.msk.bf16.gmra.mrb[24].mxu1 %vm948_vm2, %v7585_v51  ;;  %v7606_v51 = vld [vmem:[#allocation52_spill] sm:$0xff] }
 0x12e   : > { %4716 = vmatprep.mubr.msk.bf16.mxu1 %vm948_vm2, %v7587_v44  ;;  %v7609_v44 = vld [vmem:[#allocation61_spill] sm:$0xff] }
 0x132   : > { %4907 = vmatmul.mubr.msk.bf16.gmra.mrb[8].mxu0 %vm948_vm2, %v7588_v20 }
 0x133   : > { %4910 = vmatprep.mubr.msk.bf16.mxu0 %vm948_vm2, %v7589_v39 }
 0x135   : > { %4717 = vmatmul.mubr.msk.bf16.gmra.mrb[28].mxu1 %vm948_vm2, %v6485_v54  ;;  %v1523_v54 = vrot.slane %v7581_v12, 4  ;;  %v7596_v12 = vld [vmem:[#allocation11_spill] sm:$0xff] }
 0x136   : > { %4720 = vmatprep.mubr.msk.bf16.mxu1 %vm948_vm2, %v6495_v17  ;;  %v7594_v17 = vrot.slane %v5797_v58, 4  ;;  %v5368_v58 = vld [vmem:[%s7287_s1 + $0x8] sm:$0x3] }
 0x138   : > { %v1525_v52 = vsel %vm1522_vm3, %v1523_v54, %v7594_v17  ;;  %v7620_v17 = vld [vmem:[#allocation37_spill] sm:$0xff] }
 0x13a   : > { %4911 = vmatmul.mubr.msk.bf16.gmra.mrb[12].mxu0 %vm948_vm2, %v7590_v19 }
 0x13b   : > { %4914 = vmatprep.mubr.msk.bf16.mxu0 %vm948_vm2, %v7591_v40 }
 0x13d   : > { %4721 = vmatmul.mubr.msk.bf16.gmra.mrb[32].mxu1 %vm948_vm2, %v6511_v23  ;;  %v7595_v23 = vld [vmem:[#allocation79_spill] sm:$0xff] }
 0x13e   : > { %4724 = vmatprep.mubr.msk.bf16.mxu1 %vm948_vm2, %v7592_v57  ;;  %v7614_v57 = vld [vmem:[#allocation19_spill] sm:$0xff] }
 0x142   : > { %4915 = vmatmul.mubr.msk.bf16.gmra.mrb[16].mxu0 %vm948_vm2, %v6543_v32 }
 0x143   : > { %4918 = vmatprep.mubr.msk.bf16.mxu0 %vm948_vm2, %v7595_v23 }
 0x145   : > { %4725 = vmatmul.mubr.msk.bf16.gmra.mrb[36].mxu1 %vm948_vm2, %v7593_v13  ;;  %v7616_v13 = vld [vmem:[#allocation22_spill] sm:$0xff] }
 0x146   : > { %4730 = vmatprep.mubr.msk.bf16.mxu1 %vm948_vm2, %v1525_v52 }
 0x14a   : > { %4919 = vmatmul.mubr.msk.bf16.gmra.mrb[20].mxu0 %vm948_vm2, %v6552_v41 }
 0x14b   : > { %4922 = vmatprep.mubr.msk.bf16.mxu0 %vm948_vm2, %v7597_v46 }
 0x14d   : > { %4731 = vmatmul.mubr.msk.bf16.vlgmr.msra.gmra.mrb[0].mxu1 %vm948_vm2, %v7596_v12 }
 0x14e   : > { %4771 = vmatpush3.bf16.msra.mxu1 %v1874_v30  ;;  %4734 = vmatprep.mubr.msk.bf16.mxu1 %vm948_vm2, %v5891_v56  ;;  %v7601_v56 = vld [vmem:[#allocation87_spill] sm:$0xff]  ;;  %v7622_v30 = vld [vmem:[#allocation41_spill] sm:$0xff] }
 0x14f   : > { %5348 = vmatprep.subr.msk.bf16.mxu1 %vm1009_vm0, %v5368_v58  ;;  %v7624_v58 = vld [vmem:[#allocation8_spill] sm:$0xff] }
 0x152   : > { %4923 = vmatmul.mubr.msk.bf16.gmra.mrb[24].mxu0 %vm948_vm2, %v7598_v62 }
 0x153   : > { %4926 = vmatprep.mubr.msk.bf16.mxu0 %vm948_vm2, %v7599_v8 }
 0x155   : > { %4735 = vmatmul.mubr.msk.bf16.gmra.mrb[4].mxu1 %vm948_vm2, %v5938_v5  ;;  %v6848_v5 = vrot.slane %v6499_v26, 4  ;;  %v3323_v26 = vsel %vm1009_vm0, %v4260_v14, 0  ;;  %v7607_v14 = vld [vmem:[#allocation56_spill] sm:$0xff] }
 0x156   : > { %4738 = vmatprep.mubr.msk.bf16.mxu1 %vm948_vm2, %v5976_v50 }
 0x157   : > { %v6853_v53 = vsel %vm1522_vm3, %v7602_v24, %v6848_v5  ;;  %v2732_v50 = vsel %vm1522_vm3, %v6848_v5, %v1523_v54 }
 0x15a   : > { %4927 = vmatmul.mubr.msk.bf16.gmra.mrb[28].mxu0 %vm948_vm2, %v7600_v42 }
 0x15b   : > { %4930 = vmatprep.mubr.msk.bf16.mxu0 %vm948_vm2, %v7601_v56 }
 0x15d   : > { %4739 = vmatmul.mubr.msk.bf16.gmra.mrb[8].mxu1 %vm948_vm2, %v6013_v25  ;;  %v7603_v25 = vld [vmem:[#allocation42_spill] sm:$0xff] }
 0x15e   : > { %4742 = vmatprep.mubr.msk.bf16.mxu1 %vm948_vm2, %v7586_v55  ;;  %v7608_v55 = vld [vmem:[#allocation57_spill] sm:$0xff] }
 0x162   : > { %4931 = vmatmul.mubr.msk.bf16.gmra.mrb[32].mxu0 %vm948_vm2, %v6853_v53 }
 0x163   : > { %4934 = vmatprep.mubr.msk.bf16.mxu0 %vm948_vm2, %v2732_v50  ;;  %v7626_v50 = vld [vmem:[#allocation53_spill] sm:$0xff] }
 0x165   : > { %4743 = vmatmul.mubr.msk.bf16.gmra.mrb[12].mxu1 %vm948_vm2, %v7588_v20  ;;  %v7610_v20 = vld [vmem:[#allocation65_spill] sm:$0xff] }
 0x166   : > { %4746 = vmatprep.mubr.msk.bf16.mxu1 %vm948_vm2, %v7589_v39  ;;  %v7611_v39 = vld [vmem:[#allocation82_spill] sm:$0xff] }
 0x16a   : > { %4935 = vmatmul.mubr.msk.bf16.gmra.mrb[36].mxu0 %vm948_vm2, %v1523_v54  ;;  %v7615_v54 = vld [vmem:[#allocation2_spill] sm:$0xff] }
 0x16b   : > { %4940 = vmatprep.mubr.msk.bf16.mxu0 %vm948_vm2, %v7603_v25  ;;  %v3225_v25 = vrot.slane %v5888_v49, 5 }
 0x16d   : > { %4747 = vmatmul.mubr.msk.bf16.gmra.mrb[16].mxu1 %vm948_vm2, %v7590_v19  ;;  %v7612_v19 = vld [vmem:[#allocation85_spill] sm:$0xff] }
 0x16e   : > { %4750 = vmatprep.mubr.msk.bf16.mxu1 %vm948_vm2, %v7591_v40  ;;  %v7613_v40 = vld [vmem:[#allocation16_spill] sm:$0xff] }
 0x172   : > { %4941 = vmatmul.mubr.msk.bf16.vlgmr.msra.gmra.mrb[0].mxu0 %vm948_vm2, %v7604_v33  ;;  %v7627_v33 = vld [vmem:[#allocation60_spill] sm:$0xff] }
 0x173   : > { %4981 = vmatpush3.bf16.msra.mxu0 %v3323_v26  ;;  %4944 = vmatprep.mubr.msk.bf16.mxu0 %vm948_vm2, %v7605_v21  ;;  %v7628_v21 = vld [vmem:[#allocation62_spill] sm:$0xff] }
 0x175   : > { %4751 = vmatmul.mubr.msk.bf16.gmra.mrb[20].mxu1 %vm948_vm2, %v6543_v32 }
 0x176   : > { %4754 = vmatprep.mubr.msk.bf16.mxu1 %vm948_vm2, %v7595_v23 }
 0x17a   : > { %4945 = vmatmul.mubr.msk.bf16.gmra.mrb[4].mxu0 %vm948_vm2, %v7606_v51  ;;  %v3229_v51 = vrot.slane %v5973_v7, 5  ;;  %v7632_v7 = vld [vmem:[#allocation75_spill] sm:$0xff] }
 0x17b   : > { %4948 = vmatprep.mubr.msk.bf16.mxu0 %vm948_vm2, %v7607_v14 }
 0x17d   : > { %4755 = vmatmul.mubr.msk.bf16.gmra.mrb[24].mxu1 %vm948_vm2, %v6552_v41 }
 0x17e   : > { %4758 = vmatprep.mubr.msk.bf16.mxu1 %vm948_vm2, %v7597_v46 }
 0x182   : > { %4949 = vmatmul.mubr.msk.bf16.gmra.mrb[8].mxu0 %vm948_vm2, %v7608_v55  ;;  %v7630_v55 = vld [vmem:[#allocation68_spill] sm:$0xff] }
 0x183   : > { %4952 = vmatprep.mubr.msk.bf16.mxu0 %vm948_vm2, %v7609_v44  ;;  %v7631_v44 = vld [vmem:[#allocation70_spill] sm:$0xff] }
 0x185   : > { %4759 = vmatmul.mubr.msk.bf16.gmra.mrb[28].mxu1 %vm948_vm2, %v7598_v62 }
 0x186   : > { %4762 = vmatprep.mubr.msk.bf16.mxu1 %vm948_vm2, %v7599_v8 }
 0x18a   : > { %4953 = vmatmul.mubr.msk.bf16.gmra.mrb[12].mxu0 %vm948_vm2, %v7610_v20  ;;  %v7634_v20 = vld [vmem:[#allocation78_spill] sm:$0xff] }
 0x18b   : > { %4956 = vmatprep.mubr.msk.bf16.mxu0 %vm948_vm2, %v7611_v39 }
 0x18d   : > { %4763 = vmatmul.mubr.msk.bf16.gmra.mrb[32].mxu1 %vm948_vm2, %v7600_v42 }
 0x18e   : > { %4766 = vmatprep.mubr.msk.bf16.mxu1 %vm948_vm2, %v7601_v56 }
 0x192   : > { %4957 = vmatmul.mubr.msk.bf16.gmra.mrb[16].mxu0 %vm948_vm2, %v7612_v19 }
 0x193   : > { %4960 = vmatprep.mubr.msk.bf16.mxu0 %vm948_vm2, %v6613_v18  ;;  %v7617_v18 = vld [vmem:[#allocation25_spill] sm:$0xff] }
 0x195   : > { %4767 = vmatmul.mubr.msk.bf16.gmra.mrb[36].mxu1 %vm948_vm2, %v7602_v24  ;;  %v3222_v24 = vrot.slane %v7624_v58, 5 }
 0x196   : > { %4772 = vmatprep.mubr.msk.bf16.mxu1 %vm948_vm2, %v7613_v40  ;;  %v7636_v40 = vld [vmem:[#allocation5_spill] sm:$0xff] }
 0x19a   : > { %4961 = vmatmul.mubr.msk.bf16.gmra.mrb[20].mxu0 %vm948_vm2, %v6627_v47  ;;  %v7618_v47 = vld [vmem:[#allocation29_spill] sm:$0xff] }
 0x19b   : > { %4964 = vmatprep.mubr.msk.bf16.mxu0 %vm948_vm2, %v6716_v43  ;;  %v7619_v43 = vld [vmem:[#allocation33_spill] sm:$0xff] }
 0x19d   : > { %4773 = vmatmul.mubr.msk.bf16.vlgmr.msra.gmra.mrb[0].mxu1 %vm948_vm2, %v7614_v57 }
 0x19e   : > { %5023 = vmatpush3.bf16.msra.mxu1 %v7615_v54  ;;  %4776 = vmatprep.mubr.msk.bf16.mxu1 %vm948_vm2, %v7616_v13 }
 0x1a2   : > { %4965 = vmatmul.mubr.msk.bf16.gmra.mrb[24].mxu0 %vm948_vm2, %v6724_v61  ;;  %v7621_v61 = vld [vmem:[#allocation3_spill] sm:$0xff] }
 0x1a3   : > { %4968 = vmatprep.mubr.msk.bf16.mxu0 %vm948_vm2, %v6734_v9  ;;  %v2976_v52 = vor.u32 %v6755_v34, %v7621_v61  ;;  %v7638_v61 = vld [vmem:[#allocation7_spill] sm:$0xff] }
 0x1a5   : > { %4777 = vmatmul.mubr.msk.bf16.gmra.mrb[4].mxu1 %vm948_vm2, %v7617_v18  ;;  %v2977_v9 = vsel %vm2354_vm4, %v6549_v36, %v2976_v52  ;;  %v2978_v12 = vsel %vm2354_vm4, %v2976_v52, %v6755_v34  ;;  %v7625_v36 = vld [vmem:[#allocation51_spill] sm:$0xff]  ;;  %v7637_v18 = vld [vmem:[#allocation6_spill] sm:$0xff] }
 0x1a6   : > { %4780 = vmatprep.mubr.msk.bf16.mxu1 %vm948_vm2, %v7618_v47 }
 0x1aa   : > { %4969 = vmatmul.mubr.msk.bf16.gmra.mrb[28].mxu0 %vm948_vm2, %v6508_v35  ;;  %v7623_v35 = vld [vmem:[#allocation48_spill] sm:$0xff] }
 0x1ab   : > { %4972 = vmatprep.mubr.msk.bf16.mxu0 %vm948_vm2, %v6538_v48  ;;  %v3223_v48 = vrot.slane %v5844_v37, 5  ;;  %v3227_v37 = vrot.slane %v5935_v4, 5  ;;  %v7629_v4 = vrot.slane %v6010_v31, 5  ;;  %v7633_v31 = vld [vmem:[#allocation76_spill] sm:$0xff] }
 0x1ad   : > { %4781 = vmatmul.mubr.msk.bf16.gmra.mrb[8].mxu1 %vm948_vm2, %v7619_v43  ;;  %v3226_v34 = vsel %vm3221_vm6, %v3223_v48, %v3225_v25  ;;  %v3228_v26 = vsel %vm3221_vm6, %v3225_v25, %v3227_v37  ;;  %v3230_v49 = vsel %vm3221_vm6, %v3227_v37, %v3229_v51  ;;  %v3232_v14 = vsel %vm3221_vm6, %v3229_v51, %v7629_v4  ;;  %v7639_v4 = vld [vmem:[#allocation13_spill] sm:$0xff] }
 0x1ae   : > { %4784 = vmatprep.mubr.msk.bf16.mxu1 %vm948_vm2, %v7620_v17 }
 0x1b2   : > { %4973 = vmatmul.mubr.msk.bf16.gmra.mrb[32].mxu0 %vm948_vm2, %v6572_v45  ;;  %v3224_v45 = vsel %vm3221_vm6, %v3222_v24, %v3223_v48 }
 0x1b3   : > { %4976 = vmatprep.mubr.msk.bf16.mxu0 %vm948_vm2, %v2977_v9 }
 0x1b5   : > { %4785 = vmatmul.mubr.msk.bf16.gmra.mrb[12].mxu1 %vm948_vm2, %v7622_v30 }
 0x1b6   : > { %4788 = vmatprep.mubr.msk.bf16.mxu1 %vm948_vm2, %v7623_v35 }
 0x1ba   : > { %4977 = vmatmul.mubr.msk.bf16.gmra.mrb[36].mxu0 %vm948_vm2, %v2978_v12 }
 0x1bb   : > { %4982 = vmatprep.mubr.msk.bf16.mxu0 %vm948_vm2, %v3224_v45 }
 0x1bd   : > { %4789 = vmatmul.mubr.msk.bf16.gmra.mrb[16].mxu1 %vm948_vm2, %v7625_v36 }
 0x1be   : > { %4792 = vmatprep.mubr.msk.bf16.mxu1 %vm948_vm2, %v7626_v50 }
 0x1c2   : > { %4983 = vmatmul.mubr.msk.bf16.vlgmr.msra.gmra.mrb[0].mxu0 %vm948_vm2, %v3226_v34 }
 0x1c3   : > { %4986 = vmatprep.mubr.msk.bf16.mxu0 %vm948_vm2, %v3228_v26 }
 0x1c5   : > { %4793 = vmatmul.mubr.msk.bf16.gmra.mrb[20].mxu1 %vm948_vm2, %v7627_v33 }
 0x1c6   : > { %4796 = vmatprep.mubr.msk.bf16.mxu1 %vm948_vm2, %v7628_v21 }
 0x1ca   : > { %4987 = vmatmul.mubr.msk.bf16.gmra.mrb[4].mxu0 %vm948_vm2, %v3230_v49 }
 0x1cb   : > { %4990 = vmatprep.mubr.msk.bf16.mxu0 %vm948_vm2, %v3232_v14 }
 0x1cd   : > { %4797 = vmatmul.mubr.msk.bf16.gmra.mrb[24].mxu1 %vm948_vm2, %v7630_v55 }
 0x1ce   : > { %4800 = vmatprep.mubr.msk.bf16.mxu1 %vm948_vm2, %v7631_v44 }
 0x1d2   : > { %4991 = vmatmul.mubr.msk.bf16.gmra.mrb[8].mxu0 %vm948_vm2, %v6638_v59 }
 0x1d3   : > { %4994 = vmatprep.mubr.msk.bf16.mxu0 %vm948_vm2, %v6641_v3 }
 0x1d5   : > { %4801 = vmatmul.mubr.msk.bf16.gmra.mrb[28].mxu1 %vm948_vm2, %v7632_v7 }
 0x1d6   : > { %4804 = vmatprep.mubr.msk.bf16.mxu1 %vm948_vm2, %v7633_v31  ;;  %v7640_v31 = vld [vmem:[#allocation10_spill] sm:$0xff] }
 0x1da   : > { %4995 = vmatmul.mubr.msk.bf16.gmra.mrb[12].mxu0 %vm948_vm2, %v6644_v2 }
 0x1db   : > { %4998 = vmatprep.mubr.msk.bf16.mxu0 %vm948_vm2, %v6663_v29 }
 0x1dd   : > { %4805 = vmatmul.mubr.msk.bf16.gmra.mrb[32].mxu1 %vm948_vm2, %v7634_v20 }
 0x1de   : > { %4808 = vmatprep.mubr.msk.bf16.mxu1 %vm948_vm2, %v6688_v11 }
 0x1e2   : > { %4999 = vmatmul.mubr.msk.bf16.gmra.mrb[16].mxu0 %vm948_vm2, %v6666_v6 }
 0x1e3   : > { %5002 = vmatprep.mubr.msk.bf16.mxu0 %vm948_vm2, %v6669_v27 }
 0x1e5   : > { %4809 = vmatmul.mubr.msk.bf16.gmra.mrb[36].mxu1 %vm948_vm2, %v6660_v28 }
 0x1e6   : > { %4834 = vmatprep.mubr.msk.bf16.mxu1 %vm948_vm2, %v6543_v32 }
 0x1ea   : > { %5003 = vmatmul.mubr.msk.bf16.gmra.mrb[20].mxu0 %vm948_vm2, %v6675_v22 }
 0x1eb   : > { %5006 = vmatprep.mubr.msk.bf16.mxu0 %vm948_vm2, %v6678_v10 }
 0x1ed   : > { %4835 = vmatmul.mubr.msk.bf16.vlgmr.msra.gmra.mrb[20].mxu1 %vm948_vm2, %v7595_v23 }
 0x1ee   : > { %4838 = vmatprep.mubr.msk.bf16.mxu1 %vm948_vm2, %v6552_v41 }
 0x1f2   : > { %5007 = vmatmul.mubr.msk.bf16.gmra.mrb[24].mxu0 %vm948_vm2, %v6681_v15 }
 0x1f3   : > { %5010 = vmatprep.mubr.msk.bf16.mxu0 %vm948_vm2, %v6691_v16 }
 0x1f5   : > { %4839 = vmatmul.mubr.msk.bf16.gmra.mrb[24].mxu1 %vm948_vm2, %v7597_v46 }
 0x1f6   : > { %4842 = vmatprep.mubr.msk.bf16.mxu1 %vm948_vm2, %v7598_v62 }
 0x1fa   : > { %5011 = vmatmul.mubr.msk.bf16.gmra.mrb[28].mxu0 %vm948_vm2, %v6698_v63 }
 0x1fb   : > { %5014 = vmatprep.mubr.msk.bf16.mxu0 %vm948_vm2, %v6705_v60 }
 0x1fd   : > { %4843 = vmatmul.mubr.msk.bf16.gmra.mrb[28].mxu1 %vm948_vm2, %v7599_v8 }
 0x1fe   : > { %4846 = vmatprep.mubr.msk.bf16.mxu1 %vm948_vm2, %v7600_v42 }
 0x202   : > { %5015 = vmatmul.mubr.msk.bf16.gmra.mrb[32].mxu0 %vm948_vm2, %v6708_v38 }
 0x203   : > { %5018 = vmatprep.mubr.msk.bf16.mxu0 %vm948_vm2, %v6713_v1 }
 0x205   : > { %4847 = vmatmul.mubr.msk.bf16.gmra.mrb[32].mxu1 %vm948_vm2, %v7601_v56 }
 0x206   : > { %4850 = vmatprep.mubr.msk.bf16.mxu1 %vm948_vm2, %v6853_v53 }
 0x20a   : > { %5019 = vmatmul.mubr.msk.bf16.gmra.mrb[36].mxu0 %vm948_vm2, %v6701_v0 }
 0x20d   : > { %4851 = vmatmul.mubr.msk.bf16.gmra.mrb[36].mxu1 %vm948_vm2, %v6848_v5  ;;  %v7635_v5 = vld [vmem:[#allocation4_spill] sm:$0xff] }
 0x270   : > { %v4774_v41 = vpop.f32.mrb[0].mxu1 }
 0x271   : > { %v1910_v32 = vpop.f32.mrb[1].mxu1 }
 0x272   : > { %v4775_v59 = vpop.f32.mrb[2].mxu1 }
 0x273   : > { %v1913_v3 = vpop.f32.mrb[3].mxu1 }
 0x278   : > { %v4778_v2 = vpop.f32.mrb[4].mxu1 }
 0x279   : > { %v1926_v28 = vpop.f32.mrb[5].mxu1 }
 0x27a   : > { %v4779_v29 = vpop.f32.mrb[6].mxu1 }
 0x27b   : > { %v1929_v6 = vpop.f32.mrb[7].mxu1 }
 0x280   : > { %v7040_v27 = vpop.f32.mrb[8].mxu1 }
 0x281   : > { %v7042_v22 = vpop.f32.mrb[9].mxu1 }
 0x282   : > { %v7044_v10 = vpop.f32.mrb[10].mxu1 }
 0x283   : > { %v7046_v15 = vpop.f32.mrb[11].mxu1 }
 0x288   : > { %v7048_v11 = vpop.f32.mrb[12].mxu1 }
 0x289   : > { %v7050_v16 = vpop.f32.mrb[13].mxu1 }
 0x28a   : > { %v7052_v63 = vpop.f32.mrb[14].mxu1 }
 0x28b   : > { %v7054_v0 = vpop.f32.mrb[15].mxu1 }
 0x290   : > { %v7056_v60 = vpop.f32.mrb[16].mxu1 }
 0x291   : > { %v7058_v38 = vpop.f32.mrb[17].mxu1 }
 0x292   : > { %v7060_v1 = vpop.f32.mrb[18].mxu1 }
 0x293   : > { %v7062_v23 = vpop.f32.mrb[19].mxu1 }
 0x295   : > { %v4984_v46 = vpop.f32.mrb[0].mxu0 }
 0x296   : > { %v5024_v62 = vadd.f32 %v4984_v46, %v4774_v41  ;;  %v3359_v8 = vpop.f32.mrb[1].mxu0 }
 0x297   : > { %v5025_v42 = vadd.f32 %v3359_v8, %v1910_v32  ;;  %v4985_v56 = vpop.f32.mrb[2].mxu0 }
 0x298   : > { %v3558_v53 = vmul.f32 %v5024_v62, %v7635_v5  ;;  %v5026_v39 = vadd.f32 %v4985_v56, %v4775_v59  ;;  %v3362_v19 = vpop.f32.mrb[3].mxu0  ;;  %v7642_v5 = vld [vmem:[#allocation9_spill] sm:$0xff] }
 0x299   : > { %v3556_v57 = vmul.f32 %v5025_v42, %v7636_v40  ;;  %v5027_v54 = vadd.f32 %v3362_v19, %v1913_v3  ;;  %v7641_v42 = vld [vmem:[#allocation12_spill] sm:$0xff] }
 0x29a   : > { %v4324_v13 = vpack.c.bf16 %v3558_v53, %v3558_v53  ;;  %v3559_v47 = vmul.f32 %v5026_v39, %v7637_v18  ;;  %v3877_v9 = vmul.f32 %v3558_v53, %v3558_v53  ;;  %v3795_v37 = vsel %vm948_vm2, %v3558_v53, 0.0 }
 0x29b   : > { %v4322_v43 = vpack.c.bf16 %v3556_v57, %v3556_v57  ;;  %v3875_v17 = vmul.f32 %v3556_v57, %v3556_v57  ;;  %v3557_v52 = vmul.f32 %v5027_v54, %v7638_v61  ;;  %v3792_v35 = vsel %vm948_vm2, %v3556_v57, 0.0 }
 0x29c   : > { %3755 = vst.msk [vmem:[%s7070_s23 + $0x8] sm:$0xf] %vm3752_vm7, %v4324_v13  ;;  %v4325_v30 = vpack.c.bf16 %v3559_v47, %v3559_v47  ;;  %v3878_v45 = vmul.f32 %v3559_v47, %v3559_v47  ;;  %v3917_v7 = vsel %vm948_vm2, %v3877_v9, 0.0  ;;  %v3797_v32 = vsel %vm948_vm2, %v3559_v47, 0.0 }
 0x29d   : > { %3753 = vst.msk [vmem:[%s7070_s23] sm:$0xf] %vm3752_vm7, %v4322_v43  ;;  %v4323_v48 = vpack.c.bf16 %v3557_v52, %v3557_v52  ;;  %v3793_v12 = vsel %vm948_vm2, %v3557_v52, 0.0  ;;  %v3876_v58 = vmul.f32 %v3557_v52, %v3557_v52  ;;  %v4988_v24 = vpop.f32.mrb[4].mxu0  ;;  %v3914_v34 = vsel %vm948_vm2, %v3875_v17, 0.0 }
 0x29e   : > { %3756 = vst.msk [vmem:[%s7070_s23 + $0xc] sm:$0xf] %vm3752_vm7, %v4325_v30  ;;  %v3794_v36 = vadd.f32 %v3793_v12, %v3792_v35  ;;  %v5028_v50 = vadd.f32 %v4988_v24, %v4778_v2  ;;  %v3375_v25 = vpop.f32.mrb[5].mxu0  ;;  %v3919_v59 = vsel %vm948_vm2, %v3878_v45, 0.0  ;;  %v7643_v24 = vld [vmem:[#allocation18_spill] sm:$0xff] }
 0x29f   : > { %3754 = vst.msk [vmem:[%s7070_s23 + $0x4] sm:$0xf] %vm3752_vm7, %v4323_v48  ;;  %v3915_v26 = vsel %vm948_vm2, %v3876_v58, 0.0  ;;  %v5029_v33 = vadd.f32 %v3375_v25, %v1926_v28  ;;  %v4989_v21 = vpop.f32.mrb[6].mxu0  ;;  %v7644_v25 = vld [vmem:[#allocation15_spill] sm:$0xff] }
 0x2a0   : > { %v3796_v51 = vadd.f32 %v3795_v37, %v3794_v36  ;;  %v3916_v49 = vadd.f32 %v3915_v26, %v3914_v34  ;;  %v3562_v14 = vmul.f32 %v5028_v50, %v7639_v4  ;;  %v5030_v55 = vadd.f32 %v4989_v21, %v4779_v29  ;;  %v3378_v44 = vpop.f32.mrb[7].mxu0  ;;  %v7645_v34 = vld [vmem:[#allocation17_spill] sm:$0xff]  ;;  %v7646_v21 = vld [vmem:[#allocation14_spill] sm:$0xff] }
 0x2a1   : > { %v3560_v20 = vmul.f32 %v5029_v33, %v7640_v31  ;;  %v5031_v41 = vadd.f32 %v3378_v44, %v1929_v6 }
 0x2a2   : > { %v3918_v3 = vadd.f32 %v3917_v7, %v3916_v49  ;;  %v4328_v2 = vpack.c.bf16 %v3562_v14, %v3562_v14  ;;  %v3798_v46 = vadd.f32 %v3797_v32, %v3796_v51  ;;  %v3563_v56 = vmul.f32 %v5030_v55, %v7641_v42 }
 0x2a3   : > { %v4326_v28 = vpack.c.bf16 %v3560_v20, %v3560_v20  ;;  %v3799_v62 = vsel %vm948_vm2, %v3560_v20, 0.0  ;;  %v3879_v8 = vmul.f32 %v3560_v20, %v3560_v20  ;;  %v3561_v53 = vmul.f32 %v5031_v41, %v7642_v5 }
 0x2a4   : > { %3759 = vst.msk [vmem:[%s7070_s23 + $0x18] sm:$0xf] %vm3752_vm7, %v4328_v2  ;;  %v3920_v29 = vadd.f32 %v3919_v59, %v3918_v3  ;;  %v3800_v6 = vadd.f32 %v3799_v62, %v3798_v46  ;;  %v3881_v40 = vmul.f32 %v3562_v14, %v3562_v14  ;;  %v4329_v54 = vpack.c.bf16 %v3563_v56, %v3563_v56 }
 0x2a5   : > { %3757 = vst.msk [vmem:[%s7070_s23 + $0x10] sm:$0xf] %vm3752_vm7, %v4326_v28  ;;  %v3921_v39 = vsel %vm948_vm2, %v3879_v8, 0.0  ;;  %v4992_v19 = vpop.f32.mrb[8].mxu0  ;;  %v4327_v18 = vpack.c.bf16 %v3561_v53, %v3561_v53  ;;  %v3801_v47 = vsel %vm948_vm2, %v3561_v53, 0.0  ;;  %v3880_v43 = vmul.f32 %v3561_v53, %v3561_v53 }
 0x2a6   : > { %v3922_v57 = vadd.f32 %v3921_v39, %v3920_v29  ;;  %v3391_v13 = vpop.f32.mrb[9].mxu0  ;;  %v5032_v17 = vadd.f32 %v4992_v19, %v7040_v27  ;;  %v3803_v52 = vsel %vm948_vm2, %v3562_v14, 0.0  ;;  %3760 = vst.msk [vmem:[%s7070_s23 + $0x1c] sm:$0xf] %vm3752_vm7, %v4329_v54  ;;  %v3802_v9 = vadd.f32 %v3801_v47, %v3800_v6  ;;  %v7647_v19 = vld [vmem:[#allocation24_spill] sm:$0xff] }
 0x2a7   : > { %v4993_v61 = vpop.f32.mrb[10].mxu0  ;;  %v5033_v30 = vadd.f32 %v3391_v13, %v7042_v22  ;;  %v3882_v12 = vmul.f32 %v3563_v56, %v3563_v56  ;;  %3758 = vst.msk [vmem:[%s7070_s23 + $0x14] sm:$0xf] %vm3752_vm7, %v4327_v18  ;;  %v3923_v58 = vsel %vm948_vm2, %v3880_v43, 0.0  ;;  %v3925_v22 = vsel %vm948_vm2, %v3881_v40, 0.0  ;;  %v7648_v18 = vld [vmem:[#allocation21_spill] sm:$0xff] }
 0x2a8   : > { %v5034_v35 = vadd.f32 %v4993_v61, %v7044_v10  ;;  %v3394_v48 = vpop.f32.mrb[11].mxu0  ;;  %v3566_v45 = vmul.f32 %v5032_v17, %v7643_v24  ;;  %v3804_v36 = vadd.f32 %v3803_v52, %v3802_v9  ;;  %v3924_v50 = vadd.f32 %v3923_v58, %v3922_v57  ;;  %v7649_v61 = vld [vmem:[#allocation23_spill] sm:$0xff] }
 0x2a9   : > { %v5035_v27 = vadd.f32 %v3394_v48, %v7046_v15  ;;  %v3564_v37 = vmul.f32 %v5033_v30, %v7644_v25  ;;  %v3805_v10 = vsel %vm948_vm2, %v3563_v56, 0.0  ;;  %v3927_v55 = vsel %vm948_vm2, %v3882_v12, 0.0 }
 0x2aa   : > { %v3567_v26 = vmul.f32 %v5034_v35, %v7645_v34  ;;  %v4332_v33 = vpack.c.bf16 %v3566_v45, %v3566_v45  ;;  %v3926_v49 = vadd.f32 %v3925_v22, %v3924_v50  ;;  %v3806_v14 = vadd.f32 %v3805_v10, %v3804_v36 }
 0x2ab   : > { %v3565_v51 = vmul.f32 %v5035_v27, %v7646_v21  ;;  %v4330_v4 = vpack.c.bf16 %v3564_v37, %v3564_v37  ;;  %v3807_v15 = vsel %vm948_vm2, %v3564_v37, 0.0  ;;  %v3811_v44 = vsel %vm948_vm2, %v3566_v45, 0.0  ;;  %v7650_v27 = vld [vmem:[#allocation20_spill] sm:$0xff] }
 0x2ac   : > { %3763 = vst.msk [vmem:[%s7070_s23 + $0x28] sm:$0xf] %vm3752_vm7, %v4332_v33  ;;  %v3883_v7 = vmul.f32 %v3564_v37, %v3564_v37  ;;  %v4333_v31 = vpack.c.bf16 %v3567_v26, %v3567_v26  ;;  %v3885_v41 = vmul.f32 %v3566_v45, %v3566_v45  ;;  %v3808_v32 = vadd.f32 %v3807_v15, %v3806_v14  ;;  %v7651_v14 = vld [vmem:[#allocation32_spill] sm:$0xff] }
 0x2ad   : > { %v4996_v20 = vpop.f32.mrb[12].mxu0  ;;  %3761 = vst.msk [vmem:[%s7070_s23 + $0x20] sm:$0xf] %vm3752_vm7, %v4330_v4  ;;  %v3928_v59 = vadd.f32 %v3927_v55, %v3926_v49  ;;  %v4331_v3 = vpack.c.bf16 %v3565_v51, %v3565_v51  ;;  %v3809_v46 = vsel %vm948_vm2, %v3565_v51, 0.0  ;;  %v3884_v62 = vmul.f32 %v3565_v51, %v3565_v51  ;;  %v7652_v55 = vld [vmem:[#allocation28_spill] sm:$0xff] }
 0x2ae   : > { %v3407_v2 = vpop.f32.mrb[13].mxu0  ;;  %v3929_v28 = vsel %vm948_vm2, %v3883_v7, 0.0  ;;  %3764 = vst.msk [vmem:[%s7070_s23 + $0x2c] sm:$0xf] %vm3752_vm7, %v4333_v31  ;;  %v5036_v8 = vadd.f32 %v4996_v20, %v7048_v11  ;;  %v3886_v56 = vmul.f32 %v3567_v26, %v3567_v26  ;;  %v3810_v5 = vadd.f32 %v3809_v46, %v3808_v32 }
 0x2af   : > { %v4997_v29 = vpop.f32.mrb[14].mxu0  ;;  %v3930_v42 = vadd.f32 %v3929_v28, %v3928_v59  ;;  %3762 = vst.msk [vmem:[%s7070_s23 + $0x24] sm:$0xf] %vm3752_vm7, %v4331_v3  ;;  %v5037_v53 = vadd.f32 %v3407_v2, %v7050_v16  ;;  %v3931_v39 = vsel %vm948_vm2, %v3884_v62, 0.0  ;;  %v3933_v43 = vsel %vm948_vm2, %v3885_v41, 0.0 }
 0x2b0   : > { %v3410_v6 = vpop.f32.mrb[15].mxu0  ;;  %v3570_v40 = vmul.f32 %v5036_v8, %v7647_v19  ;;  %v5038_v57 = vadd.f32 %v4997_v29, %v7052_v63  ;;  %v3812_v13 = vadd.f32 %v3811_v44, %v3810_v5  ;;  %v3813_v17 = vsel %vm948_vm2, %v3567_v26, 0.0 }
 0x2b1   : > { %v5039_v54 = vadd.f32 %v3410_v6, %v7054_v0  ;;  %v3932_v11 = vadd.f32 %v3931_v39, %v3930_v42  ;;  %v3568_v47 = vmul.f32 %v5037_v53, %v7648_v18  ;;  %v3935_v0 = vsel %vm948_vm2, %v3886_v56, 0.0 }
 0x2b2   : > { %v4336_v16 = vpack.c.bf16 %v3570_v40, %v3570_v40  ;;  %v3571_v52 = vmul.f32 %v5038_v57, %v7649_v61  ;;  %v3814_v35 = vadd.f32 %v3813_v17, %v3812_v13  ;;  %v3889_v25 = vmul.f32 %v3570_v40, %v3570_v40 }
 0x2b3   : > { %v3934_v9 = vadd.f32 %v3933_v43, %v3932_v11  ;;  %v4334_v30 = vpack.c.bf16 %v3568_v47, %v3568_v47  ;;  %v3815_v63 = vsel %vm948_vm2, %v3568_v47, 0.0  ;;  %v3887_v48 = vmul.f32 %v3568_v47, %v3568_v47 }
 0x2b4   : > { %3767 = vst.msk [vmem:[%s7070_s23 + $0x38] sm:$0xf] %vm3752_vm7, %v4336_v16  ;;  %v4337_v12 = vpack.c.bf16 %v3571_v52, %v3571_v52  ;;  %v3816_v24 = vadd.f32 %v3815_v63, %v3814_v35  ;;  %v3569_v36 = vmul.f32 %v5039_v54, %v7650_v27  ;;  %v3819_v7 = vsel %vm948_vm2, %v3570_v40, 0.0  ;;  %v7655_v27 = vld [vmem:[#allocation40_spill] sm:$0xff] }
 0x2b5   : > { %v5000_v58 = vpop.f32.mrb[16].mxu0  ;;  %3765 = vst.msk [vmem:[%s7070_s23 + $0x30] sm:$0xf] %vm3752_vm7, %v4334_v30  ;;  %v3936_v45 = vadd.f32 %v3935_v0, %v3934_v9  ;;  %v3937_v37 = vsel %vm948_vm2, %v3887_v48, 0.0  ;;  %v3890_v31 = vmul.f32 %v3571_v52, %v3571_v52  ;;  %v3941_v20 = vsel %vm948_vm2, %v3889_v25, 0.0 }
 0x2b6   : > { %v3423_v50 = vpop.f32.mrb[17].mxu0  ;;  %3768 = vst.msk [vmem:[%s7070_s23 + $0x3c] sm:$0xf] %vm3752_vm7, %v4337_v12  ;;  %v5040_v34 = vadd.f32 %v5000_v58, %v7056_v60  ;;  %v4335_v33 = vpack.c.bf16 %v3569_v36, %v3569_v36  ;;  %v3817_v21 = vsel %vm948_vm2, %v3569_v36, 0.0  ;;  %v3888_v4 = vmul.f32 %v3569_v36, %v3569_v36 }
 0x2b7   : > { %v5041_v26 = vadd.f32 %v3423_v50, %v7058_v38  ;;  %v5001_v22 = vpop.f32.mrb[18].mxu0  ;;  %v3938_v10 = vadd.f32 %v3937_v37, %v3936_v45  ;;  %v3818_v49 = vadd.f32 %v3817_v21, %v3816_v24  ;;  %v3821_v3 = vsel %vm948_vm2, %v3571_v52, 0.0  ;;  %v7656_v50 = vld [vmem:[#allocation36_spill] sm:$0xff] }
 0x2b8   : > { %v3426_v51 = vpop.f32.mrb[19].mxu0  ;;  %v3574_v15 = vmul.f32 %v5040_v34, %v7651_v14  ;;  %3766 = vst.msk [vmem:[%s7070_s23 + $0x34] sm:$0xf] %vm3752_vm7, %v4335_v33  ;;  %v5042_v60 = vadd.f32 %v5001_v22, %v7060_v1  ;;  %v3939_v32 = vsel %vm948_vm2, %v3888_v4, 0.0  ;;  %v7653_v1 = vld [vmem:[#allocation31_spill] sm:$0xff]  ;;  %v3943_v5 = vsel %vm948_vm2, %v3890_v31, 0.0 }
 0x2b9   : > { %v3572_v44 = vmul.f32 %v5041_v26, %v7652_v55  ;;  %v5043_v38 = vadd.f32 %v3426_v51, %v7062_v23  ;;  %v3820_v41 = vadd.f32 %v3819_v7, %v3818_v49  ;;  %v3940_v2 = vadd.f32 %v3939_v32, %v3938_v10  ;;  %v7654_v23 = vld [vmem:[#allocation27_spill] sm:$0xff] }
 0x2ba   : > { %v4340_v59 = vpack.c.bf16 %v3574_v15, %v3574_v15  ;;  %v3575_v29 = vmul.f32 %v5042_v60, %v7653_v1  ;;  %v3827_v19 = vsel %vm948_vm2, %v3574_v15, 0.0  ;;  %v3893_v18 = vmul.f32 %v3574_v15, %v3574_v15  ;;  %v7657_v34 = vld [vmem:[#allocation39_spill] sm:$0xff] }
 0x2bb   : > { %v4338_v28 = vpack.c.bf16 %v3572_v44, %v3572_v44  ;;  %v3823_v46 = vsel %vm948_vm2, %v3572_v44, 0.0  ;;  %v3822_v62 = vadd.f32 %v3821_v3, %v3820_v41  ;;  %v3891_v8 = vmul.f32 %v3572_v44, %v3572_v44  ;;  %v7658_v22 = vld [vmem:[#allocation35_spill] sm:$0xff] }
 0x2bc   : > { %3771 = vst.msk [vmem:[%s7070_s23 + $0x48] sm:$0xf] %vm3752_vm7, %v4340_v59  ;;  %v3573_v42 = vmul.f32 %v5043_v38, %v7654_v23  ;;  %v3942_v53 = vadd.f32 %v3941_v20, %v3940_v2  ;;  %v4341_v54 = vpack.c.bf16 %v3575_v29, %v3575_v29  ;;  %v3894_v48 = vmul.f32 %v3575_v29, %v3575_v29 }
 0x2bd   : > { %v5004_v56 = vpop.f32.mrb[20].mxu0  ;;  %3769 = vst.msk [vmem:[%s7070_s23 + $0x40] sm:$0xf] %vm3752_vm7, %v4338_v28  ;;  %v3824_v40 = vadd.f32 %v3823_v46, %v3822_v62  ;;  %v3945_v57 = vsel %vm948_vm2, %v3891_v8, 0.0  ;;  %v3949_v33 = vsel %vm948_vm2, %v3893_v18, 0.0  ;;  %v3829_v21 = vsel %vm948_vm2, %v3575_v29, 0.0 }
 0x2be   : > { %v3439_v39 = vpop.f32.mrb[21].mxu0  ;;  %v3944_v47 = vadd.f32 %v3943_v5, %v3942_v53  ;;  %v4339_v43 = vpack.c.bf16 %v3573_v42, %v3573_v42  ;;  %v3825_v17 = vsel %vm948_vm2, %v3573_v42, 0.0  ;;  %3772 = vst.msk [vmem:[%s7070_s23 + $0x4c] sm:$0xf] %vm3752_vm7, %v4341_v54  ;;  %v3892_v9 = vmul.f32 %v3573_v42, %v3573_v42  ;;  %v7660_v18 = vld [vmem:[#allocation47_spill] sm:$0xff] }
 0x2bf   : > { %v5005_v11 = vpop.f32.mrb[22].mxu0  ;;  %v3826_v52 = vadd.f32 %v3825_v17, %v3824_v40  ;;  %v3951_v60 = vsel %vm948_vm2, %v3894_v48, 0.0  ;;  %v7659_v40 = vld [vmem:[#allocation50_spill] sm:$0xff] }
 0x2c0   : > { %v4836_v6 = vpop.f32.mrb[20].mxu1  ;;  %v3442_v61 = vpop.f32.mrb[23].mxu0  ;;  %v3946_v0 = vadd.f32 %v3945_v57, %v3944_v47  ;;  %3770 = vst.msk [vmem:[%s7070_s23 + $0x44] sm:$0xf] %vm3752_vm7, %v4339_v43  ;;  %v3947_v45 = vsel %vm948_vm2, %v3892_v9, 0.0  ;;  %v7661_v43 = vld [vmem:[#allocation49_spill] sm:$0xff] }
 0x2c1   : > { %v2235_v13 = vpop.f32.mrb[21].mxu1  ;;  %v5044_v30 = vadd.f32 %v5004_v56, %v4836_v6  ;;  %v3828_v24 = vadd.f32 %v3827_v19, %v3826_v52  ;;  %v7662_v9 = vld [vmem:[#allocation46_spill] sm:$0xff] }
 0x2c2   : > { %v4837_v16 = vpop.f32.mrb[22].mxu1  ;;  %v5045_v35 = vadd.f32 %v3439_v39, %v2235_v13  ;;  %v3948_v37 = vadd.f32 %v3947_v45, %v3946_v0 }
 0x2c3   : > { %v2238_v63 = vpop.f32.mrb[23].mxu1  ;;  %v5046_v12 = vadd.f32 %v5005_v11, %v4837_v16  ;;  %v3578_v36 = vmul.f32 %v5044_v30, %v7655_v27  ;;  %v3830_v15 = vadd.f32 %v3829_v21, %v3828_v24 }
 0x2c4   : > { %v5047_v58 = vadd.f32 %v3442_v61, %v2238_v63  ;;  %v3576_v25 = vmul.f32 %v5045_v35, %v7656_v50  ;;  %v3950_v14 = vadd.f32 %v3949_v33, %v3948_v37 }
 0x2c5   : > { %v3579_v26 = vmul.f32 %v5046_v12, %v7657_v34  ;;  %v4344_v51 = vpack.c.bf16 %v3578_v36, %v3578_v36  ;;  %v5008_v4 = vpop.f32.mrb[24].mxu0  ;;  %v3835_v38 = vsel %vm948_vm2, %v3578_v36, 0.0  ;;  %v3897_v8 = vmul.f32 %v3578_v36, %v3578_v36 }
 0x2c6   : > { %v3577_v10 = vmul.f32 %v5047_v58, %v7658_v22  ;;  %v4342_v49 = vpack.c.bf16 %v3576_v25, %v3576_v25  ;;  %v3831_v55 = vsel %vm948_vm2, %v3576_v25, 0.0  ;;  %v3895_v44 = vmul.f32 %v3576_v25, %v3576_v25  ;;  %v3455_v31 = vpop.f32.mrb[25].mxu0 }
 0x2c7   : > { %3775 = vst.msk [vmem:[%s7070_s23 + $0x58] sm:$0xf] %vm3752_vm7, %v4344_v51  ;;  %v4345_v20 = vpack.c.bf16 %v3579_v26, %v3579_v26  ;;  %v5009_v32 = vpop.f32.mrb[26].mxu0  ;;  %v3832_v59 = vadd.f32 %v3831_v55, %v3830_v15  ;;  %v3952_v3 = vadd.f32 %v3951_v60, %v3950_v14  ;;  %v3898_v39 = vmul.f32 %v3579_v26, %v3579_v26 }
 0x2c8   : > { %v4840_v7 = vpop.f32.mrb[24].mxu1  ;;  %3773 = vst.msk [vmem:[%s7070_s23 + $0x50] sm:$0xf] %vm3752_vm7, %v4342_v49  ;;  %v3953_v2 = vsel %vm948_vm2, %v3895_v44, 0.0  ;;  %v4343_v28 = vpack.c.bf16 %v3577_v10, %v3577_v10  ;;  %v3458_v62 = vpop.f32.mrb[27].mxu0  ;;  %v3833_v1 = vsel %vm948_vm2, %v3577_v10, 0.0  ;;  %v3896_v29 = vmul.f32 %v3577_v10, %v3577_v10 }
 0x2c9   : > { %v2251_v41 = vpop.f32.mrb[25].mxu1  ;;  %3776 = vst.msk [vmem:[%s7070_s23 + $0x5c] sm:$0xf] %vm3752_vm7, %v4345_v20  ;;  %v5048_v23 = vadd.f32 %v5008_v4, %v4840_v7  ;;  %v3954_v56 = vadd.f32 %v3953_v2, %v3952_v3  ;;  %v3834_v5 = vadd.f32 %v3833_v1, %v3832_v59  ;;  %v3957_v16 = vsel %vm948_vm2, %v3897_v8, 0.0  ;;  %v7664_v2 = vld [vmem:[#allocation55_spill] sm:$0xff]  ;;  %v7665_v1 = vld [vmem:[#allocation58_spill] sm:$0xff] }
 0x2ca   : > { %v4841_v46 = vpop.f32.mrb[26].mxu1  ;;  %3774 = vst.msk [vmem:[%s7070_s23 + $0x54] sm:$0xf] %vm3752_vm7, %v4343_v28  ;;  %v5049_v53 = vadd.f32 %v3455_v31, %v2251_v41  ;;  %v3955_v19 = vsel %vm948_vm2, %v3896_v29, 0.0  ;;  %v3837_v61 = vsel %vm948_vm2, %v3579_v26, 0.0  ;;  %v3959_v45 = vsel %vm948_vm2, %v3898_v39, 0.0 }
 0x2cb   : > { %v2254_v42 = vpop.f32.mrb[27].mxu1  ;;  %v5050_v6 = vadd.f32 %v5009_v32, %v4841_v46  ;;  %v3582_v57 = vmul.f32 %v5048_v23, %v7659_v40  ;;  %v3836_v13 = vadd.f32 %v3835_v38, %v3834_v5  ;;  %v3956_v11 = vadd.f32 %v3955_v19, %v3954_v56  ;;  %v7663_v38 = vld [vmem:[#allocation59_spill] sm:$0xff] }
 0x2cc   : > { %v5051_v54 = vadd.f32 %v3458_v62, %v2254_v42  ;;  %v3580_v47 = vmul.f32 %v5049_v53, %v7660_v18 }
 0x2cd   : > { %v3583_v17 = vmul.f32 %v5050_v6, %v7661_v43  ;;  %v4348_v52 = vpack.c.bf16 %v3582_v57, %v3582_v57  ;;  %v5012_v35 = vpop.f32.mrb[28].mxu0  ;;  %v3958_v63 = vadd.f32 %v3957_v16, %v3956_v11  ;;  %v3838_v48 = vadd.f32 %v3837_v61, %v3836_v13 }
 0x2ce   : > { %v3581_v30 = vmul.f32 %v5051_v54, %v7662_v9  ;;  %v4346_v0 = vpack.c.bf16 %v3580_v47, %v3580_v47  ;;  %v3839_v12 = vsel %vm948_vm2, %v3580_v47, 0.0  ;;  %v3471_v24 = vpop.f32.mrb[29].mxu0  ;;  %v3843_v27 = vsel %vm948_vm2, %v3582_v57, 0.0 }
 0x2cf   : > { %3779 = vst.msk [vmem:[%s7070_s23 + $0x68] sm:$0xf] %vm3752_vm7, %v4348_v52  ;;  %v3899_v36 = vmul.f32 %v3580_v47, %v3580_v47  ;;  %v4349_v50 = vpack.c.bf16 %v3583_v17, %v3583_v17  ;;  %v5013_v37 = vpop.f32.mrb[30].mxu0  ;;  %v3901_v34 = vmul.f32 %v3582_v57, %v3582_v57  ;;  %v3840_v26 = vadd.f32 %v3839_v12, %v3838_v48  ;;  %v7666_v47 = vld [vmem:[#allocation54_spill] sm:$0xff] }
 0x2d0   : > { %v4844_v58 = vpop.f32.mrb[28].mxu1  ;;  %3777 = vst.msk [vmem:[%s7070_s23 + $0x60] sm:$0xf] %vm3752_vm7, %v4346_v0  ;;  %v3960_v22 = vadd.f32 %v3959_v45, %v3958_v63  ;;  %v4347_v10 = vpack.c.bf16 %v3581_v30, %v3581_v30  ;;  %v3474_v21 = vpop.f32.mrb[31].mxu0  ;;  %v3841_v49 = vsel %vm948_vm2, %v3581_v30, 0.0  ;;  %v3900_v4 = vmul.f32 %v3581_v30, %v3581_v30  ;;  %v7667_v45 = vld [vmem:[#allocation67_spill] sm:$0xff] }
 0x2d1   : > { %v2267_v25 = vpop.f32.mrb[29].mxu1  ;;  %v3961_v51 = vsel %vm948_vm2, %v3899_v36, 0.0  ;;  %3780 = vst.msk [vmem:[%s7070_s23 + $0x6c] sm:$0xf] %vm3752_vm7, %v4349_v50  ;;  %v5052_v14 = vadd.f32 %v5012_v35, %v4844_v58  ;;  %v3902_v44 = vmul.f32 %v3583_v17, %v3583_v17  ;;  %v3842_v7 = vadd.f32 %v3841_v49, %v3840_v26  ;;  %v7668_v36 = vld [vmem:[#allocation64_spill] sm:$0xff] }
 0x2d2   : > { %v4845_v33 = vpop.f32.mrb[30].mxu1  ;;  %v3962_v55 = vadd.f32 %v3961_v51, %v3960_v22  ;;  %3778 = vst.msk [vmem:[%s7070_s23 + $0x64] sm:$0xf] %vm3752_vm7, %v4347_v10  ;;  %v5053_v31 = vadd.f32 %v3471_v24, %v2267_v25  ;;  %v3963_v60 = vsel %vm948_vm2, %v3900_v4, 0.0  ;;  %v3965_v46 = vsel %vm948_vm2, %v3901_v34, 0.0  ;;  %v7669_v34 = vld [vmem:[#allocation66_spill] sm:$0xff] }
 0x2d3   : > { %v2270_v15 = vpop.f32.mrb[31].mxu1  ;;  %v3586_v20 = vmul.f32 %v5052_v14, %v7663_v38  ;;  %v5054_v41 = vadd.f32 %v5013_v37, %v4845_v33  ;;  %v3844_v59 = vadd.f32 %v3843_v27, %v3842_v7  ;;  %v3845_v62 = vsel %vm948_vm2, %v3583_v17, 0.0 }
 0x2d4   : > { %v5055_v32 = vadd.f32 %v3474_v21, %v2270_v15  ;;  %v3964_v3 = vadd.f32 %v3963_v60, %v3962_v55  ;;  %v3584_v28 = vmul.f32 %v5053_v31, %v7664_v2  ;;  %v3967_v19 = vsel %vm948_vm2, %v3902_v44, 0.0 }
 0x2d5   : > { %v4352_v8 = vpack.c.bf16 %v3586_v20, %v3586_v20  ;;  %v3587_v29 = vmul.f32 %v5054_v41, %v7665_v1  ;;  %v5016_v23 = vpop.f32.mrb[32].mxu0  ;;  %v3846_v5 = vadd.f32 %v3845_v62, %v3844_v59  ;;  %v3905_v63 = vmul.f32 %v3586_v20, %v3586_v20 }
 0x2d6   : > { %v3966_v42 = vadd.f32 %v3965_v46, %v3964_v3  ;;  %v4350_v56 = vpack.c.bf16 %v3584_v28, %v3584_v28  ;;  %v3847_v53 = vsel %vm948_vm2, %v3584_v28, 0.0  ;;  %v3487_v39 = vpop.f32.mrb[33].mxu0  ;;  %v3903_v40 = vmul.f32 %v3584_v28, %v3584_v28  ;;  %v7670_v3 = vld [vmem:[#allocation63_spill] sm:$0xff] }
 0x2d7   : > { %3783 = vst.msk [vmem:[%s7070_s23 + $0x78] sm:$0xf] %vm3752_vm7, %v4352_v8  ;;  %v4353_v57 = vpack.c.bf16 %v3587_v29, %v3587_v29  ;;  %v5017_v13 = vpop.f32.mrb[34].mxu0  ;;  %v3848_v11 = vadd.f32 %v3847_v53, %v3846_v5  ;;  %v3585_v43 = vmul.f32 %v5055_v32, %v7666_v47  ;;  %v3851_v25 = vsel %vm948_vm2, %v3586_v20, 0.0 }
 0x2d8   : > { %v4848_v6 = vpop.f32.mrb[32].mxu1  ;;  %3781 = vst.msk [vmem:[%s7070_s23 + $0x70] sm:$0xf] %vm3752_vm7, %v4350_v56  ;;  %v3968_v18 = vadd.f32 %v3967_v19, %v3966_v42  ;;  %v3490_v16 = vpop.f32.mrb[35].mxu0  ;;  %v3969_v61 = vsel %vm948_vm2, %v3903_v40, 0.0  ;;  %v3906_v37 = vmul.f32 %v3587_v29, %v3587_v29  ;;  %v3853_v49 = vsel %vm948_vm2, %v3587_v29, 0.0 }
 0x2d9   : > { %v2283_v54 = vpop.f32.mrb[33].mxu1  ;;  %3784 = vst.msk [vmem:[%s7070_s23 + $0x7c] sm:$0xf] %vm3752_vm7, %v4353_v57  ;;  %v5056_v52 = vadd.f32 %v5016_v23, %v4848_v6  ;;  %v4351_v48 = vpack.c.bf16 %v3585_v43, %v3585_v43  ;;  %v3849_v12 = vsel %vm948_vm2, %v3585_v43, 0.0  ;;  %v3904_v24 = vmul.f32 %v3585_v43, %v3585_v43  ;;  %v7671_v19 = vld [vmem:[#allocation74_spill] sm:$0xff]  ;;  %v7672_v57 = vld [vmem:[#allocation72_spill] sm:$0xff] }
 0x2da   : > { %v4849_v17 = vpop.f32.mrb[34].mxu1  ;;  %v5057_v9 = vadd.f32 %v3487_v39, %v2283_v54  ;;  %v3970_v0 = vadd.f32 %v3969_v61, %v3968_v18  ;;  %v3850_v58 = vadd.f32 %v3849_v12, %v3848_v11  ;;  %v3973_v7 = vsel %vm948_vm2, %v3905_v63, 0.0 }
 0x2db   : > { %v5058_v30 = vadd.f32 %v5017_v13, %v4849_v17  ;;  %v2286_v35 = vpop.f32.mrb[35].mxu1  ;;  %v3590_v27 = vmul.f32 %v5056_v52, %v7667_v45  ;;  %3782 = vst.msk [vmem:[%s7070_s23 + $0x74] sm:$0xf] %vm3752_vm7, %v4351_v48  ;;  %v3971_v33 = vsel %vm948_vm2, %v3904_v24, 0.0  ;;  %v3975_v32 = vsel %vm948_vm2, %v3906_v37, 0.0  ;;  %v7673_v48 = vld [vmem:[#allocation71_spill] sm:$0xff] }
 0x2dc   : > { %v3588_v50 = vmul.f32 %v5057_v9, %v7668_v36  ;;  %v5059_v22 = vadd.f32 %v3490_v16, %v2286_v35  ;;  %v3852_v10 = vadd.f32 %v3851_v25, %v3850_v58  ;;  %v3972_v4 = vadd.f32 %v3971_v33, %v3970_v0 }
 0x2dd   : > { %v3591_v26 = vmul.f32 %v5058_v30, %v7669_v34  ;;  %v4356_v21 = vpack.c.bf16 %v3590_v27, %v3590_v27  ;;  %v5020_v51 = vpop.f32.mrb[36].mxu0  ;;  %v3909_v42 = vmul.f32 %v3590_v27, %v3590_v27  ;;  %v3859_v13 = vsel %vm948_vm2, %v3590_v27, 0.0 }
 0x2de   : > { %v4354_v14 = vpack.c.bf16 %v3588_v50, %v3588_v50  ;;  %v3855_v15 = vsel %vm948_vm2, %v3588_v50, 0.0  ;;  %v3503_v44 = vpop.f32.mrb[37].mxu0  ;;  %v3854_v31 = vadd.f32 %v3853_v49, %v3852_v10  ;;  %v3907_v60 = vmul.f32 %v3588_v50, %v3588_v50 }
 0x2df   : > { %3787 = vst.msk [vmem:[%s7070_s23 + $0x88] sm:$0xf] %vm3752_vm7, %v4356_v21  ;;  %v4357_v38 = vpack.c.bf16 %v3591_v26, %v3591_v26  ;;  %v5021_v41 = vpop.f32.mrb[38].mxu0  ;;  %v3974_v59 = vadd.f32 %v3973_v7, %v3972_v4  ;;  %v3589_v2 = vmul.f32 %v5059_v22, %v7670_v3  ;;  %v3910_v18 = vmul.f32 %v3591_v26, %v3591_v26 }
 0x2e0   : > { %v4852_v55 = vpop.f32.mrb[36].mxu1  ;;  %3785 = vst.msk [vmem:[%s7070_s23 + $0x80] sm:$0xf] %vm3752_vm7, %v4354_v14  ;;  %v3506_v46 = vpop.f32.mrb[39].mxu0  ;;  %v3856_v62 = vadd.f32 %v3855_v15, %v3854_v31  ;;  %v3977_v8 = vsel %vm948_vm2, %v3907_v60, 0.0  ;;  %v3861_v61 = vsel %vm948_vm2, %v3591_v26, 0.0 }
 0x2e1   : > { %v2299_v20 = vpop.f32.mrb[37].mxu1  ;;  %3788 = vst.msk [vmem:[%s7070_s23 + $0x8c] sm:$0xf] %vm3752_vm7, %v4357_v38  ;;  %v5060_v1 = vadd.f32 %v5020_v51, %v4852_v55  ;;  %v3976_v56 = vadd.f32 %v3975_v32, %v3974_v59  ;;  %v4355_v5 = vpack.c.bf16 %v3589_v2, %v3589_v2  ;;  %v3857_v53 = vsel %vm948_vm2, %v3589_v2, 0.0 }
 0x2e2   : > { %v4853_v28 = vpop.f32.mrb[38].mxu1  ;;  %v5061_v29 = vadd.f32 %v3503_v44, %v2299_v20  ;;  %v3858_v6 = vadd.f32 %v3857_v53, %v3856_v62  ;;  %v3908_v39 = vmul.f32 %v3589_v2, %v3589_v2  ;;  %v3981_v35 = vsel %vm948_vm2, %v3909_v42, 0.0 }
 0x2e3   : > { %v2302_v23 = vpop.f32.mrb[39].mxu1  ;;  %v3594_v40 = vmul.f32 %v5060_v1, %v7671_v19  ;;  %v3978_v11 = vadd.f32 %v3977_v8, %v3976_v56  ;;  %3786 = vst.msk [vmem:[%s7070_s23 + $0x84] sm:$0xf] %vm3752_vm7, %v4355_v5  ;;  %v3983_v58 = vsel %vm948_vm2, %v3910_v18, 0.0 }
 0x2e4   : > { %v3592_v54 = vmul.f32 %v5061_v29, %v7672_v57  ;;  %v5062_v47 = vadd.f32 %v3506_v46, %v2302_v23  ;;  %v3860_v43 = vadd.f32 %v3859_v13, %v3858_v6  ;;  %v3979_v17 = vsel %vm948_vm2, %v3908_v39, 0.0 }
 0x2e5   : > { %v4360_v16 = vpack.c.bf16 %v3594_v40, %v3594_v40  ;;  %v3980_v52 = vadd.f32 %v3979_v17, %v3978_v11  ;;  %v3913_v34 = vmul.f32 %v3594_v40, %v3594_v40  ;;  %v3867_v22 = vsel %vm948_vm2, %v3594_v40, 0.0 }
 0x2e6   : > { %v4358_v9 = vpack.c.bf16 %v3592_v54, %v3592_v54  ;;  %v3863_v30 = vsel %vm948_vm2, %v3592_v54, 0.0  ;;  %v3862_v63 = vadd.f32 %v3861_v61, %v3860_v43  ;;  %v3911_v0 = vmul.f32 %v3592_v54, %v3592_v54 }
 0x2e7   : > { %3791 = vst.msk [vmem:[%s7070_s23 + $0x98] sm:$0xf] %vm3752_vm7, %v4360_v16  ;;  %v3593_v12 = vmul.f32 %v5062_v47, %v7673_v48  ;;  %v3982_v24 = vadd.f32 %v3981_v35, %v3980_v52  ;;  %v3989_v49 = vsel %vm948_vm2, %v3913_v34, 0.0 }
 0x2e8   : > { %3789 = vst.msk [vmem:[%s7070_s23 + $0x90] sm:$0xf] %vm3752_vm7, %v4358_v9  ;;  %v3864_v45 = vadd.f32 %v3863_v30, %v3862_v63  ;;  %v3985_v27 = vsel %vm948_vm2, %v3911_v0, 0.0 }
 0x2e9   : > { %v4359_v36 = vpack.c.bf16 %v3593_v12, %v3593_v12  ;;  %v3865_v50 = vsel %vm948_vm2, %v3593_v12, 0.0  ;;  %v3984_v25 = vadd.f32 %v3983_v58, %v3982_v24  ;;  %v3912_v37 = vmul.f32 %v3593_v12, %v3593_v12 }
 0x2ea   : > { %v3866_v26 = vadd.f32 %v3865_v50, %v3864_v45 }
 0x2eb   : > { %3790 = vst.msk [vmem:[%s7070_s23 + $0x94] sm:$0xf] %vm3752_vm7, %v4359_v36  ;;  %v3986_v10 = vadd.f32 %v3985_v27, %v3984_v25  ;;  %v3987_v33 = vsel %vm948_vm2, %v3912_v37, 0.0 }
 0x2ec   : > { %v3868_v21 = vadd.f32 %v3867_v22, %v3866_v26 }
 0x2ed   : > { %v3988_v51 = vadd.f32 %v3987_v33, %v3986_v10 }
 0x2ee   : > { %v3869_v60 = vrot.slane %v3868_v21, 4 }
 0x2ef   : > { %v3990_v4 = vadd.f32 %v3989_v49, %v3988_v51 }
 0x2f0   : > { %v3870_v38 = vadd.f32 %v3869_v60, %v3868_v21 }
 0x2f1   : > { %v3991_v14 = vrot.slane %v3990_v4, 4 }
 0x2f2   : > { %v3871_v20 = vrot.slane %v3870_v38, 2 }
 0x2f3   : > { %v3992_v15 = vadd.f32 %v3991_v14, %v3990_v4 }
 0x2f4   : > { %v3872_v41 = vadd.f32 %v3871_v20, %v3870_v38 }
 0x2f5   : > { %v3993_v55 = vrot.slane %v3992_v15, 2 }
 0x2f6   : > { %v3873_v32 = vrot.slane %v3872_v41, 1 }
 0x2f7   : > { %v3994_v44 = vadd.f32 %v3993_v55, %v3992_v15 }
 0x2f8   : > { %v3874_v59 = vadd.f32 %v3873_v32, %v3872_v41 }
 0x2f9   : > { %v3995_v7 = vrot.slane %v3994_v44, 1 }
 0x2fb   : > { %v3996_v31 = vadd.f32 %v3995_v7, %v3994_v44 }
 0x2fd   : > { %3998 = vrot.lane.b32.xlu1 %v3996_v31, %s5380_s15 }
 0x36f   : > { %v3999_v3 = vpop.permute.xlu1 %3998 }
 0x370   : > { %v4001_v2 = vsel %vm948_vm2, %v3874_v59, %v3999_v3 }
 0x371   : > { %4003 = vst.msk [vmem:[%s260_s27] sm:$0x1] %vm4002_vm8, %v4001_v2 }
 0x372 PF: > { %s17_s21 = sadd.s32 1, %s5375_s21  }
 0x373   : > { %p14_p4 = scmp.ge.s32.totalorder %s17_s21, 4  }
 0x375   :  { %16 = sbr.rel (!%p14_p4) target bundleno = 1 (0x1), region = 90 }

</bundles_post_ra>
